<compile_context>
chip_gen: v5e
topology: v5e:2x2
jax: 0.10.0
libtpu: 0.0.40
codegen_flags: <defaults>
</compile_context>

<pallas_src>
import functools

import jax
import jax.numpy as jnp
import numpy as np
from jax.experimental import pallas as pl
from jax.experimental.pallas import tpu as pltpu

_SLOPE = 0.2
_EPS = 1e-5
_BLOCK_BUDGET = 20 << 20      # target live block bytes per grid step
_VMEM_FLOOR = 16 << 20
_VMEM_CAP = 56 << 20          # stay below v7x's 64 MiB physical VMEM


def _vmem_limit(need_bytes):
    return int(min(_VMEM_CAP, max(_VMEM_FLOOR, 2 * need_bytes + (4 << 20))))


def _pick_tn(cout, k_rows):
    """Cout tile: keep the whole weight block VMEM-resident when it is small."""
    if k_rows * cout * 2 <= (8 << 20):
        return cout
    for tn in (512, 256, 128):
        if cout % tn == 0 and k_rows * tn * 2 <= (8 << 20):
            return tn
    return 128 if cout % 128 == 0 else cout


def _pick_batch_block(n, m_rows, bytes_fn, row_cap=2048):
    """Largest per-step image count b | n with aligned blocks that fit VMEM."""
    fallback = None
    for b in range(n, 0, -1):
        if n % b:
            continue
        if not (b == n or (b * m_rows) % 8 == 0):
            continue
        fallback = b                       # smallest valid b seen so far
        if b * m_rows <= row_cap and bytes_fn(b) <= _BLOCK_BUDGET:
            return b
    return fallback if fallback is not None else n


def _pick_row_block(total_rows, row_bytes, cap=4096):
    for d in range(min(total_rows, cap), 0, -1):
        if total_rows % d:
            continue
        if d != total_rows and d % 8:
            continue
        if d * row_bytes <= _BLOCK_BUDGET:
            return d
    return total_rows


# ----------------------------------------------------------------------------
# Pallas kernels
# ----------------------------------------------------------------------------
def _conv_kernel(x_ref, w_ref, b_ref, *rest, taps, ho, rows, act, slope,
                 want_stats):
    """One (batch-block, Cout-tile) grid step: conv-as-matmul, fused epilogue.

    Fused-slab path (taps is a list of (tap_idx, row_offset)):
      x_ref : (b, Q, wo, cin)  pre-rearranged slab (bf16); each tap is a
              major-dim slice + layout-trivial reshape -> (rows, cin) matmul.
      w_ref : (k*k, cin, tn)   per-tap weight slices (bf16)
    im2col path (taps is None):
      x_ref : (rows, K) patch matrix (bf16);  w_ref : (K, tn)  -> one matmul.
    b_ref  : (1, tn) bias (f32)
    outputs: o_ref (rows, tn); optional channel sum / sum-of-squares (1, 1, tn)
    scratch: acc_ref (rows, tn) f32 accumulator (MXU accumulation path).
    """
    if want_stats:
        o_ref, sum_ref, sq_ref, acc_ref = rest
    else:
        o_ref, acc_ref = rest

    if taps is None:
        acc_ref[...] = jnp.dot(x_ref[...], w_ref[...],
                               preferred_element_type=jnp.float32)
    else:
        cin = w_ref.shape[-2]
        for i, (t, r0) in enumerate(taps):
            patch = x_ref[:, r0:r0 + ho, :, :].reshape(rows, cin)
            prod = jnp.dot(patch, w_ref[t], preferred_element_type=jnp.float32)
            if i == 0:
                acc_ref[...] = prod
            else:
                acc_ref[...] += prod

    acc = acc_ref[...] + b_ref[...]

    if want_stats:   # BatchNorm batch statistics on the pre-activation output
        sum_ref[0] = jnp.sum(acc, axis=0, keepdims=True)
        sq_ref[0] = jnp.sum(acc * acc, axis=0, keepdims=True)

    if act == "leaky":
        acc = jnp.where(acc >= 0.0, acc, slope * acc)
    elif act == "sigmoid":
        acc = 1.0 / (1.0 + jnp.exp(-acc))      # exact (final probability head)
    o_ref[...] = acc.astype(o_ref.dtype)


def _bn_leaky_kernel(y_ref, scale_ref, shift_ref, o_ref, *, slope):
    """Row-blocked BN apply (precomputed scale/shift) + LeakyReLU."""
    y = y_ref[...].astype(jnp.float32) * scale_ref[...] + shift_ref[...]
    o_ref[...] = jnp.where(y >= 0.0, y, slope * y).astype(o_ref.dtype)


# ----------------------------------------------------------------------------
# Wrappers
# ----------------------------------------------------------------------------
def _im2col_xla(x_nhwc, k, s, p):
    """XLA-side im2col (first merged conv and non-sublane-aligned tiny maps)."""
    n, h, w, c = x_nhwc.shape
    xp = jnp.pad(x_nhwc, ((0, 0), (p, p), (p, p), (0, 0)))
    ho = (h + 2 * p - k) // s + 1
    wo = (w + 2 * p - k) // s + 1
    cols = [xp[:, kh:kh + s * ho:s, kw:kw + s * wo:s, :]
            for kh in range(k) for kw in range(k)]
    pat = jnp.stack(cols, axis=3)                     # (n, ho, wo, k*k, c)
    return pat.reshape(n * ho * wo, k * k * c), ho, wo


def _s2d_expand(x_nhwc, k, s, p, ho, wo):
    """Pad + space-to-depth + width-shift expansion.

    Output (n, s*s*ndw*hs, wo, cin): every conv tap becomes a contiguous slice
    of the second (untiled, major) dim inside the kernel -> no per-tap VMEM
    relayout copies.  Duplication factor is only ndw (=2 for 4x4 stride-2
    convs) versus k*k for full im2col.
    """
    n, h, w, c = x_nhwc.shape
    nh = (k - 1) // s + 1
    ndw = (k - 1) // s + 1
    hs = ho + nh - 1
    ws = wo + ndw - 1
    xp = jnp.pad(x_nhwc, ((0, 0), (p, s * hs - h - p),
                          (p, s * ws - w - p), (0, 0)))
    xr = xp.reshape(n, hs, s, ws, s, c).transpose(0, 2, 4, 1, 3, 5)
    slabs = jnp.stack([xr[:, :, :, :, dw:dw + wo, :] for dw in range(ndw)],
                      axis=3)                         # (n, s, s, ndw, hs, wo, c)
    return slabs.reshape(n, s * s * ndw * hs, wo, c), hs, ndw


def conv_block(x_nhwc, w_oihw, bias, *, stride, pad, act="none",
               want_stats=False, out_dtype=jnp.bfloat16):
    """act(conv2d(x, w) + b); returns y2d of shape (n*ho*wo, cout)."""
    n, h, w, cin = x_nhwc.shape
    cout, cin2, k, _ = w_oihw.shape
    assert cin == cin2
    s, p = stride, pad
    ho = (h + 2 * p - k) // s + 1
    wo = (w + 2 * p - k) // s + 1
    m_rows = ho * wo

    # OIHW -> tap-major (k*k, Cin, Cout), bf16 for the MXU.
    w_taps = jnp.transpose(w_oihw, (2, 3, 1, 0)).reshape(k * k, cin, cout)
    w_taps = w_taps.astype(jnp.bfloat16)
    bias2d = bias.reshape(1, cout).astype(jnp.float32)

    k_rows = k * k * cin
    use_fused = (wo % 8 == 0) and (k_rows >= 512)

    if use_fused:
        xq, hs, ndw = _s2d_expand(x_nhwc.astype(jnp.bfloat16), k, s, p, ho, wo)
        q_rows = xq.shape[1]
        taps = []
        for kh in range(k):
            for kw in range(k):
                a, b2, dh, dw = kh % s, kw % s, kh // s, kw // s
                taps.append((kh * k + kw, ((a * s + b2) * ndw + dw) * hs + dh))
        tn = _pick_tn(cout, k_rows)
        x_bytes = lambda b: b * q_rows * wo * cin * 2
        w_bytes = k * k * cin * tn * 2
        wk = w_taps
        x_arg = xq
    else:
        x2d, _, _ = _im2col_xla(x_nhwc, k, s, p)
        x2d = x2d.astype(jnp.bfloat16)
        taps = None
        tn = _pick_tn(cout, k_rows)
        x_bytes = lambda b: b * m_rows * k_rows * 2
        w_bytes = k_rows * tn * 2
        wk = w_taps.reshape(k_rows, cout)
        x_arg = x2d

    out_b = jnp.dtype(out_dtype).itemsize

    def need_bytes(b):
        rows = b * m_rows
        return (2 * x_bytes(b) + 2 * w_bytes + 2 * rows * tn * out_b
                + rows * tn * 4 + (4 * tn * 4 if want_stats else 0)
                + 2 * tn * 4)

    bblk = _pick_batch_block(n, m_rows, need_bytes)
    rows = bblk * m_rows
    grid = (n // bblk, cout // tn)

    kern = functools.partial(_conv_kernel, taps=taps, ho=ho, rows=rows,
                             act=act, slope=_SLOPE, want_stats=want_stats)

    if use_fused:
        x_spec = pl.BlockSpec((bblk, q_rows, wo, cin), lambda i, j: (i, 0, 0, 0))
        w_spec = pl.BlockSpec((k * k, cin, tn), lambda i, j: (0, 0, j))
    else:
        x_spec = pl.BlockSpec((rows, k_rows), lambda i, j: (i, 0))
        w_spec = pl.BlockSpec((k_rows, tn), lambda i, j: (0, j))

    out_shape = [jax.ShapeDtypeStruct((n * m_rows, cout), out_dtype)]
    out_specs = [pl.BlockSpec((rows, tn), lambda i, j: (i, j))]
    if want_stats:
        out_shape += [jax.ShapeDtypeStruct((n // bblk, 1, cout), jnp.float32)] * 2
        out_specs += [pl.BlockSpec((1, 1, tn), lambda i, j: (i, 0, j))] * 2

    res = pl.pallas_call(
        kern,
        grid=grid,
        in_specs=[x_spec, w_spec, pl.BlockSpec((1, tn), lambda i, j: (0, j))],
        out_specs=out_specs,
        out_shape=out_shape,
        scratch_shapes=[pltpu.VMEM((rows, tn), jnp.float32)],
        compiler_params=pltpu.CompilerParams(
            dimension_semantics=("parallel", "parallel"),
            vmem_limit_bytes=_vmem_limit(need_bytes(bblk))),
    )(x_arg, wk, bias2d)

    if want_stats:
        y, ssum, ssq = res
        return y, ssum, ssq, ho, wo
    return res[0], ho, wo


def bn_apply_leaky(y2d, scale, shift):
    """BatchNorm apply (scale/shift precomputed) + LeakyReLU, row-blocked."""
    rows, c = y2d.shape
    rb = _pick_row_block(rows, c * 12)   # 2x in + 2x out (bf16) + f32 temp
    return pl.pallas_call(
        functools.partial(_bn_leaky_kernel, slope=_SLOPE),
        grid=(rows // rb,),
        in_specs=[
            pl.BlockSpec((rb, c), lambda i: (i, 0)),
            pl.BlockSpec((1, c), lambda i: (0, 0)),
            pl.BlockSpec((1, c), lambda i: (0, 0)),
        ],
        out_specs=pl.BlockSpec((rb, c), lambda i: (i, 0)),
        out_shape=jax.ShapeDtypeStruct((rows, c), jnp.bfloat16),
        compiler_params=pltpu.CompilerParams(
            dimension_semantics=("parallel",),
            vmem_limit_bytes=_vmem_limit(rb * c * 12)),
    )(y2d, scale.reshape(1, c).astype(jnp.float32),
      shift.reshape(1, c).astype(jnp.float32))


# ----------------------------------------------------------------------------
# Discriminator: parameters + forward
# ----------------------------------------------------------------------------
def init_discriminator_params(key, input_dim, label_dim, num_filters, output_dim):
    def conv_init(k, cout, cin, ksz):
        w = 0.02 * jax.random.normal(k, (cout, cin, ksz, ksz), jnp.float32)
        b = jnp.zeros((cout,), jnp.float32)
        return w, b

    keys = jax.random.split(key, len(num_filters) + 2)
    half = num_filters[0] // 2
    params = {
        "input_conv": conv_init(keys[0], half, input_dim, 4),
        "label_conv": conv_init(keys[1], half, label_dim, 4),
        "hidden": [],
    }
    for i in range(1, len(num_filters)):
        w, b = conv_init(keys[1 + i], num_filters[i], num_filters[i - 1], 4)
        gamma = jnp.ones((num_filters[i],), jnp.float32)
        beta = jnp.zeros((num_filters[i],), jnp.float32)
        params["hidden"].append((w, b, gamma, beta))
    params["out_conv"] = conv_init(keys[-1], output_dim, num_filters[-1], 4)
    return params


def discriminator_forward(params, z_nchw, c_nchw):
    # NCHW (PyTorch) -> NHWC for the kernels.
    z = jnp.transpose(z_nchw, (0, 2, 3, 1))
    c = jnp.transpose(c_nchw, (0, 2, 3, 1))
    x = jnp.concatenate([z, c], axis=-1)              # (N, H, W, in+label)
    n = x.shape[0]

    # Merge the two first-layer convs into one conv over the channel-concat
    # input with a block-diagonal weight (identical math to
    # torch.cat([conv(z), conv(c)], 1)); routed through the im2col path so the
    # MXU sees a single K = k*k*(in+label) contraction.
    w_in, b_in = params["input_conv"]
    w_lb, b_lb = params["label_conv"]
    half, in_dim = w_in.shape[0], w_in.shape[1]
    lb_dim = w_lb.shape[1]
    wm = jnp.zeros((2 * half, in_dim + lb_dim, 4, 4), jnp.float32)
    wm = wm.at[:half, :in_dim].set(w_in)
    wm = wm.at[half:, in_dim:].set(w_lb)
    bm = jnp.concatenate([b_in, b_lb])

    cur, ch, cw = conv_block(x, wm, bm, stride=2, pad=1, act="leaky")
    cch = 2 * half

    for (wgt, bias, gamma, beta) in params["hidden"]:
        cout = wgt.shape[0]
        xin = cur.reshape(n, ch, cw, cch)
        y, ssum, ssq, ho, wo = conv_block(xin, wgt, bias, stride=2, pad=1,
                                          act="none", want_stats=True)
        cnt = n * ho * wo
        mean = jnp.sum(ssum, axis=(0, 1)) / cnt
        var = jnp.maximum(jnp.sum(ssq, axis=(0, 1)) / cnt - mean * mean, 0.0)
        scale = gamma * jax.lax.rsqrt(var + _EPS)
        shift = beta - mean * scale
        cur = bn_apply_leaky(y, scale, shift)
        # TODO(synk): fold scale/shift + LeakyReLU + next-layer s2d rearrange
        # into adjacent kernels to drop the extra HBM pass (biggest on v5e).
        ch, cw, cch = ho, wo, cout

    w_o, b_o = params["out_conv"]
    xin = cur.reshape(n, ch, cw, cch)
    out, ho, wo = conv_block(xin, w_o, b_o, stride=1, pad=0, act="sigmoid",
                             out_dtype=jnp.float32)
    out = out.reshape(n, ho, wo, -1)
    return jnp.transpose(out, (0, 3, 1, 2))           # back to NCHW


# ----------------------------------------------------------------------------
# Pure-JAX reference (f32, for the correctness check)
# ----------------------------------------------------------------------------
def reference_forward(params, z_nchw, c_nchw):
    def conv(x, w, b, stride, pad):
        dn = jax.lax.conv_dimension_numbers(x.shape, w.shape, ("NCHW", "OIHW", "NCHW"))
        y = jax.lax.conv_general_dilated(
            x, w, (stride, stride), [(pad, pad), (pad, pad)],
            dimension_numbers=dn, precision=jax.lax.Precision.HIGHEST)
        return y + b.reshape(1, -1, 1, 1)

    leaky = lambda v: jnp.where(v >= 0, v, 0.2 * v)
    w, b = params["input_conv"]
    h1 = leaky(conv(z_nchw, w, b, 2, 1))
    w, b = params["label_conv"]
    h2 = leaky(conv(c_nchw, w, b, 2, 1))
    x = jnp.concatenate([h1, h2], axis=1)
    for (w, b, gamma, beta) in params["hidden"]:
        y = conv(x, w, b, 2, 1)
        mean = jnp.mean(y, axis=(0, 2, 3), keepdims=True)
        var = jnp.mean((y - mean) ** 2, axis=(0, 2, 3), keepdims=True)
        y = (y - mean) / jnp.sqrt(var + _EPS)
        y = y * gamma.reshape(1, -1, 1, 1) + beta.reshape(1, -1, 1, 1)
        x = leaky(y)
    w, b = params["out_conv"]
    return jax.nn.sigmoid(conv(x, w, b, 1, 0))


# ----------------------------------------------------------------------------
if __name__ == "__main__":
    key = jax.random.PRNGKey(0)
    # Scaled-down version of num_filters=[512, 256, 128] for a small test.
    input_dim, label_dim, output_dim = 3, 10, 1
    num_filters = [64, 32, 16]
    N, H, W = 2, 32, 32      # 32 -> 16 -> 8 -> 4 -> 1 (final k=4, s=1, p=0 conv)

    kp, kz, kc = jax.random.split(key, 3)
    params = init_discriminator_params(kp, input_dim, label_dim, num_filters,
                                       output_dim)
    z = jax.random.normal(kz, (N, input_dim, H, W), jnp.float32)
    c = jax.random.normal(kc, (N, label_dim, H, W), jnp.float32)

    out = jax.jit(discriminator_forward)(params, z, c)
    out = jax.block_until_ready(out)

    assert out.shape == (N, output_dim, 1, 1), out.shape
    ref = reference_forward(params, z, c)
    # bf16 activations/weights -> slightly looser tolerance.
    np.testing.assert_allclose(np.asarray(out), np.asarray(ref),
                               rtol=0.0, atol=3e-2)
    print("KERNEL_OK")
</pallas_src>

<mosaic_0001>
module attributes {stable_mosaic.version = 11 : i64} {
  func.func @_conv_kernel(%arg0: i32, %arg1: i32, %arg2: memref<512x208xbf16, #tpu.memory_space<vmem>>, %arg3: memref<208x64xbf16, #tpu.memory_space<vmem>>, %arg4: memref<1x64xf32, #tpu.memory_space<vmem>>, %arg5: memref<512x64xbf16, #tpu.memory_space<vmem>>, %arg6: memref<512x64xf32, #tpu.memory_space<vmem>>) attributes {dimension_semantics = [#tpu.dimension_semantics<parallel>, #tpu.dimension_semantics<parallel>], iteration_bounds = array<i64: 1, 1>, scalar_prefetch = 0 : i64, scratch_operands = 1 : i64, tpu.core_type = #tpu.core_type<tc>, window_params = [{transform_indices = @transform_0, window_bounds = array<i64: 512, 208>}, {transform_indices = @transform_1, window_bounds = array<i64: 208, 64>}, {transform_indices = @transform_2, window_bounds = array<i64: 1, 64>}, {transform_indices = @transform_3, window_bounds = array<i64: 512, 64>}]} {
    %c0 = arith.constant 0 : index
    %c0_0 = arith.constant 0 : index
    %0 = vector.load %arg2[%c0, %c0_0] : memref<512x208xbf16, #tpu.memory_space<vmem>>, vector<512x208xbf16>
    %c0_1 = arith.constant 0 : index
    %c0_2 = arith.constant 0 : index
    %1 = vector.load %arg3[%c0_1, %c0_2] : memref<208x64xbf16, #tpu.memory_space<vmem>>, vector<208x64xbf16>
    %cst = arith.constant dense<0.000000e+00> : vector<512x64xf32>
    %2 = tpu.matmul %0, %1, %cst {dimension_numbers = #tpu.dot_dimension_numbers<[1], [0], [0], [1], [0, 0, 1, 1], [], []>} : vector<512x208xbf16>, vector<208x64xbf16>, vector<512x64xf32> -> vector<512x64xf32>
    %c0_3 = arith.constant 0 : index
    %c0_4 = arith.constant 0 : index
    %3 = vector.load %arg6[%c0_3, %c0_4] : memref<512x64xf32, #tpu.memory_space<vmem>>, vector<512x64xf32>
    tpu.vector_store %arg6[%c0_3, %c0_4], %2 {strides = array<i32>} : memref<512x64xf32, #tpu.memory_space<vmem>>, vector<512x64xf32>,
    %c0_5 = arith.constant 0 : index
    %c0_6 = arith.constant 0 : index
    %4 = vector.load %arg6[%c0_5, %c0_6] : memref<512x64xf32, #tpu.memory_space<vmem>>, vector<512x64xf32>
    %c0_7 = arith.constant 0 : index
    %c0_8 = arith.constant 0 : index
    %5 = vector.load %arg4[%c0_7, %c0_8] : memref<1x64xf32, #tpu.memory_space<vmem>>, vector<1x64xf32>
    %6 = vector.broadcast %5 : vector<1x64xf32> to vector<512x64xf32>
    %7 = arith.addf %4, %6 : vector<512x64xf32>
    %cst_9 = arith.constant 0.000000e+00 : f32
    %8 = vector.broadcast %cst_9 : f32 to vector<512x64xf32>
    %9 = arith.cmpf oge, %7, %8 : vector<512x64xf32>
    %cst_10 = arith.constant 2.000000e-01 : f32
    %10 = vector.broadcast %cst_10 : f32 to vector<512x64xf32>
    %11 = arith.mulf %10, %7 : vector<512x64xf32>
    %12 = arith.select %9, %7, %11 : vector<512x64xi1>, vector<512x64xf32>
    %13 = arith.truncf %12 : vector<512x64xf32> to vector<512x64xbf16>
    %c0_11 = arith.constant 0 : index
    %c0_12 = arith.constant 0 : index
    %14 = vector.load %arg5[%c0_11, %c0_12] : memref<512x64xbf16, #tpu.memory_space<vmem>>, vector<512x64xbf16>
    tpu.vector_store %arg5[%c0_11, %c0_12], %13 {strides = array<i32>} : memref<512x64xbf16, #tpu.memory_space<vmem>>, vector<512x64xbf16>,
    return
  }
  func.func @transform_0(%arg0: i32, %arg1: i32) -> (i32, i32) {
    %c0_i32 = arith.constant 0 : i32
    %c0_i32_0 = arith.constant 0 : i32
    return %arg0, %c0_i32 : i32, i32
  }
  func.func @transform_1(%arg0: i32, %arg1: i32) -> (i32, i32) {
    %c0_i32 = arith.constant 0 : i32
    %c0_i32_0 = arith.constant 0 : i32
    return %c0_i32, %arg1 : i32, i32
  }
  func.func @transform_2(%arg0: i32, %arg1: i32) -> (i32, i32) {
    %c0_i32 = arith.constant 0 : i32
    %c0_i32_0 = arith.constant 0 : i32
    return %c0_i32, %arg1 : i32, i32
  }
  func.func @transform_3(%arg0: i32, %arg1: i32) -> (i32, i32) {
    %c0_i32 = arith.constant 0 : i32
    return %arg0, %arg1 : i32, i32
  }
}

module attributes {stable_mosaic.version = 11 : i64} {
  func.func @_conv_kernel(%arg0: i32, %arg1: i32, %arg2: memref<2x72x8x64xbf16, #tpu.memory_space<vmem>>, %arg3: memref<16x64x32xbf16, #tpu.memory_space<vmem>>, %arg4: memref<1x32xf32, #tpu.memory_space<vmem>>, %arg5: memref<128x32xbf16, #tpu.memory_space<vmem>>, %arg6: memref<1x1x32xf32, #tpu.memory_space<vmem>>, %arg7: memref<1x1x32xf32, #tpu.memory_space<vmem>>, %arg8: memref<128x32xf32, #tpu.memory_space<vmem>>) attributes {dimension_semantics = [#tpu.dimension_semantics<parallel>, #tpu.dimension_semantics<parallel>], iteration_bounds = array<i64: 1, 1>, scalar_prefetch = 0 : i64, scratch_operands = 1 : i64, tpu.core_type = #tpu.core_type<tc>, window_params = [{transform_indices = @transform_0, window_bounds = array<i64: 2, 72, 8, 64>}, {transform_indices = @transform_1, window_bounds = array<i64: 16, 64, 32>}, {transform_indices = @transform_2, window_bounds = array<i64: 1, 32>}, {transform_indices = @transform_3, window_bounds = array<i64: 128, 32>}, {transform_indices = @transform_4, window_bounds = array<i64: 1, 1, 32>}, {transform_indices = @transform_5, window_bounds = array<i64: 1, 1, 32>}]} {
    %c0 = arith.constant 0 : index
    %c0_0 = arith.constant 0 : index
    %c0_1 = arith.constant 0 : index
    %c0_2 = arith.constant 0 : index
    %0 = vector.load %arg2[%c0, %c0_0, %c0_1, %c0_2] : memref<2x72x8x64xbf16, #tpu.memory_space<vmem>>, vector<2x8x8x64xbf16>
    %1 = vector.shape_cast %0 : vector<2x8x8x64xbf16> to vector<128x64xbf16>
    %c0_3 = arith.constant 0 : index
    %c0_4 = arith.constant 0 : index
    %c0_5 = arith.constant 0 : index
    %2 = vector.load %arg3[%c0_3, %c0_4, %c0_5] : memref<16x64x32xbf16, #tpu.memory_space<vmem>>, vector<1x64x32xbf16>
    %3 = vector.shape_cast %2 : vector<1x64x32xbf16> to vector<64x32xbf16>
    %cst = arith.constant dense<0.000000e+00> : vector<128x32xf32>
    %4 = tpu.matmul %1, %3, %cst {dimension_numbers = #tpu.dot_dimension_numbers<[1], [0], [0], [1], [0, 0, 1, 1], [], []>} : vector<128x64xbf16>, vector<64x32xbf16>, vector<128x32xf32> -> vector<128x32xf32>
    %c0_6 = arith.constant 0 : index
    %c0_7 = arith.constant 0 : index
    %5 = vector.load %arg8[%c0_6, %c0_7] : memref<128x32xf32, #tpu.memory_space<vmem>>, vector<128x32xf32>
    tpu.vector_store %arg8[%c0_6, %c0_7], %4 {strides = array<i32>} : memref<128x32xf32, #tpu.memory_space<vmem>>, vector<128x32xf32>,
    %c0_8 = arith.constant 0 : index
    %c18 = arith.constant 18 : index
    %c0_9 = arith.constant 0 : index
    %c0_10 = arith.constant 0 : index
    %6 = vector.load %arg2[%c0_8, %c18, %c0_9, %c0_10] : memref<2x72x8x64xbf16, #tpu.memory_space<vmem>>, vector<2x8x8x64xbf16>
    %7 = vector.shape_cast %6 : vector<2x8x8x64xbf16> to vector<128x64xbf16>
    %c1 = arith.constant 1 : index
    %c0_11 = arith.constant 0 : index
    %c0_12 = arith.constant 0 : index
    %8 = vector.load %arg3[%c1, %c0_11, %c0_12] : memref<16x64x32xbf16, #tpu.memory_space<vmem>>, vector<1x64x32xbf16>
    %9 = vector.shape_cast %8 : vector<1x64x32xbf16> to vector<64x32xbf16>
    %cst_13 = arith.constant dense<0.000000e+00> : vector<128x32xf32>
    %10 = tpu.matmul %7, %9, %cst_13 {dimension_numbers = #tpu.dot_dimension_numbers<[1], [0], [0], [1], [0, 0, 1, 1], [], []>} : vector<128x64xbf16>, vector<64x32xbf16>, vector<128x32xf32> -> vector<128x32xf32>
    %c0_14 = arith.constant 0 : index
    %c0_15 = arith.constant 0 : index
    %11 = vector.load %arg8[%c0_14, %c0_15] : memref<128x32xf32, #tpu.memory_space<vmem>>, vector<128x32xf32>
    %12 = arith.addf %11, %10 : vector<128x32xf32>
    %c0_16 = arith.constant 0 : index
    %c0_17 = arith.constant 0 : index
    %13 = vector.load %arg8[%c0_16, %c0_17] : memref<128x32xf32, #tpu.memory_space<vmem>>, vector<128x32xf32>
    tpu.vector_store %arg8[%c0_16, %c0_17], %12 {strides = array<i32>} : memref<128x32xf32, #tpu.memory_space<vmem>>, vector<128x32xf32>,
    %c0_18 = arith.constant 0 : index
    %c9 = arith.constant 9 : index
    %c0_19 = arith.constant 0 : index
    %c0_20 = arith.constant 0 : index
    %14 = vector.load %arg2[%c0_18, %c9, %c0_19, %c0_20] : memref<2x72x8x64xbf16, #tpu.memory_space<vmem>>, vector<2x8x8x64xbf16>
    %15 = vector.shape_cast %14 : vector<2x8x8x64xbf16> to vector<128x64xbf16>
    %c2 = arith.constant 2 : index
    %c0_21 = arith.constant 0 : index
    %c0_22 = arith.constant 0 : index
    %16 = vector.load %arg3[%c2, %c0_21, %c0_22] : memref<16x64x32xbf16, #tpu.memory_space<vmem>>, vector<1x64x32xbf16>
    %17 = vector.shape_cast %16 : vector<1x64x32xbf16> to vector<64x32xbf16>
    %cst_23 = arith.constant dense<0.000000e+00> : vector<128x32xf32>
    %18 = tpu.matmul %15, %17, %cst_23 {dimension_numbers = #tpu.dot_dimension_numbers<[1], [0], [0], [1], [0, 0, 1, 1], [], []>} : vector<128x64xbf16>, vector<64x32xbf16>, vector<128x32xf32> -> vector<128x32xf32>
    %c0_24 = arith.constant 0 : index
    %c0_25 = arith.constant 0 : index
    %19 = vector.load %arg8[%c0_24, %c0_25] : memref<128x32xf32, #tpu.memory_space<vmem>>, vector<128x32xf32>
    %20 = arith.addf %19, %18 : vector<128x32xf32>
    %c0_26 = arith.constant 0 : index
    %c0_27 = arith.constant 0 : index
    %21 = vector.load %arg8[%c0_26, %c0_27] : memref<128x32xf32, #tpu.memory_space<vmem>>, vector<128x32xf32>
    tpu.vector_store %arg8[%c0_26, %c0_27], %20 {strides = array<i32>} : memref<128x32xf32, #tpu.memory_space<vmem>>, vector<128x32xf32>,
    %c0_28 = arith.constant 0 : index
    %c27 = arith.constant 27 : index
    %c0_29 = arith.constant 0 : index
    %c0_30 = arith.constant 0 : index
    %22 = vector.load %arg2[%c0_28, %c27, %c0_29, %c0_30] : memref<2x72x8x64xbf16, #tpu.memory_space<vmem>>, vector<2x8x8x64xbf16>
    %23 = vector.shape_cast %22 : vector<2x8x8x64xbf16> to vector<128x64xbf16>
    %c3 = arith.constant 3 : index
    %c0_31 = arith.constant 0 : index
    %c0_32 = arith.constant 0 : index
    %24 = vector.load %arg3[%c3, %c0_31, %c0_32] : memref<16x64x32xbf16, #tpu.memory_space<vmem>>, vector<1x64x32xbf16>
    %25 = vector.shape_cast %24 : vector<1x64x32xbf16> to vector<64x32xbf16>
    %cst_33 = arith.constant dense<0.000000e+00> : vector<128x32xf32>
    %26 = tpu.matmul %23, %25, %cst_33 {dimension_numbers = #tpu.dot_dimension_numbers<[1], [0], [0], [1], [0, 0, 1, 1], [], []>} : vector<128x64xbf16>, vector<64x32xbf16>, vector<128x32xf32> -> vector<128x32xf32>
    %c0_34 = arith.constant 0 : index
    %c0_35 = arith.constant 0 : index
    %27 = vector.load %arg8[%c0_34, %c0_35] : memref<128x32xf32, #tpu.memory_space<vmem>>, vector<128x32xf32>
    %28 = arith.addf %27, %26 : vector<128x32xf32>
    %c0_36 = arith.constant 0 : index
    %c0_37 = arith.constant 0 : index
    %29 = vector.load %arg8[%c0_36, %c0_37] : memref<128x32xf32, #tpu.memory_space<vmem>>, vector<128x32xf32>
    tpu.vector_store %arg8[%c0_36, %c0_37], %28 {strides = array<i32>} : memref<128x32xf32, #tpu.memory_space<vmem>>, vector<128x32xf32>,
    %c0_38 = arith.constant 0 : index
    %c36 = arith.constant 36 : index
    %c0_39 = arith.constant 0 : index
    %c0_40 = arith.constant 0 : index
    %30 = vector.load %arg2[%c0_38, %c36, %c0_39, %c0_40] : memref<2x72x8x64xbf16, #tpu.memory_space<vmem>>, vector<2x8x8x64xbf16>
    %31 = vector.shape_cast %30 : vector<2x8x8x64xbf16> to vector<128x64xbf16>
    %c4 = arith.constant 4 : index
    %c0_41 = arith.constant 0 : index
    %c0_42 = arith.constant 0 : index
    %32 = vector.load %arg3[%c4, %c0_41, %c0_42] : memref<16x64x32xbf16, #tpu.memory_space<vmem>>, vector<1x64x32xbf16>
    %33 = vector.shape_cast %32 : vector<1x64x32xbf16> to vector<64x32xbf16>
    %cst_43 = arith.constant dense<0.000000e+00> : vector<128x32xf32>
    %34 = tpu.matmul %31, %33, %cst_43 {dimension_numbers = #tpu.dot_dimension_numbers<[1], [0], [0], [1], [0, 0, 1, 1], [], []>} : vector<128x64xbf16>, vector<64x32xbf16>, vector<128x32xf32> -> vector<128x32xf32>
    %c0_44 = arith.constant 0 : index
    %c0_45 = arith.constant 0 : index
    %35 = vector.load %arg8[%c0_44, %c0_45] : memref<128x32xf32, #tpu.memory_space<vmem>>, vector<128x32xf32>
    %36 = arith.addf %35, %34 : vector<128x32xf32>
    %c0_46 = arith.constant 0 : index
    %c0_47 = arith.constant 0 : index
    %37 = vector.load %arg8[%c0_46, %c0_47] : memref<128x32xf32, #tpu.memory_space<vmem>>, vector<128x32xf32>
    tpu.vector_store %arg8[%c0_46, %c0_47], %36 {strides = array<i32>} : memref<128x32xf32, #tpu.memory_space<vmem>>, vector<128x32xf32>,
    %c0_48 = arith.constant 0 : index
    %c54 = arith.constant 54 : index
    %c0_49 = arith.constant 0 : index
    %c0_50 = arith.constant 0 : index
    %38 = vector.load %arg2[%c0_48, %c54, %c0_49, %c0_50] : memref<2x72x8x64xbf16, #tpu.memory_space<vmem>>, vector<2x8x8x64xbf16>
    %39 = vector.shape_cast %38 : vector<2x8x8x64xbf16> to vector<128x64xbf16>
    %c5 = arith.constant 5 : index
    %c0_51 = arith.constant 0 : index
    %c0_52 = arith.constant 0 : index
    %40 = vector.load %arg3[%c5, %c0_51, %c0_52] : memref<16x64x32xbf16, #tpu.memory_space<vmem>>, vector<1x64x32xbf16>
    %41 = vector.shape_cast %40 : vector<1x64x32xbf16> to vector<64x32xbf16>
    %cst_53 = arith.constant dense<0.000000e+00> : vector<128x32xf32>
    %42 = tpu.matmul %39, %41, %cst_53 {dimension_numbers = #tpu.dot_dimension_numbers<[1], [0], [0], [1], [0, 0, 1, 1], [], []>} : vector<128x64xbf16>, vector<64x32xbf16>, vector<128x32xf32> -> vector<128x32xf32>
    %c0_54 = arith.constant 0 : index
    %c0_55 = arith.constant 0 : index
    %43 = vector.load %arg8[%c0_54, %c0_55] : memref<128x32xf32, #tpu.memory_space<vmem>>, vector<128x32xf32>
    %44 = arith.addf %43, %42 : vector<128x32xf32>
    %c0_56 = arith.constant 0 : index
    %c0_57 = arith.constant 0 : index
    %45 = vector.load %arg8[%c0_56, %c0_57] : memref<128x32xf32, #tpu.memory_space<vmem>>, vector<128x32xf32>
    tpu.vector_store %arg8[%c0_56, %c0_57], %44 {strides = array<i32>} : memref<128x32xf32, #tpu.memory_space<vmem>>, vector<128x32xf32>,
    %c0_58 = arith.constant 0 : index
    %c45 = arith.constant 45 : index
    %c0_59 = arith.constant 0 : index
    %c0_60 = arith.constant 0 : index
    %46 = vector.load %arg2[%c0_58, %c45, %c0_59, %c0_60] : memref<2x72x8x64xbf16, #tpu.memory_space<vmem>>, vector<2x8x8x64xbf16>
    %47 = vector.shape_cast %46 : vector<2x8x8x64xbf16> to vector<128x64xbf16>
    %c6 = arith.constant 6 : index
    %c0_61 = arith.constant 0 : index
    %c0_62 = arith.constant 0 : index
    %48 = vector.load %arg3[%c6, %c0_61, %c0_62] : memref<16x64x32xbf16, #tpu.memory_space<vmem>>, vector<1x64x32xbf16>
    %49 = vector.shape_cast %48 : vector<1x64x32xbf16> to vector<64x32xbf16>
    %cst_63 = arith.constant dense<0.000000e+00> : vector<128x32xf32>
    %50 = tpu.matmul %47, %49, %cst_63 {dimension_numbers = #tpu.dot_dimension_numbers<[1], [0], [0], [1], [0, 0, 1, 1], [], []>} : vector<128x64xbf16>, vector<64x32xbf16>, vector<128x32xf32> -> vector<128x32xf32>
    %c0_64 = arith.constant 0 : index
    %c0_65 = arith.constant 0 : index
    %51 = vector.load %arg8[%c0_64, %c0_65] : memref<128x32xf32, #tpu.memory_space<vmem>>, vector<128x32xf32>
    %52 = arith.addf %51, %50 : vector<128x32xf32>
    %c0_66 = arith.constant 0 : index
    %c0_67 = arith.constant 0 : index
    %53 = vector.load %arg8[%c0_66, %c0_67] : memref<128x32xf32, #tpu.memory_space<vmem>>, vector<128x32xf32>
    tpu.vector_store %arg8[%c0_66, %c0_67], %52 {strides = array<i32>} : memref<128x32xf32, #tpu.memory_space<vmem>>, vector<128x32xf32>,
    %c0_68 = arith.constant 0 : index
    %c63 = arith.constant 63 : index
    %c0_69 = arith.constant 0 : index
    %c0_70 = arith.constant 0 : index
    %54 = vector.load %arg2[%c0_68, %c63, %c0_69, %c0_70] : memref<2x72x8x64xbf16, #tpu.memory_space<vmem>>, vector<2x8x8x64xbf16>
    %55 = vector.shape_cast %54 : vector<2x8x8x64xbf16> to vector<128x64xbf16>
    %c7 = arith.constant 7 : index
    %c0_71 = arith.constant 0 : index
    %c0_72 = arith.constant 0 : index
    %56 = vector.load %arg3[%c7, %c0_71, %c0_72] : memref<16x64x32xbf16, #tpu.memory_space<vmem>>, vector<1x64x32xbf16>
    %57 = vector.shape_cast %56 : vector<1x64x32xbf16> to vector<64x32xbf16>
    %cst_73 = arith.constant dense<0.000000e+00> : vector<128x32xf32>
    %58 = tpu.matmul %55, %57, %cst_73 {dimension_numbers = #tpu.dot_dimension_numbers<[1], [0], [0], [1], [0, 0, 1, 1], [], []>} : vector<128x64xbf16>, vector<64x32xbf16>, vector<128x32xf32> -> vector<128x32xf32>
    %c0_74 = arith.constant 0 : index
    %c0_75 = arith.constant 0 : index
    %59 = vector.load %arg8[%c0_74, %c0_75] : memref<128x32xf32, #tpu.memory_space<vmem>>, vector<128x32xf32>
    %60 = arith.addf %59, %58 : vector<128x32xf32>
    %c0_76 = arith.constant 0 : index
    %c0_77 = arith.constant 0 : index
    %61 = vector.load %arg8[%c0_76, %c0_77] : memref<128x32xf32, #tpu.memory_space<vmem>>, vector<128x32xf32>
    tpu.vector_store %arg8[%c0_76, %c0_77], %60 {strides = array<i32>} : memref<128x32xf32, #tpu.memory_space<vmem>>, vector<128x32xf32>,
    %c0_78 = arith.constant 0 : index
    %c1_79 = arith.constant 1 : index
    %c0_80 = arith.constant 0 : index
    %c0_81 = arith.constant 0 : index
    %62 = vector.load %arg2[%c0_78, %c1_79, %c0_80, %c0_81] : memref<2x72x8x64xbf16, #tpu.memory_space<vmem>>, vector<2x8x8x64xbf16>
    %63 = vector.shape_cast %62 : vector<2x8x8x64xbf16> to vector<128x64xbf16>
    %c8 = arith.constant 8 : index
    %c0_82 = arith.constant 0 : index
    %c0_83 = arith.constant 0 : index
    %64 = vector.load %arg3[%c8, %c0_82, %c0_83] : memref<16x64x32xbf16, #tpu.memory_space<vmem>>, vector<1x64x32xbf16>
    %65 = vector.shape_cast %64 : vector<1x64x32xbf16> to vector<64x32xbf16>
    %cst_84 = arith.constant dense<0.000000e+00> : vector<128x32xf32>
    %66 = tpu.matmul %63, %65, %cst_84 {dimension_numbers = #tpu.dot_dimension_numbers<[1], [0], [0], [1], [0, 0, 1, 1], [], []>} : vector<128x64xbf16>, vector<64x32xbf16>, vector<128x32xf32> -> vector<128x32xf32>
    %c0_85 = arith.constant 0 : index
    %c0_86 = arith.constant 0 : index
    %67 = vector.load %arg8[%c0_85, %c0_86] : memref<128x32xf32, #tpu.memory_space<vmem>>, vector<128x32xf32>
    %68 = arith.addf %67, %66 : vector<128x32xf32>
    %c0_87 = arith.constant 0 : index
    %c0_88 = arith.constant 0 : index
    %69 = vector.load %arg8[%c0_87, %c0_88] : memref<128x32xf32, #tpu.memory_space<vmem>>, vector<128x32xf32>
    tpu.vector_store %arg8[%c0_87, %c0_88], %68 {strides = array<i32>} : memref<128x32xf32, #tpu.memory_space<vmem>>, vector<128x32xf32>,
    %c0_89 = arith.constant 0 : index
    %c19 = arith.constant 19 : index
    %c0_90 = arith.constant 0 : index
    %c0_91 = arith.constant 0 : index
    %70 = vector.load %arg2[%c0_89, %c19, %c0_90, %c0_91] : memref<2x72x8x64xbf16, #tpu.memory_space<vmem>>, vector<2x8x8x64xbf16>
    %71 = vector.shape_cast %70 : vector<2x8x8x64xbf16> to vector<128x64xbf16>
    %c9_92 = arith.constant 9 : index
    %c0_93 = arith.constant 0 : index
    %c0_94 = arith.constant 0 : index
    %72 = vector.load %arg3[%c9_92, %c0_93, %c0_94] : memref<16x64x32xbf16, #tpu.memory_space<vmem>>, vector<1x64x32xbf16>
    %73 = vector.shape_cast %72 : vector<1x64x32xbf16> to vector<64x32xbf16>
    %cst_95 = arith.constant dense<0.000000e+00> : vector<128x32xf32>
    %74 = tpu.matmul %71, %73, %cst_95 {dimension_numbers = #tpu.dot_dimension_numbers<[1], [0], [0], [1], [0, 0, 1, 1], [], []>} : vector<128x64xbf16>, vector<64x32xbf16>, vector<128x32xf32> -> vector<128x32xf32>
    %c0_96 = arith.constant 0 : index
    %c0_97 = arith.constant 0 : index
    %75 = vector.load %arg8[%c0_96, %c0_97] : memref<128x32xf32, #tpu.memory_space<vmem>>, vector<128x32xf32>
    %76 = arith.addf %75, %74 : vector<128x32xf32>
    %c0_98 = arith.constant 0 : index
    %c0_99 = arith.constant 0 : index
    %77 = vector.load %arg8[%c0_98, %c0_99] : memref<128x32xf32, #tpu.memory_space<vmem>>, vector<128x32xf32>
    tpu.vector_store %arg8[%c0_98, %c0_99], %76 {strides = array<i32>} : memref<128x32xf32, #tpu.memory_space<vmem>>, vector<128x32xf32>,
    %c0_100 = arith.constant 0 : index
    %c10 = arith.constant 10 : index
    %c0_101 = arith.constant 0 : index
    %c0_102 = arith.constant 0 : index
    %78 = vector.load %arg2[%c0_100, %c10, %c0_101, %c0_102] : memref<2x72x8x64xbf16, #tpu.memory_space<vmem>>, vector<2x8x8x64xbf16>
    %79 = vector.shape_cast %78 : vector<2x8x8x64xbf16> to vector<128x64xbf16>
    %c10_103 = arith.constant 10 : index
    %c0_104 = arith.constant 0 : index
    %c0_105 = arith.constant 0 : index
    %80 = vector.load %arg3[%c10_103, %c0_104, %c0_105] : memref<16x64x32xbf16, #tpu.memory_space<vmem>>, vector<1x64x32xbf16>
    %81 = vector.shape_cast %80 : vector<1x64x32xbf16> to vector<64x32xbf16>
    %cst_106 = arith.constant dense<0.000000e+00> : vector<128x32xf32>
    %82 = tpu.matmul %79, %81, %cst_106 {dimension_numbers = #tpu.dot_dimension_numbers<[1], [0], [0], [1], [0, 0, 1, 1], [], []>} : vector<128x64xbf16>, vector<64x32xbf16>, vector<128x32xf32> -> vector<128x32xf32>
    %c0_107 = arith.constant 0 : index
    %c0_108 = arith.constant 0 : index
    %83 = vector.load %arg8[%c0_107, %c0_108] : memref<128x32xf32, #tpu.memory_space<vmem>>, vector<128x32xf32>
    %84 = arith.addf %83, %82 : vector<128x32xf32>
    %c0_109 = arith.constant 0 : index
    %c0_110 = arith.constant 0 : index
    %85 = vector.load %arg8[%c0_109, %c0_110] : memref<128x32xf32, #tpu.memory_space<vmem>>, vector<128x32xf32>
    tpu.vector_store %arg8[%c0_109, %c0_110], %84 {strides = array<i32>} : memref<128x32xf32, #tpu.memory_space<vmem>>, vector<128x32xf32>,
    %c0_111 = arith.constant 0 : index
    %c28 = arith.constant 28 : index
    %c0_112 = arith.constant 0 : index
    %c0_113 = arith.constant 0 : index
    %86 = vector.load %arg2[%c0_111, %c28, %c0_112, %c0_113] : memref<2x72x8x64xbf16, #tpu.memory_space<vmem>>, vector<2x8x8x64xbf16>
    %87 = vector.shape_cast %86 : vector<2x8x8x64xbf16> to vector<128x64xbf16>
    %c11 = arith.constant 11 : index
    %c0_114 = arith.constant 0 : index
    %c0_115 = arith.constant 0 : index
    %88 = vector.load %arg3[%c11, %c0_114, %c0_115] : memref<16x64x32xbf16, #tpu.memory_space<vmem>>, vector<1x64x32xbf16>
    %89 = vector.shape_cast %88 : vector<1x64x32xbf16> to vector<64x32xbf16>
    %cst_116 = arith.constant dense<0.000000e+00> : vector<128x32xf32>
    %90 = tpu.matmul %87, %89, %cst_116 {dimension_numbers = #tpu.dot_dimension_numbers<[1], [0], [0], [1], [0, 0, 1, 1], [], []>} : vector<128x64xbf16>, vector<64x32xbf16>, vector<128x32xf32> -> vector<128x32xf32>
    %c0_117 = arith.constant 0 : index
    %c0_118 = arith.constant 0 : index
    %91 = vector.load %arg8[%c0_117, %c0_118] : memref<128x32xf32, #tpu.memory_space<vmem>>, vector<128x32xf32>
    %92 = arith.addf %91, %90 : vector<128x32xf32>
    %c0_119 = arith.constant 0 : index
    %c0_120 = arith.constant 0 : index
    %93 = vector.load %arg8[%c0_119, %c0_120] : memref<128x32xf32, #tpu.memory_space<vmem>>, vector<128x32xf32>
    tpu.vector_store %arg8[%c0_119, %c0_120], %92 {strides = array<i32>} : memref<128x32xf32, #tpu.memory_space<vmem>>, vector<128x32xf32>,
    %c0_121 = arith.constant 0 : index
    %c37 = arith.constant 37 : index
    %c0_122 = arith.constant 0 : index
    %c0_123 = arith.constant 0 : index
    %94 = vector.load %arg2[%c0_121, %c37, %c0_122, %c0_123] : memref<2x72x8x64xbf16, #tpu.memory_space<vmem>>, vector<2x8x8x64xbf16>
    %95 = vector.shape_cast %94 : vector<2x8x8x64xbf16> to vector<128x64xbf16>
    %c12 = arith.constant 12 : index
    %c0_124 = arith.constant 0 : index
    %c0_125 = arith.constant 0 : index
    %96 = vector.load %arg3[%c12, %c0_124, %c0_125] : memref<16x64x32xbf16, #tpu.memory_space<vmem>>, vector<1x64x32xbf16>
    %97 = vector.shape_cast %96 : vector<1x64x32xbf16> to vector<64x32xbf16>
    %cst_126 = arith.constant dense<0.000000e+00> : vector<128x32xf32>
    %98 = tpu.matmul %95, %97, %cst_126 {dimension_numbers = #tpu.dot_dimension_numbers<[1], [0], [0], [1], [0, 0, 1, 1], [], []>} : vector<128x64xbf16>, vector<64x32xbf16>, vector<128x32xf32> -> vector<128x32xf32>
    %c0_127 = arith.constant 0 : index
    %c0_128 = arith.constant 0 : index
    %99 = vector.load %arg8[%c0_127, %c0_128] : memref<128x32xf32, #tpu.memory_space<vmem>>, vector<128x32xf32>
    %100 = arith.addf %99, %98 : vector<128x32xf32>
    %c0_129 = arith.constant 0 : index
    %c0_130 = arith.constant 0 : index
    %101 = vector.load %arg8[%c0_129, %c0_130] : memref<128x32xf32, #tpu.memory_space<vmem>>, vector<128x32xf32>
    tpu.vector_store %arg8[%c0_129, %c0_130], %100 {strides = array<i32>} : memref<128x32xf32, #tpu.memory_space<vmem>>, vector<128x32xf32>,
    %c0_131 = arith.constant 0 : index
    %c55 = arith.constant 55 : index
    %c0_132 = arith.constant 0 : index
    %c0_133 = arith.constant 0 : index
    %102 = vector.load %arg2[%c0_131, %c55, %c0_132, %c0_133] : memref<2x72x8x64xbf16, #tpu.memory_space<vmem>>, vector<2x8x8x64xbf16>
    %103 = vector.shape_cast %102 : vector<2x8x8x64xbf16> to vector<128x64xbf16>
    %c13 = arith.constant 13 : index
    %c0_134 = arith.constant 0 : index
    %c0_135 = arith.constant 0 : index
    %104 = vector.load %arg3[%c13, %c0_134, %c0_135] : memref<16x64x32xbf16, #tpu.memory_space<vmem>>, vector<1x64x32xbf16>
    %105 = vector.shape_cast %104 : vector<1x64x32xbf16> to vector<64x32xbf16>
    %cst_136 = arith.constant dense<0.000000e+00> : vector<128x32xf32>
    %106 = tpu.matmul %103, %105, %cst_136 {dimension_numbers = #tpu.dot_dimension_numbers<[1], [0], [0], [1], [0, 0, 1, 1], [], []>} : vector<128x64xbf16>, vector<64x32xbf16>, vector<128x32xf32> -> vector<128x32xf32>
    %c0_137 = arith.constant 0 : index
    %c0_138 = arith.constant 0 : index
    %107 = vector.load %arg8[%c0_137, %c0_138] : memref<128x32xf32, #tpu.memory_space<vmem>>, vector<128x32xf32>
    %108 = arith.addf %107, %106 : vector<128x32xf32>
    %c0_139 = arith.constant 0 : index
    %c0_140 = arith.constant 0 : index
    %109 = vector.load %arg8[%c0_139, %c0_140] : memref<128x32xf32, #tpu.memory_space<vmem>>, vector<128x32xf32>
    tpu.vector_store %arg8[%c0_139, %c0_140], %108 {strides = array<i32>} : memref<128x32xf32, #tpu.memory_space<vmem>>, vector<128x32xf32>,
    %c0_141 = arith.constant 0 : index
    %c46 = arith.constant 46 : index
    %c0_142 = arith.constant 0 : index
    %c0_143 = arith.constant 0 : index
    %110 = vector.load %arg2[%c0_141, %c46, %c0_142, %c0_143] : memref<2x72x8x64xbf16, #tpu.memory_space<vmem>>, vector<2x8x8x64xbf16>
    %111 = vector.shape_cast %110 : vector<2x8x8x64xbf16> to vector<128x64xbf16>
    %c14 = arith.constant 14 : index
    %c0_144 = arith.constant 0 : index
    %c0_145 = arith.constant 0 : index
    %112 = vector.load %arg3[%c14, %c0_144, %c0_145] : memref<16x64x32xbf16, #tpu.memory_space<vmem>>, vector<1x64x32xbf16>
    %113 = vector.shape_cast %112 : vector<1x64x32xbf16> to vector<64x32xbf16>
    %cst_146 = arith.constant dense<0.000000e+00> : vector<128x32xf32>
    %114 = tpu.matmul %111, %113, %cst_146 {dimension_numbers = #tpu.dot_dimension_numbers<[1], [0], [0], [1], [0, 0, 1, 1], [], []>} : vector<128x64xbf16>, vector<64x32xbf16>, vector<128x32xf32> -> vector<128x32xf32>
    %c0_147 = arith.constant 0 : index
    %c0_148 = arith.constant 0 : index
    %115 = vector.load %arg8[%c0_147, %c0_148] : memref<128x32xf32, #tpu.memory_space<vmem>>, vector<128x32xf32>
    %116 = arith.addf %115, %114 : vector<128x32xf32>
    %c0_149 = arith.constant 0 : index
    %c0_150 = arith.constant 0 : index
    %117 = vector.load %arg8[%c0_149, %c0_150] : memref<128x32xf32, #tpu.memory_space<vmem>>, vector<128x32xf32>
    tpu.vector_store %arg8[%c0_149, %c0_150], %116 {strides = array<i32>} : memref<128x32xf32, #tpu.memory_space<vmem>>, vector<128x32xf32>,
    %c0_151 = arith.constant 0 : index
    %c64 = arith.constant 64 : index
    %c0_152 = arith.constant 0 : index
    %c0_153 = arith.constant 0 : index
    %118 = vector.load %arg2[%c0_151, %c64, %c0_152, %c0_153] : memref<2x72x8x64xbf16, #tpu.memory_space<vmem>>, vector<2x8x8x64xbf16>
    %119 = vector.shape_cast %118 : vector<2x8x8x64xbf16> to vector<128x64xbf16>
    %c15 = arith.constant 15 : index
    %c0_154 = arith.constant 0 : index
    %c0_155 = arith.constant 0 : index
    %120 = vector.load %arg3[%c15, %c0_154, %c0_155] : memref<16x64x32xbf16, #tpu.memory_space<vmem>>, vector<1x64x32xbf16>
    %121 = vector.shape_cast %120 : vector<1x64x32xbf16> to vector<64x32xbf16>
    %cst_156 = arith.constant dense<0.000000e+00> : vector<128x32xf32>
    %122 = tpu.matmul %119, %121, %cst_156 {dimension_numbers = #tpu.dot_dimension_numbers<[1], [0], [0], [1], [0, 0, 1, 1], [], []>} : vector<128x64xbf16>, vector<64x32xbf16>, vector<128x32xf32> -> vector<128x32xf32>
    %c0_157 = arith.constant 0 : index
    %c0_158 = arith.constant 0 : index
    %123 = vector.load %arg8[%c0_157, %c0_158] : memref<128x32xf32, #tpu.memory_space<vmem>>, vector<128x32xf32>
    %124 = arith.addf %123, %122 : vector<128x32xf32>
    %c0_159 = arith.constant 0 : index
    %c0_160 = arith.constant 0 : index
    %125 = vector.load %arg8[%c0_159, %c0_160] : memref<128x32xf32, #tpu.memory_space<vmem>>, vector<128x32xf32>
    tpu.vector_store %arg8[%c0_159, %c0_160], %124 {strides = array<i32>} : memref<128x32xf32, #tpu.memory_space<vmem>>, vector<128x32xf32>,
    %c0_161 = arith.constant 0 : index
    %c0_162 = arith.constant 0 : index
    %126 = vector.load %arg8[%c0_161, %c0_162] : memref<128x32xf32, #tpu.memory_space<vmem>>, vector<128x32xf32>
    %c0_163 = arith.constant 0 : index
    %c0_164 = arith.constant 0 : index
    %127 = vector.load %arg4[%c0_163, %c0_164] : memref<1x32xf32, #tpu.memory_space<vmem>>, vector<1x32xf32>
    %128 = vector.broadcast %127 : vector<1x32xf32> to vector<128x32xf32>
    %129 = arith.addf %126, %128 : vector<128x32xf32>
    %cst_165 = arith.constant dense<0.000000e+00> : vector<32xf32>
    %130 = vector.multi_reduction <add>, %129, %cst_165 [0] : vector<128x32xf32> to vector<32xf32>
    %131 = vector.shape_cast %130 : vector<32xf32> to vector<1x32xf32>
    %c0_166 = arith.constant 0 : index
    %c0_167 = arith.constant 0 : index
    %c0_168 = arith.constant 0 : index
    %132 = vector.load %arg6[%c0_166, %c0_167, %c0_168] : memref<1x1x32xf32, #tpu.memory_space<vmem>>, vector<1x1x32xf32>
    %133 = vector.shape_cast %132 : vector<1x1x32xf32> to vector<1x32xf32>
    %134 = vector.shape_cast %131 : vector<1x32xf32> to vector<1x1x32xf32>
    tpu.vector_store %arg6[%c0_166, %c0_167, %c0_168], %134 {strides = array<i32>} : memref<1x1x32xf32, #tpu.memory_space<vmem>>, vector<1x1x32xf32>,
    %135 = arith.mulf %129, %129 : vector<128x32xf32>
    %cst_169 = arith.constant dense<0.000000e+00> : vector<32xf32>
    %136 = vector.multi_reduction <add>, %135, %cst_169 [0] : vector<128x32xf32> to vector<32xf32>
    %137 = vector.shape_cast %136 : vector<32xf32> to vector<1x32xf32>
    %c0_170 = arith.constant 0 : index
    %c0_171 = arith.constant 0 : index
    %c0_172 = arith.constant 0 : index
    %138 = vector.load %arg7[%c0_170, %c0_171, %c0_172] : memref<1x1x32xf32, #tpu.memory_space<vmem>>, vector<1x1x32xf32>
    %139 = vector.shape_cast %138 : vector<1x1x32xf32> to vector<1x32xf32>
    %140 = vector.shape_cast %137 : vector<1x32xf32> to vector<1x1x32xf32>
    tpu.vector_store %arg7[%c0_170, %c0_171, %c0_172], %140 {strides = array<i32>} : memref<1x1x32xf32, #tpu.memory_space<vmem>>, vector<1x1x32xf32>,
    %141 = arith.truncf %129 : vector<128x32xf32> to vector<128x32xbf16>
    %c0_173 = arith.constant 0 : index
    %c0_174 = arith.constant 0 : index
    %142 = vector.load %arg5[%c0_173, %c0_174] : memref<128x32xbf16, #tpu.memory_space<vmem>>, vector<128x32xbf16>
    tpu.vector_store %arg5[%c0_173, %c0_174], %141 {strides = array<i32>} : memref<128x32xbf16, #tpu.memory_space<vmem>>, vector<128x32xbf16>,
    return
  }
  func.func @transform_0(%arg0: i32, %arg1: i32) -> (i32, i32, i32, i32) {
    %c0_i32 = arith.constant 0 : i32
    %c0_i32_0 = arith.constant 0 : i32
    %c0_i32_1 = arith.constant 0 : i32
    %c0_i32_2 = arith.constant 0 : i32
    return %arg0, %c0_i32, %c0_i32_0, %c0_i32_1 : i32, i32, i32, i32
  }
  func.func @transform_1(%arg0: i32, %arg1: i32) -> (i32, i32, i32) {
    %c0_i32 = arith.constant 0 : i32
    %c0_i32_0 = arith.constant 0 : i32
    %c0_i32_1 = arith.constant 0 : i32
    return %c0_i32, %c0_i32_0, %arg1 : i32, i32, i32
  }
  func.func @transform_2(%arg0: i32, %arg1: i32) -> (i32, i32) {
    %c0_i32 = arith.constant 0 : i32
    %c0_i32_0 = arith.constant 0 : i32
    return %c0_i32, %arg1 : i32, i32
  }
  func.func @transform_3(%arg0: i32, %arg1: i32) -> (i32, i32) {
    %c0_i32 = arith.constant 0 : i32
    return %arg0, %arg1 : i32, i32
  }
  func.func @transform_4(%arg0: i32, %arg1: i32) -> (i32, i32, i32) {
    %c0_i32 = arith.constant 0 : i32
    %c0_i32_0 = arith.constant 0 : i32
    return %arg0, %c0_i32, %arg1 : i32, i32, i32
  }
  func.func @transform_5(%arg0: i32, %arg1: i32) -> (i32, i32, i32) {
    %c0_i32 = arith.constant 0 : i32
    %c0_i32_0 = arith.constant 0 : i32
    return %arg0, %c0_i32, %arg1 : i32, i32, i32
  }
}

module attributes {stable_mosaic.version = 11 : i64} {
  func.func @_bn_leaky_kernel(%arg0: i32, %arg1: memref<128x32xbf16, #tpu.memory_space<vmem>>, %arg2: memref<1x32xf32, #tpu.memory_space<vmem>>, %arg3: memref<1x32xf32, #tpu.memory_space<vmem>>, %arg4: memref<128x32xbf16, #tpu.memory_space<vmem>>) attributes {dimension_semantics = [#tpu.dimension_semantics<parallel>], iteration_bounds = array<i64: 1>, scalar_prefetch = 0 : i64, scratch_operands = 0 : i64, tpu.core_type = #tpu.core_type<tc>, window_params = [{transform_indices = @transform_0, window_bounds = array<i64: 128, 32>}, {pipeline_mode = #tpu.pipeline_mode<synchronous>, transform_indices = @transform_1, window_bounds = array<i64: 1, 32>}, {pipeline_mode = #tpu.pipeline_mode<synchronous>, transform_indices = @transform_2, window_bounds = array<i64: 1, 32>}, {transform_indices = @transform_3, window_bounds = array<i64: 128, 32>}]} {
    %c0 = arith.constant 0 : index
    %c0_0 = arith.constant 0 : index
    %0 = vector.load %arg1[%c0, %c0_0] : memref<128x32xbf16, #tpu.memory_space<vmem>>, vector<128x32xbf16>
    %1 = arith.extf %0 : vector<128x32xbf16> to vector<128x32xf32>
    %c0_1 = arith.constant 0 : index
    %c0_2 = arith.constant 0 : index
    %2 = vector.load %arg2[%c0_1, %c0_2] : memref<1x32xf32, #tpu.memory_space<vmem>>, vector<1x32xf32>
    %3 = vector.broadcast %2 : vector<1x32xf32> to vector<128x32xf32>
    %4 = arith.mulf %1, %3 : vector<128x32xf32>
    %c0_3 = arith.constant 0 : index
    %c0_4 = arith.constant 0 : index
    %5 = vector.load %arg3[%c0_3, %c0_4] : memref<1x32xf32, #tpu.memory_space<vmem>>, vector<1x32xf32>
    %6 = vector.broadcast %5 : vector<1x32xf32> to vector<128x32xf32>
    %7 = arith.addf %4, %6 : vector<128x32xf32>
    %cst = arith.constant 0.000000e+00 : f32
    %8 = vector.broadcast %cst : f32 to vector<128x32xf32>
    %9 = arith.cmpf oge, %7, %8 : vector<128x32xf32>
    %cst_5 = arith.constant 2.000000e-01 : f32
    %10 = vector.broadcast %cst_5 : f32 to vector<128x32xf32>
    %11 = arith.mulf %10, %7 : vector<128x32xf32>
    %12 = arith.select %9, %7, %11 : vector<128x32xi1>, vector<128x32xf32>
    %13 = arith.truncf %12 : vector<128x32xf32> to vector<128x32xbf16>
    %c0_6 = arith.constant 0 : index
    %c0_7 = arith.constant 0 : index
    %14 = vector.load %arg4[%c0_6, %c0_7] : memref<128x32xbf16, #tpu.memory_space<vmem>>, vector<128x32xbf16>
    tpu.vector_store %arg4[%c0_6, %c0_7], %13 {strides = array<i32>} : memref<128x32xbf16, #tpu.memory_space<vmem>>, vector<128x32xbf16>,
    return
  }
  func.func @transform_0(%arg0: i32) -> (i32, i32) {
    %c0_i32 = arith.constant 0 : i32
    %c0_i32_0 = arith.constant 0 : i32
    return %arg0, %c0_i32 : i32, i32
  }
  func.func @transform_1(%arg0: i32) -> (i32, i32) {
    %c0_i32 = arith.constant 0 : i32
    %c0_i32_0 = arith.constant 0 : i32
    %c0_i32_1 = arith.constant 0 : i32
    return %c0_i32, %c0_i32_0 : i32, i32
  }
  func.func @transform_2(%arg0: i32) -> (i32, i32) {
    %c0_i32 = arith.constant 0 : i32
    %c0_i32_0 = arith.constant 0 : i32
    %c0_i32_1 = arith.constant 0 : i32
    return %c0_i32, %c0_i32_0 : i32, i32
  }
  func.func @transform_3(%arg0: i32) -> (i32, i32) {
    %c0_i32 = arith.constant 0 : i32
    %c0_i32_0 = arith.constant 0 : i32
    return %arg0, %c0_i32 : i32, i32
  }
}

module attributes {stable_mosaic.version = 11 : i64} {
  func.func @_conv_kernel(%arg0: i32, %arg1: i32, %arg2: memref<32x512xbf16, #tpu.memory_space<vmem>>, %arg3: memref<512x16xbf16, #tpu.memory_space<vmem>>, %arg4: memref<1x16xf32, #tpu.memory_space<vmem>>, %arg5: memref<32x16xbf16, #tpu.memory_space<vmem>>, %arg6: memref<1x1x16xf32, #tpu.memory_space<vmem>>, %arg7: memref<1x1x16xf32, #tpu.memory_space<vmem>>, %arg8: memref<32x16xf32, #tpu.memory_space<vmem>>) attributes {dimension_semantics = [#tpu.dimension_semantics<parallel>, #tpu.dimension_semantics<parallel>], iteration_bounds = array<i64: 1, 1>, scalar_prefetch = 0 : i64, scratch_operands = 1 : i64, tpu.core_type = #tpu.core_type<tc>, window_params = [{transform_indices = @transform_0, window_bounds = array<i64: 32, 512>}, {transform_indices = @transform_1, window_bounds = array<i64: 512, 16>}, {transform_indices = @transform_2, window_bounds = array<i64: 1, 16>}, {transform_indices = @transform_3, window_bounds = array<i64: 32, 16>}, {transform_indices = @transform_4, window_bounds = array<i64: 1, 1, 16>}, {transform_indices = @transform_5, window_bounds = array<i64: 1, 1, 16>}]} {
    %c0 = arith.constant 0 : index
    %c0_0 = arith.constant 0 : index
    %0 = vector.load %arg2[%c0, %c0_0] : memref<32x512xbf16, #tpu.memory_space<vmem>>, vector<32x512xbf16>
    %c0_1 = arith.constant 0 : index
    %c0_2 = arith.constant 0 : index
    %1 = vector.load %arg3[%c0_1, %c0_2] : memref<512x16xbf16, #tpu.memory_space<vmem>>, vector<512x16xbf16>
    %cst = arith.constant dense<0.000000e+00> : vector<32x16xf32>
    %2 = tpu.matmul %0, %1, %cst {dimension_numbers = #tpu.dot_dimension_numbers<[1], [0], [0], [1], [0, 0, 1, 1], [], []>} : vector<32x512xbf16>, vector<512x16xbf16>, vector<32x16xf32> -> vector<32x16xf32>
    %c0_3 = arith.constant 0 : index
    %c0_4 = arith.constant 0 : index
    %3 = vector.load %arg8[%c0_3, %c0_4] : memref<32x16xf32, #tpu.memory_space<vmem>>, vector<32x16xf32>
    tpu.vector_store %arg8[%c0_3, %c0_4], %2 {strides = array<i32>} : memref<32x16xf32, #tpu.memory_space<vmem>>, vector<32x16xf32>,
    %c0_5 = arith.constant 0 : index
    %c0_6 = arith.constant 0 : index
    %4 = vector.load %arg8[%c0_5, %c0_6] : memref<32x16xf32, #tpu.memory_space<vmem>>, vector<32x16xf32>
    %c0_7 = arith.constant 0 : index
    %c0_8 = arith.constant 0 : index
    %5 = vector.load %arg4[%c0_7, %c0_8] : memref<1x16xf32, #tpu.memory_space<vmem>>, vector<1x16xf32>
    %6 = vector.broadcast %5 : vector<1x16xf32> to vector<32x16xf32>
    %7 = arith.addf %4, %6 : vector<32x16xf32>
    %cst_9 = arith.constant dense<0.000000e+00> : vector<16xf32>
    %8 = vector.multi_reduction <add>, %7, %cst_9 [0] : vector<32x16xf32> to vector<16xf32>
    %9 = vector.shape_cast %8 : vector<16xf32> to vector<1x16xf32>
    %c0_10 = arith.constant 0 : index
    %c0_11 = arith.constant 0 : index
    %c0_12 = arith.constant 0 : index
    %10 = vector.load %arg6[%c0_10, %c0_11, %c0_12] : memref<1x1x16xf32, #tpu.memory_space<vmem>>, vector<1x1x16xf32>
    %11 = vector.shape_cast %10 : vector<1x1x16xf32> to vector<1x16xf32>
    %12 = vector.shape_cast %9 : vector<1x16xf32> to vector<1x1x16xf32>
    tpu.vector_store %arg6[%c0_10, %c0_11, %c0_12], %12 {strides = array<i32>} : memref<1x1x16xf32, #tpu.memory_space<vmem>>, vector<1x1x16xf32>,
    %13 = arith.mulf %7, %7 : vector<32x16xf32>
    %cst_13 = arith.constant dense<0.000000e+00> : vector<16xf32>
    %14 = vector.multi_reduction <add>, %13, %cst_13 [0] : vector<32x16xf32> to vector<16xf32>
    %15 = vector.shape_cast %14 : vector<16xf32> to vector<1x16xf32>
    %c0_14 = arith.constant 0 : index
    %c0_15 = arith.constant 0 : index
    %c0_16 = arith.constant 0 : index
    %16 = vector.load %arg7[%c0_14, %c0_15, %c0_16] : memref<1x1x16xf32, #tpu.memory_space<vmem>>, vector<1x1x16xf32>
    %17 = vector.shape_cast %16 : vector<1x1x16xf32> to vector<1x16xf32>
    %18 = vector.shape_cast %15 : vector<1x16xf32> to vector<1x1x16xf32>
    tpu.vector_store %arg7[%c0_14, %c0_15, %c0_16], %18 {strides = array<i32>} : memref<1x1x16xf32, #tpu.memory_space<vmem>>, vector<1x1x16xf32>,
    %19 = arith.truncf %7 : vector<32x16xf32> to vector<32x16xbf16>
    %c0_17 = arith.constant 0 : index
    %c0_18 = arith.constant 0 : index
    %20 = vector.load %arg5[%c0_17, %c0_18] : memref<32x16xbf16, #tpu.memory_space<vmem>>, vector<32x16xbf16>
    tpu.vector_store %arg5[%c0_17, %c0_18], %19 {strides = array<i32>} : memref<32x16xbf16, #tpu.memory_space<vmem>>, vector<32x16xbf16>,
    return
  }
  func.func @transform_0(%arg0: i32, %arg1: i32) -> (i32, i32) {
    %c0_i32 = arith.constant 0 : i32
    %c0_i32_0 = arith.constant 0 : i32
    return %arg0, %c0_i32 : i32, i32
  }
  func.func @transform_1(%arg0: i32, %arg1: i32) -> (i32, i32) {
    %c0_i32 = arith.constant 0 : i32
    %c0_i32_0 = arith.constant 0 : i32
    return %c0_i32, %arg1 : i32, i32
  }
  func.func @transform_2(%arg0: i32, %arg1: i32) -> (i32, i32) {
    %c0_i32 = arith.constant 0 : i32
    %c0_i32_0 = arith.constant 0 : i32
    return %c0_i32, %arg1 : i32, i32
  }
  func.func @transform_3(%arg0: i32, %arg1: i32) -> (i32, i32) {
    %c0_i32 = arith.constant 0 : i32
    return %arg0, %arg1 : i32, i32
  }
  func.func @transform_4(%arg0: i32, %arg1: i32) -> (i32, i32, i32) {
    %c0_i32 = arith.constant 0 : i32
    %c0_i32_0 = arith.constant 0 : i32
    return %arg0, %c0_i32, %arg1 : i32, i32, i32
  }
  func.func @transform_5(%arg0: i32, %arg1: i32) -> (i32, i32, i32) {
    %c0_i32 = arith.constant 0 : i32
    %c0_i32_0 = arith.constant 0 : i32
    return %arg0, %c0_i32, %arg1 : i32, i32, i32
  }
}

module attributes {stable_mosaic.version = 11 : i64} {
  func.func @_bn_leaky_kernel(%arg0: i32, %arg1: memref<32x16xbf16, #tpu.memory_space<vmem>>, %arg2: memref<1x16xf32, #tpu.memory_space<vmem>>, %arg3: memref<1x16xf32, #tpu.memory_space<vmem>>, %arg4: memref<32x16xbf16, #tpu.memory_space<vmem>>) attributes {dimension_semantics = [#tpu.dimension_semantics<parallel>], iteration_bounds = array<i64: 1>, scalar_prefetch = 0 : i64, scratch_operands = 0 : i64, tpu.core_type = #tpu.core_type<tc>, window_params = [{transform_indices = @transform_0, window_bounds = array<i64: 32, 16>}, {pipeline_mode = #tpu.pipeline_mode<synchronous>, transform_indices = @transform_1, window_bounds = array<i64: 1, 16>}, {pipeline_mode = #tpu.pipeline_mode<synchronous>, transform_indices = @transform_2, window_bounds = array<i64: 1, 16>}, {transform_indices = @transform_3, window_bounds = array<i64: 32, 16>}]} {
    %c0 = arith.constant 0 : index
    %c0_0 = arith.constant 0 : index
    %0 = vector.load %arg1[%c0, %c0_0] : memref<32x16xbf16, #tpu.memory_space<vmem>>, vector<32x16xbf16>
    %1 = arith.extf %0 : vector<32x16xbf16> to vector<32x16xf32>
    %c0_1 = arith.constant 0 : index
    %c0_2 = arith.constant 0 : index
    %2 = vector.load %arg2[%c0_1, %c0_2] : memref<1x16xf32, #tpu.memory_space<vmem>>, vector<1x16xf32>
    %3 = vector.broadcast %2 : vector<1x16xf32> to vector<32x16xf32>
    %4 = arith.mulf %1, %3 : vector<32x16xf32>
    %c0_3 = arith.constant 0 : index
    %c0_4 = arith.constant 0 : index
    %5 = vector.load %arg3[%c0_3, %c0_4] : memref<1x16xf32, #tpu.memory_space<vmem>>, vector<1x16xf32>
    %6 = vector.broadcast %5 : vector<1x16xf32> to vector<32x16xf32>
    %7 = arith.addf %4, %6 : vector<32x16xf32>
    %cst = arith.constant 0.000000e+00 : f32
    %8 = vector.broadcast %cst : f32 to vector<32x16xf32>
    %9 = arith.cmpf oge, %7, %8 : vector<32x16xf32>
    %cst_5 = arith.constant 2.000000e-01 : f32
    %10 = vector.broadcast %cst_5 : f32 to vector<32x16xf32>
    %11 = arith.mulf %10, %7 : vector<32x16xf32>
    %12 = arith.select %9, %7, %11 : vector<32x16xi1>, vector<32x16xf32>
    %13 = arith.truncf %12 : vector<32x16xf32> to vector<32x16xbf16>
    %c0_6 = arith.constant 0 : index
    %c0_7 = arith.constant 0 : index
    %14 = vector.load %arg4[%c0_6, %c0_7] : memref<32x16xbf16, #tpu.memory_space<vmem>>, vector<32x16xbf16>
    tpu.vector_store %arg4[%c0_6, %c0_7], %13 {strides = array<i32>} : memref<32x16xbf16, #tpu.memory_space<vmem>>, vector<32x16xbf16>,
    return
  }
  func.func @transform_0(%arg0: i32) -> (i32, i32) {
    %c0_i32 = arith.constant 0 : i32
    %c0_i32_0 = arith.constant 0 : i32
    return %arg0, %c0_i32 : i32, i32
  }
  func.func @transform_1(%arg0: i32) -> (i32, i32) {
    %c0_i32 = arith.constant 0 : i32
    %c0_i32_0 = arith.constant 0 : i32
    %c0_i32_1 = arith.constant 0 : i32
    return %c0_i32, %c0_i32_0 : i32, i32
  }
  func.func @transform_2(%arg0: i32) -> (i32, i32) {
    %c0_i32 = arith.constant 0 : i32
    %c0_i32_0 = arith.constant 0 : i32
    %c0_i32_1 = arith.constant 0 : i32
    return %c0_i32, %c0_i32_0 : i32, i32
  }
  func.func @transform_3(%arg0: i32) -> (i32, i32) {
    %c0_i32 = arith.constant 0 : i32
    %c0_i32_0 = arith.constant 0 : i32
    return %arg0, %c0_i32 : i32, i32
  }
}

module attributes {stable_mosaic.version = 11 : i64} {
  func.func @_conv_kernel(%arg0: i32, %arg1: i32, %arg2: memref<2x256xbf16, #tpu.memory_space<vmem>>, %arg3: memref<256x1xbf16, #tpu.memory_space<vmem>>, %arg4: memref<1x1xf32, #tpu.memory_space<vmem>>, %arg5: memref<2x1xf32, #tpu.memory_space<vmem>>, %arg6: memref<2x1xf32, #tpu.memory_space<vmem>>) attributes {dimension_semantics = [#tpu.dimension_semantics<parallel>, #tpu.dimension_semantics<parallel>], iteration_bounds = array<i64: 1, 1>, scalar_prefetch = 0 : i64, scratch_operands = 1 : i64, tpu.core_type = #tpu.core_type<tc>, window_params = [{transform_indices = @transform_0, window_bounds = array<i64: 2, 256>}, {transform_indices = @transform_1, window_bounds = array<i64: 256, 1>}, {transform_indices = @transform_2, window_bounds = array<i64: 1, 1>}, {transform_indices = @transform_3, window_bounds = array<i64: 2, 1>}]} {
    %c0 = arith.constant 0 : index
    %c0_0 = arith.constant 0 : index
    %0 = vector.load %arg2[%c0, %c0_0] : memref<2x256xbf16, #tpu.memory_space<vmem>>, vector<2x256xbf16>
    %c0_1 = arith.constant 0 : index
    %c0_2 = arith.constant 0 : index
    %1 = vector.load %arg3[%c0_1, %c0_2] : memref<256x1xbf16, #tpu.memory_space<vmem>>, vector<256x1xbf16>
    %cst = arith.constant dense<0.000000e+00> : vector<2x1xf32>
    %2 = tpu.matmul %0, %1, %cst {dimension_numbers = #tpu.dot_dimension_numbers<[1], [0], [0], [1], [0, 0, 1, 1], [], []>} : vector<2x256xbf16>, vector<256x1xbf16>, vector<2x1xf32> -> vector<2x1xf32>
    %c0_3 = arith.constant 0 : index
    %c0_4 = arith.constant 0 : index
    %3 = vector.load %arg6[%c0_3, %c0_4] : memref<2x1xf32, #tpu.memory_space<vmem>>, vector<2x1xf32>
    tpu.vector_store %arg6[%c0_3, %c0_4], %2 {strides = array<i32>} : memref<2x1xf32, #tpu.memory_space<vmem>>, vector<2x1xf32>,
    %c0_5 = arith.constant 0 : index
    %c0_6 = arith.constant 0 : index
    %4 = vector.load %arg6[%c0_5, %c0_6] : memref<2x1xf32, #tpu.memory_space<vmem>>, vector<2x1xf32>
    %c0_7 = arith.constant 0 : index
    %c0_8 = arith.constant 0 : index
    %5 = vector.load %arg4[%c0_7, %c0_8] : memref<1x1xf32, #tpu.memory_space<vmem>>, vector<1x1xf32>
    %6 = vector.broadcast %5 : vector<1x1xf32> to vector<2x1xf32>
    %7 = arith.addf %4, %6 : vector<2x1xf32>
    %cst_9 = arith.constant 0.000000e+00 : f32
    %8 = vector.broadcast %cst_9 : f32 to vector<2x1xf32>
    %9 = arith.subf %8, %7 : vector<2x1xf32>
    %10 = math.exp %9 : vector<2x1xf32>
    %cst_10 = arith.constant 1.000000e+00 : f32
    %11 = vector.broadcast %cst_10 : f32 to vector<2x1xf32>
    %12 = arith.addf %11, %10 : vector<2x1xf32>
    %cst_11 = arith.constant 1.000000e+00 : f32
    %13 = vector.broadcast %cst_11 : f32 to vector<2x1xf32>
    %14 = arith.divf %13, %12 : vector<2x1xf32>
    %c0_12 = arith.constant 0 : index
    %c0_13 = arith.constant 0 : index
    %15 = vector.load %arg5[%c0_12, %c0_13] : memref<2x1xf32, #tpu.memory_space<vmem>>, vector<2x1xf32>
    tpu.vector_store %arg5[%c0_12, %c0_13], %14 {strides = array<i32>} : memref<2x1xf32, #tpu.memory_space<vmem>>, vector<2x1xf32>,
    return
  }
  func.func @transform_0(%arg0: i32, %arg1: i32) -> (i32, i32) {
    %c0_i32 = arith.constant 0 : i32
    %c0_i32_0 = arith.constant 0 : i32
    return %arg0, %c0_i32 : i32, i32
  }
  func.func @transform_1(%arg0: i32, %arg1: i32) -> (i32, i32) {
    %c0_i32 = arith.constant 0 : i32
    %c0_i32_0 = arith.constant 0 : i32
    return %c0_i32, %arg1 : i32, i32
  }
  func.func @transform_2(%arg0: i32, %arg1: i32) -> (i32, i32) {
    %c0_i32 = arith.constant 0 : i32
    %c0_i32_0 = arith.constant 0 : i32
    return %c0_i32, %arg1 : i32, i32
  }
  func.func @transform_3(%arg0: i32, %arg1: i32) -> (i32, i32) {
    %c0_i32 = arith.constant 0 : i32
    return %arg0, %arg1 : i32, i32
  }
}

</mosaic_0001>

<bundles_post_ra>
// kernel: discriminator_forward.6
= control target key start
LH: loop header
LB: loop body
LE: loop exit
PB: predicated region body
PF: predicated region fallthrough
CT: control target
= control target key end

     0   :  { %vm471_vm0 = vcmask 654336   ;;  %vm906_vm1 = vcmask 523264   ;;  %vm1359_vm3 = vcmask 519168   ;;  %s2789_s1 = inlined_call_operand.vmem [shape: bf16[208,64], index: 1, kind: input, shape index: {}]   ;;  %s2790_s0 = inlined_call_operand.vmem [shape: bf16[512,208], index: 0, kind: input, shape index: {}]   ;;  %s2791_s2 = inlined_call_operand.vmem [shape: f32[1,64], index: 2, kind: input, shape index: {}]   ;;  %s2792_s3 = inlined_call_operand.vmem [shape: bf16[512,64], index: 3, kind: output, shape index: {}]  }
   0x1   :  { %v1839_v0 = vld [vmem:[%s2789_s1 + $0x38] sm:$0xff]  ;;  %v1844_v1 = vld [vmem:[%s2789_s1 + $0x60] sm:$0xff]  ;;  %v1838_v2 = vld [vmem:[%s2789_s1 + $0x30] sm:$0xff] }
   0x2   :  { %568 = vmatpush.bf16.msra.mxu0 %v1839_v0  ;;  %1845 = vmatpush.bf16.msra.mxu2 %v1839_v0  ;;  %v1843_v3 = vld [vmem:[%s2789_s1 + $0x58] sm:$0xff]  ;;  %v1837_v4 = vld [vmem:[%s2789_s1 + $0x28] sm:$0xff]  ;;  %v1842_v5 = vld [vmem:[%s2789_s1 + $0x50] sm:$0xff] }
   0x3   :  { %740 = vmatpush.bf16.msra.mxu1 %v1844_v1  ;;  %1853 = vmatpush.bf16.msra.mxu3 %v1844_v1  ;;  %v1836_v6 = vld [vmem:[%s2789_s1 + $0x20] sm:$0xff]  ;;  %v1841_v7 = vld [vmem:[%s2789_s1 + $0x48] sm:$0xff]  ;;  %v1835_v8 = vld [vmem:[%s2789_s1 + $0x18] sm:$0xff] }
   0x4   :  { %v1840_v9 = vld [vmem:[%s2789_s1 + $0x40] sm:$0xff]  ;;  %v1432_v11 = vld [vmem:[%s2790_s0 + $0x8] sm:$0xf0]  ;;  %v1802_v12 = vld [vmem:[%s2790_s0 + $0x114] sm:$0xf] }
   0x5   :  { %v1768_v10 = vld [vmem:[%s2790_s0 + $0x4] sm:$0xf]  ;;  %v1568_v13 = vld [vmem:[%s2790_s0 + $0x118] sm:$0xf0]  ;;  %v1834_v15 = vld [vmem:[%s2789_s1 + $0x10] sm:$0xff] }
   0x6   :  { %569 = vmatpush.bf16.msra.mxu0 %v1838_v2  ;;  %1846 = vmatpush.bf16.msra.mxu2 %v1838_v2  ;;  %v1435_v14 = vor.u32 %v1768_v10, %v1432_v11  ;;  %v1571_v16 = vor.u32 %v1802_v12, %v1568_v13  ;;  %v1833_v17 = vld [vmem:[%s2789_s1 + $0x8] sm:$0xff]  ;;  %v1832_v18 = vld [vmem:[%s2789_s1] sm:$0xff]  ;;  %v1770_v25 = vld [vmem:[%s2790_s0 + $0x14] sm:$0xf] }
   0x7   :  { %741 = vmatpush.bf16.msra.mxu1 %v1843_v3  ;;  %1854 = vmatpush.bf16.msra.mxu3 %v1843_v3  ;;  %v1430_v19 = vld [vmem:[%s2790_s0] sm:$0xf]  ;;  %v1769_v20 = vld [vmem:[%s2790_s0 + $0x4] sm:$0xf0]  ;;  %v1440_v26 = vld [vmem:[%s2790_s0 + $0x18] sm:$0xf0] }
   0x8   :  { %v1558_v21 = vld [vmem:[%s2790_s0 + $0x100] sm:$0xf]  ;;  %v1801_v22 = vld [vmem:[%s2790_s0 + $0x104] sm:$0xf0]  ;;  %v1431_v23 = vor.u32 %v1769_v20, %v1430_v19  ;;  %v1804_v27 = vld [vmem:[%s2790_s0 + $0x124] sm:$0xf]  ;;  %v1443_v29 = vor.u32 %v1770_v25, %v1440_v26 }
   0x9   :  { %v1559_v24 = vor.u32 %v1801_v22, %v1558_v21  ;;  %v1576_v28 = vld [vmem:[%s2790_s0 + $0x128] sm:$0xf0]  ;;  %v1438_v31 = vld [vmem:[%s2790_s0 + $0x10] sm:$0xf]  ;;  %v1771_v32 = vld [vmem:[%s2790_s0 + $0x14] sm:$0xf0] }
   0xa   :  { %570 = vmatpush.bf16.msra.mxu0 %v1837_v4  ;;  %1847 = vmatpush.bf16.msra.mxu2 %v1837_v4  ;;  %v1579_v30 = vor.u32 %v1804_v27, %v1576_v28  ;;  %v1566_v33 = vld [vmem:[%s2790_s0 + $0x110] sm:$0xf]  ;;  %v1803_v34 = vld [vmem:[%s2790_s0 + $0x114] sm:$0xf0]  ;;  %v1439_v35 = vor.u32 %v1771_v32, %v1438_v31  ;;  %v1772_v37 = vld [vmem:[%s2790_s0 + $0x24] sm:$0xf] }
   0xb   :  { %742 = vmatpush.bf16.msra.mxu1 %v1842_v5  ;;  %1855 = vmatpush.bf16.msra.mxu3 %v1842_v5  ;;  %v1567_v36 = vor.u32 %v1803_v34, %v1566_v33  ;;  %v1448_v38 = vld [vmem:[%s2790_s0 + $0x28] sm:$0xf0]  ;;  %v1806_v39 = vld [vmem:[%s2790_s0 + $0x134] sm:$0xf]  ;;  %v1584_v40 = vld [vmem:[%s2790_s0 + $0x138] sm:$0xf0] }
   0xc   :  { %v1451_v41 = vor.u32 %v1772_v37, %v1448_v38  ;;  %v1587_v42 = vor.u32 %v1806_v39, %v1584_v40  ;;  %v1446_v43 = vld [vmem:[%s2790_s0 + $0x20] sm:$0xf]  ;;  %v1773_v44 = vld [vmem:[%s2790_s0 + $0x24] sm:$0xf0]  ;;  %v1774_v49 = vld [vmem:[%s2790_s0 + $0x34] sm:$0xf] }
   0xd   :  { %v1574_v45 = vld [vmem:[%s2790_s0 + $0x120] sm:$0xf]  ;;  %v1805_v46 = vld [vmem:[%s2790_s0 + $0x124] sm:$0xf0]  ;;  %v1447_v47 = vor.u32 %v1773_v44, %v1446_v43  ;;  %v1456_v50 = vld [vmem:[%s2790_s0 + $0x38] sm:$0xf0] }
   0xe   :  { %571 = vmatpush.bf16.msra.mxu0 %v1836_v6  ;;  %1848 = vmatpush.bf16.msra.mxu2 %v1836_v6  ;;  %v1575_v48 = vor.u32 %v1805_v46, %v1574_v45  ;;  %v1808_v51 = vld [vmem:[%s2790_s0 + $0x144] sm:$0xf]  ;;  %v1592_v52 = vld [vmem:[%s2790_s0 + $0x148] sm:$0xf0]  ;;  %v1459_v53 = vor.u32 %v1774_v49, %v1456_v50  ;;  %v1454_v55 = vld [vmem:[%s2790_s0 + $0x30] sm:$0xf] }
   0xf   :  { %743 = vmatpush.bf16.msra.mxu1 %v1841_v7  ;;  %1856 = vmatpush.bf16.msra.mxu3 %v1841_v7  ;;  %v1595_v54 = vor.u32 %v1808_v51, %v1592_v52  ;;  %v1775_v56 = vld [vmem:[%s2790_s0 + $0x34] sm:$0xf0]  ;;  %v1582_v57 = vld [vmem:[%s2790_s0 + $0x130] sm:$0xf]  ;;  %v1776_v61 = vld [vmem:[%s2790_s0 + $0x44] sm:$0xf] }
  0x10   :  { %v1807_v58 = vld [vmem:[%s2790_s0 + $0x134] sm:$0xf0]  ;;  %v1455_v59 = vor.u32 %v1775_v56, %v1454_v55  ;;  %v1464_v62 = vld [vmem:[%s2790_s0 + $0x48] sm:$0xf0]  ;;  %v1810_v63 = vld [vmem:[%s2790_s0 + $0x154] sm:$0xf] }
  0x11   :  { %v1583_v60 = vor.u32 %v1807_v58, %v1582_v57  ;;  %v1600_v0 = vld [vmem:[%s2790_s0 + $0x158] sm:$0xf0]  ;;  %v1467_v1 = vor.u32 %v1776_v61, %v1464_v62  ;;  %v1462_v3 = vld [vmem:[%s2790_s0 + $0x40] sm:$0xf]  ;;  %v1777_v4 = vld [vmem:[%s2790_s0 + $0x44] sm:$0xf0] }
  0x12   :  { %572 = vmatpush.bf16.msra.mxu0 %v1835_v8  ;;  %1849 = vmatpush.bf16.msra.mxu2 %v1835_v8  ;;  %v1603_v2 = vor.u32 %v1810_v63, %v1600_v0  ;;  %v1590_v5 = vld [vmem:[%s2790_s0 + $0x140] sm:$0xf]  ;;  %v1809_v6 = vld [vmem:[%s2790_s0 + $0x144] sm:$0xf0]  ;;  %v1463_v7 = vor.u32 %v1777_v4, %v1462_v3  ;;  %v1472_v10 = vld [vmem:[%s2790_s0 + $0x58] sm:$0xf0] }
  0x13   :  { %744 = vmatpush.bf16.msra.mxu1 %v1840_v9  ;;  %1857 = vmatpush.bf16.msra.mxu3 %v1840_v9  ;;  %v1591_v8 = vor.u32 %v1809_v6, %v1590_v5  ;;  %v1778_v9 = vld [vmem:[%s2790_s0 + $0x54] sm:$0xf]  ;;  %v1812_v11 = vld [vmem:[%s2790_s0 + $0x164] sm:$0xf]  ;;  %v1608_v12 = vld [vmem:[%s2790_s0 + $0x168] sm:$0xf0] }
  0x14   :  { %v1475_v13 = vor.u32 %v1778_v9, %v1472_v10  ;;  %v1780_v21 = vld [vmem:[%s2790_s0 + $0x64] sm:$0xf]  ;;  %v1480_v22 = vld [vmem:[%s2790_s0 + $0x68] sm:$0xf0]  ;;  %v1478_v27 = vld [vmem:[%s2790_s0 + $0x60] sm:$0xf] }
  0x15   :  { %v1483_v25 = vor.u32 %v1780_v21, %v1480_v22  ;;  %v1781_v28 = vld [vmem:[%s2790_s0 + $0x64] sm:$0xf0]  ;;  %v1782_v33 = vld [vmem:[%s2790_s0 + $0x74] sm:$0xf]  ;;  %v1488_v34 = vld [vmem:[%s2790_s0 + $0x78] sm:$0xf0] }
  0x16   :  { %1736 = vmatmul.msk.bf16.vlgmr.msra.gmra.mxu1 %vm471_vm0, %v1435_v14  ;;  %573 = vmatpush.bf16.msra.mxu0 %v1834_v15  ;;  %v1611_v14 = vor.u32 %v1812_v11, %v1608_v12  ;;  %v1479_v31 = vor.u32 %v1781_v28, %v1478_v27  ;;  %v1491_v37 = vor.u32 %v1782_v33, %v1488_v34  ;;  %v1486_v39 = vld [vmem:[%s2790_s0 + $0x70] sm:$0xf]  ;;  %v1783_v40 = vld [vmem:[%s2790_s0 + $0x74] sm:$0xf0]  ;;  %v1784_v45 = vld [vmem:[%s2790_s0 + $0x84] sm:$0xf] }
  0x17   :  { %1850 = vmatpush.bf16.msra.mxu2 %v1834_v15  ;;  %1753 = vmatmul.msk.bf16.vlgmr.msra.gmra.mxu3 %vm471_vm0, %v1571_v16  ;;  %v1470_v15 = vld [vmem:[%s2790_s0 + $0x50] sm:$0xf]  ;;  %v1779_v16 = vld [vmem:[%s2790_s0 + $0x54] sm:$0xf0]  ;;  %v1487_v43 = vor.u32 %v1783_v40, %v1486_v39  ;;  %v1496_v46 = vld [vmem:[%s2790_s0 + $0x88] sm:$0xf0] }
  0x18   :  { %v1471_v19 = vor.u32 %v1779_v16, %v1470_v15  ;;  %v1499_v49 = vor.u32 %v1784_v45, %v1496_v46  ;;  %v1494_v52 = vld [vmem:[%s2790_s0 + $0x80] sm:$0xf]  ;;  %v1817_v57 = vld [vmem:[%s2790_s0 + $0x184] sm:$0xf0]  ;;  %v1786_v62 = vld [vmem:[%s2790_s0 + $0x94] sm:$0xf] }
  0x19   :  { %v1622_v56 = vld [vmem:[%s2790_s0 + $0x180] sm:$0xf]  ;;  %v1504_v63 = vld [vmem:[%s2790_s0 + $0x98] sm:$0xf0]  ;;  %v1820_v0 = vld [vmem:[%s2790_s0 + $0x1a4] sm:$0xf] }
  0x1a   :  { %574 = vmatpush.bf16.msra.mxu0 %v1833_v17  ;;  %v2173_v6 = vld [vmem:[%s2791_s2] ss:$0 sm:$0xff]  ;;  %v1502_v12 = vld [vmem:[%s2790_s0 + $0x90] sm:$0xf]  ;;  %v1512_v27 = vld [vmem:[%s2790_s0 + $0xa8] sm:$0xf0] }
  0x1b   :  { %1851 = vmatpush.bf16.msra.mxu2 %v1833_v17  ;;  %v1598_v17 = vld [vmem:[%s2790_s0 + $0x150] sm:$0xf]  ;;  %v1822_v28 = vld [vmem:[%s2790_s0 + $0x1b4] sm:$0xf]  ;;  %v1510_v45 = vld [vmem:[%s2790_s0 + $0xa0] sm:$0xf] }
  0x1c   :  { %v1789_v46 = vld [vmem:[%s2790_s0 + $0xa4] sm:$0xf0] }
  0x1e   :  { %575 = vmatpush.bf16.msra.mxu0 %v1832_v18 }
  0x1f   :  { %1852 = vmatpush.bf16.msra.mxu2 %v1832_v18  ;;  %v1811_v18 = vld [vmem:[%s2790_s0 + $0x154] sm:$0xf0] }
  0x20   :  { %v1599_v20 = vor.u32 %v1811_v18, %v1598_v17  ;;  %v1819_v18 = vld [vmem:[%s2790_s0 + $0x194] sm:$0xf0] }
  0x21   :  { %576 = vmatmul.bf16.vlgmr.msra.gmra.mxu0 %v1431_v23  ;;  %v1814_v23 = vld [vmem:[%s2790_s0 + $0x174] sm:$0xf] }
  0x22   :  { %656 = vmatmul.bf16.vlgmr.msra.gmra.mxu2 %v1559_v24  ;;  %v1616_v24 = vld [vmem:[%s2790_s0 + $0x178] sm:$0xf0] }
  0x23   :  { %v1619_v26 = vor.u32 %v1814_v23, %v1616_v24 }
  0x26   :  { %1737 = vmatmul.msk.bf16.gmra.mxu1 %vm471_vm0, %v1443_v29  ;;  %v1606_v29 = vld [vmem:[%s2790_s0 + $0x160] sm:$0xf] }
  0x27   :  { %1754 = vmatmul.msk.bf16.gmra.mxu3 %vm471_vm0, %v1579_v30  ;;  %v1813_v30 = vld [vmem:[%s2790_s0 + $0x164] sm:$0xf0] }
  0x28   :  { %v1607_v32 = vor.u32 %v1813_v30, %v1606_v29  ;;  %v1648_v30 = vld [vmem:[%s2790_s0 + $0x1b8] sm:$0xf0] }
  0x31   :  { %581 = vmatmul.bf16.gmra.mxu0 %v1439_v35  ;;  %v1816_v35 = vld [vmem:[%s2790_s0 + $0x184] sm:$0xf] }
  0x32   :  { %661 = vmatmul.bf16.gmra.mxu2 %v1567_v36  ;;  %v1624_v36 = vld [vmem:[%s2790_s0 + $0x188] sm:$0xf0] }
  0x33   :  { %v1627_v38 = vor.u32 %v1816_v35, %v1624_v36  ;;  %v1651_v36 = vor.u32 %v1822_v28, %v1648_v30 }
  0x36   :  { %1738 = vmatmul.msk.bf16.gmra.mxu1 %vm471_vm0, %v1451_v41  ;;  %v1614_v41 = vld [vmem:[%s2790_s0 + $0x170] sm:$0xf] }
  0x37   :  { %1755 = vmatmul.msk.bf16.gmra.mxu3 %vm471_vm0, %v1587_v42  ;;  %v1815_v42 = vld [vmem:[%s2790_s0 + $0x174] sm:$0xf0] }
  0x38   :  { %v1615_v44 = vor.u32 %v1815_v42, %v1614_v41 }
  0x41   :  { %586 = vmatmul.bf16.gmra.mxu0 %v1447_v47  ;;  %v1818_v47 = vld [vmem:[%s2790_s0 + $0x194] sm:$0xf] }
  0x42   :  { %666 = vmatmul.bf16.gmra.mxu2 %v1575_v48  ;;  %v1632_v48 = vld [vmem:[%s2790_s0 + $0x198] sm:$0xf0] }
  0x43   :  { %v1635_v51 = vor.u32 %v1818_v47, %v1632_v48  ;;  %v1638_v47 = vld [vmem:[%s2790_s0 + $0x1a0] sm:$0xf] }
  0x46   :  { %1739 = vmatmul.msk.bf16.gmra.mxu1 %vm471_vm0, %v1459_v53  ;;  %v1785_v53 = vld [vmem:[%s2790_s0 + $0x84] sm:$0xf0] }
  0x47   :  { %1756 = vmatmul.msk.bf16.gmra.mxu3 %vm471_vm0, %v1595_v54  ;;  %v1495_v58 = vor.u32 %v1785_v53, %v1494_v52 }
  0x51   :  { %591 = vmatmul.bf16.gmra.mxu0 %v1455_v59 }
  0x52   :  { %671 = vmatmul.bf16.gmra.mxu2 %v1583_v60  ;;  %v1623_v60 = vor.u32 %v1817_v57, %v1622_v56 }
  0x56   :  { %1740 = vmatmul.msk.bf16.gmra.mxu1 %vm471_vm0, %v1467_v1  ;;  %v1640_v1 = vld [vmem:[%s2790_s0 + $0x1a8] sm:$0xf0] }
  0x57   :  { %1757 = vmatmul.msk.bf16.gmra.mxu3 %vm471_vm0, %v1603_v2  ;;  %v1507_v2 = vor.u32 %v1786_v62, %v1504_v63  ;;  %v1643_v5 = vor.u32 %v1820_v0, %v1640_v1  ;;  %v1824_v62 = vld [vmem:[%s2790_s0 + $0x1c4] sm:$0xf]  ;;  %v1656_v0 = vld [vmem:[%s2790_s0 + $0x1c8] sm:$0xf0] }
  0x61   :  { %596 = vmatmul.bf16.gmra.mxu0 %v1463_v7 }
  0x62   :  { %676 = vmatmul.bf16.gmra.mxu2 %v1591_v8 }
  0x66   :  { %1741 = vmatmul.msk.bf16.gmra.mxu1 %vm471_vm0, %v1475_v13  ;;  %v1787_v13 = vld [vmem:[%s2790_s0 + $0x94] sm:$0xf0] }
  0x67   :  { %1758 = vmatmul.msk.bf16.gmra.mxu3 %vm471_vm0, %v1611_v14  ;;  %v1630_v14 = vld [vmem:[%s2790_s0 + $0x190] sm:$0xf]  ;;  %v1503_v21 = vor.u32 %v1787_v13, %v1502_v12 }
  0x68   :  { %v1631_v24 = vor.u32 %v1819_v18, %v1630_v14 }
  0x71   :  { %601 = vmatmul.bf16.gmra.mxu0 %v1471_v19 }
  0x72   :  { %681 = vmatmul.bf16.gmra.mxu2 %v1599_v20 }
  0x76   :  { %1742 = vmatmul.msk.bf16.gmra.mxu1 %vm471_vm0, %v1483_v25 }
  0x77   :  { %1759 = vmatmul.msk.bf16.gmra.mxu3 %vm471_vm0, %v1619_v26  ;;  %v1788_v26 = vld [vmem:[%s2790_s0 + $0xa4] sm:$0xf] }
  0x81   :  { %606 = vmatmul.bf16.gmra.mxu0 %v1479_v31 }
  0x82   :  { %686 = vmatmul.bf16.gmra.mxu2 %v1607_v32  ;;  %v1515_v32 = vor.u32 %v1788_v26, %v1512_v27  ;;  %v1791_v26 = vld [vmem:[%s2790_s0 + $0xb4] sm:$0xf0]  ;;  %v1646_v27 = vld [vmem:[%s2790_s0 + $0x1b0] sm:$0xf] }
  0x86   :  { %1743 = vmatmul.msk.bf16.gmra.mxu1 %vm471_vm0, %v1491_v37 }
  0x87   :  { %1760 = vmatmul.msk.bf16.gmra.mxu3 %vm471_vm0, %v1627_v38 }
  0x91   :  { %611 = vmatmul.bf16.gmra.mxu0 %v1487_v43 }
  0x92   :  { %691 = vmatmul.bf16.gmra.mxu2 %v1615_v44 }
  0x93   :  { %v746_v50 = vpop.f32.mrf.mxu1 }
  0x96   :  { %1744 = vmatmul.msk.bf16.gmra.mxu1 %vm471_vm0, %v1499_v49 }
  0x97   :  { %1761 = vmatmul.msk.bf16.gmra.mxu3 %vm471_vm0, %v1635_v51  ;;  %v1821_v51 = vld [vmem:[%s2790_s0 + $0x1a4] sm:$0xf0] }
  0x9a   :  { %v2147_v54 = vpop.f32.mrf.mxu3 }
  0x9b   :  { %v748_v55 = vpop.f32.mrf.mxu1 }
  0x9e   :  { %v577_v59 = vpop.f32.mrf.mxu0 }
  0x9f   :  { %v747_v61 = vadd.f32 %v746_v50, %v577_v59 }
  0xa1   :  { %907 = vst.msk [vmem:[#allocation2] sm:$0xff] %vm906_vm1, %v747_v61  ;;  %616 = vmatmul.bf16.gmra.mxu0 %v1495_v58  ;;  %v1639_v58 = vor.u32 %v1821_v51, %v1638_v47  ;;  %v1520_v61 = vld [vmem:[%s2790_s0 + $0xb8] sm:$0xf0] }
  0xa2   :  { %696 = vmatmul.bf16.gmra.mxu2 %v1623_v60  ;;  %v2168_v3 = vpop.f32.mrf.mxu3  ;;  %v1790_v60 = vld [vmem:[%s2790_s0 + $0xb4] sm:$0xf] }
  0xa3   :  { %v751_v4 = vpop.f32.mrf.mxu1 }
  0xa5   :  { %v2175_v7 = vpop.f32.mrf.mxu2 }
  0xa6   :  { %1745 = vmatmul.msk.bf16.gmra.mxu1 %vm471_vm0, %v1507_v2  ;;  %v579_v8 = vpop.f32.mrf.mxu0 }
  0xa7   :  { %v749_v9 = vadd.f32 %v748_v55, %v579_v8  ;;  %1762 = vmatmul.msk.bf16.gmra.mxu3 %vm471_vm0, %v1643_v5 }
  0xa8   :  { %v971_v10 = vld [vmem:[#allocation2] sm:$0xff] }
  0xa9   :  { %v1039_v11 = vadd.f32 %v2173_v6, %v971_v10  ;;  %908 = vst.msk [vmem:[#allocation2 + $0x8] sm:$0xff] %vm906_vm1, %v749_v9  ;;  %v1659_v10 = vor.u32 %v1824_v62, %v1656_v0 }
  0xaa   :  { %v2190_v15 = vpop.f32.mrf.mxu3 }
  0xab   :  { %vm1103_vm2 = vcmp.ge.f32.partialorder %v1039_v11, 0.0  ;;  %v1167_v16 = vmul.f32 0.2, %v1039_v11  ;;  %v753_v17 = vpop.f32.mrf.mxu1 }
  0xad   :  { %v1231_v19 = vsel %vm1103_vm2, %v1039_v11, %v1167_v16  ;;  %v2195_v20 = vpop.f32.mrf.mxu2 }
  0xae   :  { %v1295_v22 = vpack.c.bf16 %v1231_v19, %v1231_v19  ;;  %v582_v23 = vpop.f32.mrf.mxu0 }
  0xaf   :  { %v752_v25 = vadd.f32 %v751_v4, %v582_v23  ;;  %v1523_v4 = vor.u32 %v1790_v60, %v1520_v61 }
  0xb0   :  { %1360 = vst.msk [vmem:[%s2792_s3] sm:$0xf] %vm1359_vm3, %v1295_v22  ;;  %v972_v29 = vld [vmem:[#allocation2 + $0x8] sm:$0xff] }
  0xb1   :  { %v1040_v31 = vadd.f32 %v2173_v6, %v972_v29  ;;  %909 = vst.msk [vmem:[#allocation2 + $0x10] sm:$0xff] %vm906_vm1, %v752_v25  ;;  %621 = vmatmul.bf16.gmra.mxu0 %v1503_v21 }
  0xb2   :  { %701 = vmatmul.bf16.gmra.mxu2 %v1631_v24  ;;  %v2215_v33 = vpop.f32.mrf.mxu3  ;;  %v1518_v24 = vld [vmem:[%s2790_s0 + $0xb0] sm:$0xf] }
  0xb3   :  { %vm1104_vm4 = vcmp.ge.f32.partialorder %v1040_v31, 0.0  ;;  %v1168_v34 = vmul.f32 0.2, %v1040_v31  ;;  %v756_v35 = vpop.f32.mrf.mxu1 }
  0xb5   :  { %v1232_v37 = vsel %vm1104_vm4, %v1040_v31, %v1168_v34  ;;  %v662_v38 = vpop.f32.mrf.mxu2  ;;  %v1823_v31 = vld [vmem:[%s2790_s0 + $0x1b4] sm:$0xf0] }
  0xb6   :  { %v1296_v39 = vpack.c.bf16 %v1232_v37, %v1232_v37  ;;  %v832_v40 = vadd.f32 %v2147_v54, %v662_v38  ;;  %1746 = vmatmul.msk.bf16.gmra.mxu1 %vm471_vm0, %v1515_v32  ;;  %v584_v41 = vpop.f32.mrf.mxu0  ;;  %v1511_v54 = vor.u32 %v1789_v46, %v1510_v45  ;;  %v1528_v45 = vld [vmem:[%s2790_s0 + $0xc8] sm:$0xf0]  ;;  %v1664_v46 = vld [vmem:[%s2790_s0 + $0x1d8] sm:$0xf0] }
  0xb7   :  { %v754_v42 = vadd.f32 %v753_v17, %v584_v41  ;;  %1763 = vmatmul.msk.bf16.gmra.mxu3 %vm471_vm0, %v1651_v36  ;;  %v1519_v36 = vor.u32 %v1791_v26, %v1518_v24  ;;  %v1647_v41 = vor.u32 %v1823_v31, %v1646_v27  ;;  %v1794_v27 = vld [vmem:[%s2790_s0 + $0xd4] sm:$0xf] }
  0xb8   :  { %1361 = vst.msk [vmem:[%s2792_s3 + $0x4] sm:$0xf] %vm1359_vm3, %v1296_v39  ;;  %v973_v43 = vld [vmem:[#allocation2 + $0x10] sm:$0xff] }
  0xb9   :  { %v1041_v44 = vadd.f32 %v2173_v6, %v973_v43  ;;  %941 = vst.msk [vmem:[#allocation2 + $0x110] sm:$0xff] %vm906_vm1, %v832_v40 }
  0xba   :  { %910 = vst.msk [vmem:[#allocation2 + $0x18] sm:$0xff] %vm906_vm1, %v754_v42  ;;  %v2236_v48 = vpop.f32.mrf.mxu3 }
  0xbb   :  { %vm1105_vm5 = vcmp.ge.f32.partialorder %v1041_v44, 0.0  ;;  %v1169_v49 = vmul.f32 0.2, %v1041_v44  ;;  %v758_v50 = vpop.f32.mrf.mxu1 }
  0xbd   :  { %v1233_v52 = vsel %vm1105_vm5, %v1041_v44, %v1169_v49  ;;  %v664_v53 = vpop.f32.mrf.mxu2  ;;  %v1792_v44 = vld [vmem:[%s2790_s0 + $0xc4] sm:$0xf] }
  0xbe   :  { %v1297_v55 = vpack.c.bf16 %v1233_v52, %v1233_v52  ;;  %v834_v56 = vadd.f32 %v2168_v3, %v664_v53  ;;  %v587_v57 = vpop.f32.mrf.mxu0  ;;  %v1531_v51 = vor.u32 %v1792_v44, %v1528_v45 }
  0xbf   :  { %v757_v59 = vadd.f32 %v756_v35, %v587_v57 }
  0xc0   :  { %1362 = vst.msk [vmem:[%s2792_s3 + $0x8] sm:$0xf] %vm1359_vm3, %v1297_v55  ;;  %v1005_v63 = vld [vmem:[#allocation2 + $0x110] sm:$0xff] }
  0xc1   :  { %v1073_v1 = vadd.f32 %v2173_v6, %v1005_v63  ;;  %v974_v2 = vld [vmem:[#allocation2 + $0x18] sm:$0xff]  ;;  %942 = vst.msk [vmem:[#allocation2 + $0x118] sm:$0xff] %vm906_vm1, %v834_v56  ;;  %626 = vmatmul.bf16.gmra.mxu0 %v1511_v54 }
  0xc2   :  { %v1042_v3 = vadd.f32 %v2173_v6, %v974_v2  ;;  %911 = vst.msk [vmem:[#allocation2 + $0x20] sm:$0xff] %vm906_vm1, %v757_v59  ;;  %706 = vmatmul.bf16.gmra.mxu2 %v1639_v58  ;;  %v2262_v5 = vpop.f32.mrf.mxu3 }
  0xc3   :  { %vm1137_vm6 = vcmp.ge.f32.partialorder %v1073_v1, 0.0  ;;  %v1201_v8 = vmul.f32 0.2, %v1073_v1  ;;  %v761_v9 = vpop.f32.mrf.mxu1 }
  0xc4   :  { %vm1106_vm7 = vcmp.ge.f32.partialorder %v1042_v3, 0.0  ;;  %v1170_v11 = vmul.f32 0.2, %v1042_v3 }
  0xc5   :  { %v1265_v12 = vsel %vm1137_vm6, %v1073_v1, %v1201_v8  ;;  %v667_v13 = vpop.f32.mrf.mxu2  ;;  %v1793_v8 = vld [vmem:[%s2790_s0 + $0xc4] sm:$0xf0] }
  0xc6   :  { %v1329_v14 = vpack.c.bf16 %v1265_v12, %v1265_v12  ;;  %v1234_v16 = vsel %vm1106_vm7, %v1042_v3, %v1170_v11  ;;  %v837_v17 = vadd.f32 %v2190_v15, %v667_v13  ;;  %1747 = vmatmul.msk.bf16.gmra.mxu1 %vm471_vm0, %v1523_v4  ;;  %v589_v18 = vpop.f32.mrf.mxu0  ;;  %v1654_v12 = vld [vmem:[%s2790_s0 + $0x1c0] sm:$0xf]  ;;  %v1825_v13 = vld [vmem:[%s2790_s0 + $0x1c4] sm:$0xf0] }
  0xc7   :  { %v1298_v19 = vpack.c.bf16 %v1234_v16, %v1234_v16  ;;  %v759_v21 = vadd.f32 %v758_v50, %v589_v18  ;;  %1764 = vmatmul.msk.bf16.gmra.mxu3 %vm471_vm0, %v1659_v10 }
  0xc8   :  { %1394 = vst.msk [vmem:[%s2792_s3 + $0x88] sm:$0xf] %vm1359_vm3, %v1329_v14  ;;  %v1006_v22 = vld [vmem:[#allocation2 + $0x118] sm:$0xff] }
  0xc9   :  { %1363 = vst.msk [vmem:[%s2792_s3 + $0xc] sm:$0xf] %vm1359_vm3, %v1298_v19  ;;  %v1074_v15 = vadd.f32 %v2173_v6, %v1006_v22  ;;  %v975_v23 = vld [vmem:[#allocation2 + $0x20] sm:$0xff] }
  0xca   :  { %v1043_v25 = vadd.f32 %v2173_v6, %v975_v23  ;;  %943 = vst.msk [vmem:[#allocation2 + $0x120] sm:$0xff] %vm906_vm1, %v837_v17  ;;  %v2287_v28 = vpop.f32.mrf.mxu3 }
  0xcb   :  { %vm1138_vm8 = vcmp.ge.f32.partialorder %v1074_v15, 0.0  ;;  %v1202_v29 = vmul.f32 0.2, %v1074_v15  ;;  %912 = vst.msk [vmem:[#allocation2 + $0x28] sm:$0xff] %vm906_vm1, %v759_v21  ;;  %v763_v30 = vpop.f32.mrf.mxu1 }
  0xcc   :  { %vm1107_vm9 = vcmp.ge.f32.partialorder %v1043_v25, 0.0  ;;  %v1171_v32 = vmul.f32 0.2, %v1043_v25 }
  0xcd   :  { %v1266_v34 = vsel %vm1138_vm8, %v1074_v15, %v1202_v29  ;;  %v669_v35 = vpop.f32.mrf.mxu2  ;;  %v1655_v15 = vor.u32 %v1825_v13, %v1654_v12  ;;  %v1536_v29 = vld [vmem:[%s2790_s0 + $0xd8] sm:$0xf0]  ;;  %v1544_v12 = vld [vmem:[%s2790_s0 + $0xe8] sm:$0xf0] }
  0xce   :  { %v1330_v37 = vpack.c.bf16 %v1266_v34, %v1266_v34  ;;  %v1235_v38 = vsel %vm1107_vm9, %v1043_v25, %v1171_v32  ;;  %v839_v39 = vadd.f32 %v2215_v33, %v669_v35  ;;  %v592_v40 = vpop.f32.mrf.mxu0  ;;  %v1826_v33 = vld [vmem:[%s2790_s0 + $0x1d4] sm:$0xf]  ;;  %v1672_v32 = vld [vmem:[%s2790_s0 + $0x1e8] sm:$0xf0] }
  0xcf   :  { %v1299_v42 = vpack.c.bf16 %v1235_v38, %v1235_v38  ;;  %v762_v43 = vadd.f32 %v761_v9, %v592_v40  ;;  %v1667_v55 = vor.u32 %v1826_v33, %v1664_v46 }
  0xd0   :  { %1395 = vst.msk [vmem:[%s2792_s3 + $0x8c] sm:$0xf] %vm1359_vm3, %v1330_v37 }
  0xd1   :  { %1364 = vst.msk [vmem:[%s2792_s3 + $0x10] sm:$0xf] %vm1359_vm3, %v1299_v42  ;;  %v1007_v47 = vld [vmem:[#allocation2 + $0x120] sm:$0xff]  ;;  %631 = vmatmul.bf16.gmra.mxu0 %v1519_v36  ;;  %v1539_v36 = vor.u32 %v1794_v27, %v1536_v29 }
  0xd2   :  { %v1075_v49 = vadd.f32 %v2173_v6, %v1007_v47  ;;  %v976_v50 = vld [vmem:[#allocation2 + $0x28] sm:$0xff]  ;;  %944 = vst.msk [vmem:[#allocation2 + $0x128] sm:$0xff] %vm906_vm1, %v839_v39  ;;  %711 = vmatmul.bf16.gmra.mxu2 %v1647_v41  ;;  %v2316_v52 = vpop.f32.mrf.mxu3 }
  0xd3   :  { %v1044_v53 = vadd.f32 %v2173_v6, %v976_v50  ;;  %913 = vst.msk [vmem:[#allocation2 + $0x30] sm:$0xff] %vm906_vm1, %v762_v43  ;;  %v766_v54 = vpop.f32.mrf.mxu1 }
  0xd4   :  { %vm1139_vm10 = vcmp.ge.f32.partialorder %v1075_v49, 0.0  ;;  %v1203_v56 = vmul.f32 0.2, %v1075_v49 }
  0xd5   :  { %vm1108_vm11 = vcmp.ge.f32.partialorder %v1044_v53, 0.0  ;;  %v1172_v57 = vmul.f32 0.2, %v1044_v53  ;;  %v672_v58 = vpop.f32.mrf.mxu2 }
  0xd6   :  { %v1267_v59 = vsel %vm1139_vm10, %v1075_v49, %v1203_v56  ;;  %v842_v60 = vadd.f32 %v2236_v48, %v672_v58  ;;  %1748 = vmatmul.msk.bf16.gmra.mxu1 %vm471_vm0, %v1531_v51  ;;  %v594_v61 = vpop.f32.mrf.mxu0  ;;  %v1526_v48 = vld [vmem:[%s2790_s0 + $0xc0] sm:$0xf] }
  0xd7   :  { %v1331_v62 = vpack.c.bf16 %v1267_v59, %v1267_v59  ;;  %v1236_v63 = vsel %vm1108_vm11, %v1044_v53, %v1172_v57  ;;  %v764_v0 = vadd.f32 %v763_v30, %v594_v61  ;;  %1765 = vmatmul.msk.bf16.gmra.mxu3 %vm471_vm0, %v1667_v55  ;;  %v1527_v18 = vor.u32 %v1793_v8, %v1526_v48  ;;  %v1795_v53 = vld [vmem:[%s2790_s0 + $0xd4] sm:$0xf0]  ;;  %v1662_v59 = vld [vmem:[%s2790_s0 + $0x1d0] sm:$0xf] }
  0xd8   :  { %v1300_v1 = vpack.c.bf16 %v1236_v63, %v1236_v63  ;;  %945 = vst.msk [vmem:[#allocation2 + $0x130] sm:$0xff] %vm906_vm1, %v842_v60  ;;  %v1827_v60 = vld [vmem:[%s2790_s0 + $0x1d4] sm:$0xf0] }
  0xd9   :  { %1396 = vst.msk [vmem:[%s2792_s3 + $0x90] sm:$0xf] %vm1359_vm3, %v1331_v62  ;;  %v1008_v2 = vld [vmem:[#allocation2 + $0x128] sm:$0xff] }
  0xda   :  { %1365 = vst.msk [vmem:[%s2792_s3 + $0x14] sm:$0xf] %vm1359_vm3, %v1300_v1  ;;  %v1076_v3 = vadd.f32 %v2173_v6, %v1008_v2  ;;  %v977_v4 = vld [vmem:[#allocation2 + $0x30] sm:$0xff]  ;;  %v2339_v9 = vpop.f32.mrf.mxu3 }
  0xdb   :  { %v1045_v10 = vadd.f32 %v2173_v6, %v977_v4  ;;  %914 = vst.msk [vmem:[#allocation2 + $0x38] sm:$0xff] %vm906_vm1, %v764_v0  ;;  %v768_v11 = vpop.f32.mrf.mxu1  ;;  %v1796_v4 = vld [vmem:[%s2790_s0 + $0xe4] sm:$0xf] }
  0xdc   :  { %vm1140_vm12 = vcmp.ge.f32.partialorder %v1076_v3, 0.0  ;;  %v1204_v14 = vmul.f32 0.2, %v1076_v3 }
  0xdd   :  { %vm1109_vm13 = vcmp.ge.f32.partialorder %v1045_v10, 0.0  ;;  %v1173_v16 = vmul.f32 0.2, %v1045_v10  ;;  %v674_v17 = vpop.f32.mrf.mxu2 }
  0xde   :  { %v1268_v19 = vsel %vm1140_vm12, %v1076_v3, %v1204_v14  ;;  %v844_v21 = vadd.f32 %v2262_v5, %v674_v17  ;;  %v597_v22 = vpop.f32.mrf.mxu0  ;;  %v1828_v5 = vld [vmem:[%s2790_s0 + $0x1e4] sm:$0xf]  ;;  %v1663_v3 = vor.u32 %v1827_v60, %v1662_v59  ;;  %v1680_v17 = vld [vmem:[%s2790_s0 + $0x1f8] sm:$0xf0] }
  0xdf   :  { %v1332_v23 = vpack.c.bf16 %v1268_v19, %v1268_v19  ;;  %v1237_v24 = vsel %vm1109_vm13, %v1045_v10, %v1173_v16  ;;  %v1009_v25 = vld [vmem:[#allocation2 + $0x130] sm:$0xff]  ;;  %v767_v26 = vadd.f32 %v766_v54, %v597_v22  ;;  %v1675_v40 = vor.u32 %v1828_v5, %v1672_v32 }
  0xe0   :  { %v1301_v30 = vpack.c.bf16 %v1237_v24, %v1237_v24  ;;  %v1077_v31 = vadd.f32 %v2173_v6, %v1009_v25  ;;  %946 = vst.msk [vmem:[#allocation2 + $0x138] sm:$0xff] %vm906_vm1, %v844_v21  ;;  %v1830_v16 = vld [vmem:[%s2790_s0 + $0x1f4] sm:$0xf]  ;;  %v1547_v21 = vor.u32 %v1796_v4, %v1544_v12 }
  0xe1   :  { %1397 = vst.msk [vmem:[%s2792_s3 + $0x94] sm:$0xf] %vm1359_vm3, %v1332_v23  ;;  %636 = vmatmul.bf16.gmra.mxu0 %v1527_v18  ;;  %v1683_v24 = vor.u32 %v1830_v16, %v1680_v17 }
  0xe2   :  { %1366 = vst.msk [vmem:[%s2792_s3 + $0x18] sm:$0xf] %vm1359_vm3, %v1301_v30  ;;  %vm1141_vm14 = vcmp.ge.f32.partialorder %v1077_v31, 0.0  ;;  %v1205_v34 = vmul.f32 0.2, %v1077_v31  ;;  %v978_v35 = vld [vmem:[#allocation2 + $0x38] sm:$0xff]  ;;  %716 = vmatmul.bf16.gmra.mxu2 %v1655_v15  ;;  %v2372_v37 = vpop.f32.mrf.mxu3 }
  0xe3   :  { %v1046_v38 = vadd.f32 %v2173_v6, %v978_v35  ;;  %915 = vst.msk [vmem:[#allocation2 + $0x40] sm:$0xff] %vm906_vm1, %v767_v26  ;;  %v771_v39 = vpop.f32.mrf.mxu1 }
  0xe4   :  { %v1269_v41 = vsel %vm1141_vm14, %v1077_v31, %v1205_v34 }
  0xe5   :  { %v1333_v42 = vpack.c.bf16 %v1269_v41, %v1269_v41  ;;  %vm1110_vm15 = vcmp.ge.f32.partialorder %v1046_v38, 0.0  ;;  %v1174_v43 = vmul.f32 0.2, %v1046_v38  ;;  %v677_v44 = vpop.f32.mrf.mxu2  ;;  %v1670_v41 = vld [vmem:[%s2790_s0 + $0x1e0] sm:$0xf] }
  0xe6   :  { %v847_v45 = vadd.f32 %v2287_v28, %v677_v44  ;;  %1749 = vmatmul.msk.bf16.gmra.mxu1 %vm471_vm0, %v1539_v36  ;;  %v599_v33 = vpop.f32.mrf.mxu0  ;;  %v1534_v28 = vld [vmem:[%s2790_s0 + $0xd0] sm:$0xf] }
  0xe7   :  { %1398 = vst.msk [vmem:[%s2792_s3 + $0x98] sm:$0xf] %vm1359_vm3, %v1333_v42  ;;  %v1238_v46 = vsel %vm1110_vm15, %v1046_v38, %v1174_v43  ;;  %v1010_v47 = vld [vmem:[#allocation2 + $0x138] sm:$0xff]  ;;  %v769_v49 = vadd.f32 %v768_v11, %v599_v33  ;;  %1766 = vmatmul.msk.bf16.gmra.mxu3 %vm471_vm0, %v1675_v40  ;;  %v1535_v1 = vor.u32 %v1795_v53, %v1534_v28  ;;  %v1542_v38 = vld [vmem:[%s2790_s0 + $0xe0] sm:$0xf] }
  0xe8   :  { %v1302_v50 = vpack.c.bf16 %v1238_v46, %v1238_v46  ;;  %v1078_v51 = vadd.f32 %v2173_v6, %v1010_v47  ;;  %947 = vst.msk [vmem:[#allocation2 + $0x140] sm:$0xff] %vm906_vm1, %v847_v45  ;;  %v1829_v45 = vld [vmem:[%s2790_s0 + $0x1e4] sm:$0xf0] }
  0xe9   :  { %916 = vst.msk [vmem:[#allocation2 + $0x48] sm:$0xff] %vm906_vm1, %v769_v49 }
  0xea   :  { %1367 = vst.msk [vmem:[%s2792_s3 + $0x1c] sm:$0xf] %vm1359_vm3, %v1302_v50  ;;  %vm1142_vm2 = vcmp.ge.f32.partialorder %v1078_v51, 0.0  ;;  %v1206_v54 = vmul.f32 0.2, %v1078_v51  ;;  %v979_v55 = vld [vmem:[#allocation2 + $0x40] sm:$0xff]  ;;  %v2396_v56 = vpop.f32.mrf.mxu3 }
  0xeb   :  { %v1047_v57 = vadd.f32 %v2173_v6, %v979_v55  ;;  %v773_v58 = vpop.f32.mrf.mxu1 }
  0xec   :  { %v1270_v61 = vsel %vm1142_vm2, %v1078_v51, %v1206_v54  ;;  %v1671_v54 = vor.u32 %v1829_v45, %v1670_v41 }
  0xed   :  { %v1334_v62 = vpack.c.bf16 %v1270_v61, %v1270_v61  ;;  %vm1111_vm4 = vcmp.ge.f32.partialorder %v1047_v57, 0.0  ;;  %v1175_v63 = vmul.f32 0.2, %v1047_v57  ;;  %v679_v0 = vpop.f32.mrf.mxu2 }
  0xee   :  { %v849_v2 = vadd.f32 %v2316_v52, %v679_v0  ;;  %v602_v48 = vpop.f32.mrf.mxu0 }
  0xef   :  { %1399 = vst.msk [vmem:[%s2792_s3 + $0x9c] sm:$0xf] %vm1359_vm3, %v1334_v62  ;;  %v1239_v8 = vsel %vm1111_vm4, %v1047_v57, %v1175_v63  ;;  %v1011_v10 = vld [vmem:[#allocation2 + $0x140] sm:$0xff]  ;;  %v772_v11 = vadd.f32 %v771_v39, %v602_v48  ;;  %v1797_v39 = vld [vmem:[%s2790_s0 + $0xe4] sm:$0xf0] }
  0xf0   :  { %v1303_v13 = vpack.c.bf16 %v1239_v8, %v1239_v8  ;;  %v1079_v52 = vadd.f32 %v2173_v6, %v1011_v10  ;;  %v980_v14 = vld [vmem:[#allocation2 + $0x48] sm:$0xff]  ;;  %948 = vst.msk [vmem:[#allocation2 + $0x148] sm:$0xff] %vm906_vm1, %v849_v2  ;;  %v1543_v50 = vor.u32 %v1797_v39, %v1542_v38  ;;  %v1798_v57 = vld [vmem:[%s2790_s0 + $0xf4] sm:$0xf] }
  0xf1   :  { %v1048_v18 = vadd.f32 %v2173_v6, %v980_v14  ;;  %917 = vst.msk [vmem:[#allocation2 + $0x50] sm:$0xff] %vm906_vm1, %v772_v11  ;;  %641 = vmatmul.bf16.gmra.mxu0 %v1535_v1  ;;  %v1560_v38 = vld [vmem:[%s2790_s0 + $0x108] sm:$0xf0] }
  0xf2   :  { %1368 = vst.msk [vmem:[%s2792_s3 + $0x20] sm:$0xf] %vm1359_vm3, %v1303_v13  ;;  %vm1143_vm5 = vcmp.ge.f32.partialorder %v1079_v52, 0.0  ;;  %v1207_v19 = vmul.f32 0.2, %v1079_v52  ;;  %721 = vmatmul.bf16.gmra.mxu2 %v1663_v3  ;;  %v2430_v22 = vpop.f32.mrf.mxu3 }
  0xf3   :  { %vm1112_vm6 = vcmp.ge.f32.partialorder %v1048_v18, 0.0  ;;  %v1176_v15 = vmul.f32 0.2, %v1048_v18  ;;  %v776_v23 = vpop.f32.mrf.mxu1 }
  0xf4   :  { %v1271_v25 = vsel %vm1143_vm5, %v1079_v52, %v1207_v19  ;;  %v1678_v19 = vld [vmem:[%s2790_s0 + $0x1f0] sm:$0xf] }
  0xf5   :  { %v1335_v26 = vpack.c.bf16 %v1271_v25, %v1271_v25  ;;  %v1240_v27 = vsel %vm1112_vm6, %v1048_v18, %v1176_v15  ;;  %v682_v29 = vpop.f32.mrf.mxu2  ;;  %v1799_v18 = vld [vmem:[%s2790_s0 + $0xf4] sm:$0xf0] }
  0xf6   :  { %v1304_v30 = vpack.c.bf16 %v1240_v27, %v1240_v27  ;;  %v852_v31 = vadd.f32 %v2339_v9, %v682_v29  ;;  %1750 = vmatmul.msk.bf16.gmra.mxu1 %vm471_vm0, %v1547_v21  ;;  %v604_v5 = vpop.f32.mrf.mxu0 }
  0xf7   :  { %1400 = vst.msk [vmem:[%s2792_s3 + $0xa0] sm:$0xf] %vm1359_vm3, %v1335_v26  ;;  %v1012_v32 = vld [vmem:[#allocation2 + $0x148] sm:$0xff]  ;;  %v774_v34 = vadd.f32 %v773_v58, %v604_v5  ;;  %1767 = vmatmul.msk.bf16.gmra.mxu3 %vm471_vm0, %v1683_v24  ;;  %v1552_v58 = vld [vmem:[%s2790_s0 + $0xf8] sm:$0xf0] }
  0xf8   :  { %1369 = vst.msk [vmem:[%s2792_s3 + $0x24] sm:$0xf] %vm1359_vm3, %v1304_v30  ;;  %v1080_v35 = vadd.f32 %v2173_v6, %v1012_v32  ;;  %v981_v9 = vld [vmem:[#allocation2 + $0x50] sm:$0xff]  ;;  %v1555_v62 = vor.u32 %v1798_v57, %v1552_v58  ;;  %v1831_v24 = vld [vmem:[%s2790_s0 + $0x1f4] sm:$0xf0] }
  0xf9   :  { %v1049_v36 = vadd.f32 %v2173_v6, %v981_v9  ;;  %949 = vst.msk [vmem:[#allocation2 + $0x150] sm:$0xff] %vm906_vm1, %v852_v31 }
  0xfa   :  { %vm1144_vm7 = vcmp.ge.f32.partialorder %v1080_v35, 0.0  ;;  %v1208_v40 = vmul.f32 0.2, %v1080_v35  ;;  %918 = vst.msk [vmem:[#allocation2 + $0x58] sm:$0xff] %vm906_vm1, %v774_v34  ;;  %v2456_v42 = vpop.f32.mrf.mxu3  ;;  %v1679_v34 = vor.u32 %v1831_v24, %v1678_v19 }
  0xfb   :  { %vm1113_vm8 = vcmp.ge.f32.partialorder %v1049_v36, 0.0  ;;  %v1177_v43 = vmul.f32 0.2, %v1049_v36  ;;  %v778_v44 = vpop.f32.mrf.mxu1 }
  0xfc   :  { %v1272_v33 = vsel %vm1144_vm7, %v1080_v35, %v1208_v40 }
  0xfd   :  { %v1336_v46 = vpack.c.bf16 %v1272_v33, %v1272_v33  ;;  %v1241_v47 = vsel %vm1113_vm8, %v1049_v36, %v1177_v43  ;;  %v684_v49 = vpop.f32.mrf.mxu2  ;;  %v1800_v36 = vld [vmem:[%s2790_s0 + $0x104] sm:$0xf] }
  0xfe   :  { %v1305_v51 = vpack.c.bf16 %v1241_v47, %v1241_v47  ;;  %v854_v28 = vadd.f32 %v2372_v37, %v684_v49  ;;  %v607_v53 = vpop.f32.mrf.mxu0  ;;  %v1563_v41 = vor.u32 %v1800_v36, %v1560_v38 }
  0xff   :  { %1401 = vst.msk [vmem:[%s2792_s3 + $0xa4] sm:$0xf] %vm1359_vm3, %v1336_v46  ;;  %v777_v55 = vadd.f32 %v776_v23, %v607_v53 }
 0x100   :  { %1370 = vst.msk [vmem:[%s2792_s3 + $0x28] sm:$0xf] %vm1359_vm3, %v1305_v51  ;;  %v1013_v37 = vld [vmem:[#allocation2 + $0x150] sm:$0xff] }
 0x101   :  { %v1081_v59 = vadd.f32 %v2173_v6, %v1013_v37  ;;  %v982_v60 = vld [vmem:[#allocation2 + $0x58] sm:$0xff]  ;;  %950 = vst.msk [vmem:[#allocation2 + $0x158] sm:$0xff] %vm906_vm1, %v854_v28  ;;  %646 = vmatmul.bf16.gmra.mxu0 %v1543_v50 }
 0x102   :  { %v1050_v61 = vadd.f32 %v2173_v6, %v982_v60  ;;  %919 = vst.msk [vmem:[#allocation2 + $0x60] sm:$0xff] %vm906_vm1, %v777_v55  ;;  %726 = vmatmul.bf16.gmra.mxu2 %v1671_v54  ;;  %v2480_v63 = vpop.f32.mrf.mxu3 }
 0x103   :  { %vm1145_vm9 = vcmp.ge.f32.partialorder %v1081_v59, 0.0  ;;  %v1209_v0 = vmul.f32 0.2, %v1081_v59  ;;  %v781_v1 = vpop.f32.mrf.mxu1 }
 0x104   :  { %vm1114_vm10 = vcmp.ge.f32.partialorder %v1050_v61, 0.0  ;;  %v1178_v2 = vmul.f32 0.2, %v1050_v61 }
 0x105   :  { %v1273_v48 = vsel %vm1145_vm9, %v1081_v59, %v1209_v0  ;;  %v687_v3 = vpop.f32.mrf.mxu2 }
 0x106   :  { %v1337_v4 = vpack.c.bf16 %v1273_v48, %v1273_v48  ;;  %v1242_v8 = vsel %vm1114_vm10, %v1050_v61, %v1178_v2  ;;  %v857_v10 = vadd.f32 %v2396_v56, %v687_v3  ;;  %1751 = vmatmul.msk.bf16.gmra.mxu1 %vm471_vm0, %v1555_v62  ;;  %v609_v11 = vpop.f32.mrf.mxu0  ;;  %v1550_v56 = vld [vmem:[%s2790_s0 + $0xf0] sm:$0xf] }
 0x107   :  { %v1306_v12 = vpack.c.bf16 %v1242_v8, %v1242_v8  ;;  %v779_v13 = vadd.f32 %v778_v44, %v609_v11  ;;  %v1551_v29 = vor.u32 %v1799_v18, %v1550_v56 }
 0x108   :  { %1402 = vst.msk [vmem:[%s2792_s3 + $0xa8] sm:$0xf] %vm1359_vm3, %v1337_v4  ;;  %v1014_v52 = vld [vmem:[#allocation2 + $0x158] sm:$0xff] }
 0x109   :  { %1371 = vst.msk [vmem:[%s2792_s3 + $0x2c] sm:$0xf] %vm1359_vm3, %v1306_v12  ;;  %v1082_v14 = vadd.f32 %v2173_v6, %v1014_v52  ;;  %v983_v16 = vld [vmem:[#allocation2 + $0x60] sm:$0xff] }
 0x10a   :  { %v1051_v17 = vadd.f32 %v2173_v6, %v983_v16  ;;  %951 = vst.msk [vmem:[#allocation2 + $0x160] sm:$0xff] %vm906_vm1, %v857_v10  ;;  %v2504_v21 = vpop.f32.mrf.mxu3 }
 0x10b   :  { %vm1146_vm11 = vcmp.ge.f32.partialorder %v1082_v14, 0.0  ;;  %v1210_v15 = vmul.f32 0.2, %v1082_v14  ;;  %920 = vst.msk [vmem:[#allocation2 + $0x68] sm:$0xff] %vm906_vm1, %v779_v13  ;;  %v783_v23 = vpop.f32.mrf.mxu1 }
 0x10c   :  { %vm1115_vm12 = vcmp.ge.f32.partialorder %v1051_v17, 0.0  ;;  %v1179_v25 = vmul.f32 0.2, %v1051_v17 }
 0x10d   :  { %v1274_v26 = vsel %vm1146_vm11, %v1082_v14, %v1210_v15  ;;  %v689_v27 = vpop.f32.mrf.mxu2 }
 0x10e   :  { %v1338_v30 = vpack.c.bf16 %v1274_v26, %v1274_v26  ;;  %v1243_v31 = vsel %vm1115_vm12, %v1051_v17, %v1179_v25  ;;  %v859_v5 = vadd.f32 %v2430_v22, %v689_v27  ;;  %v612_v32 = vpop.f32.mrf.mxu0 }
 0x10f   :  { %v1307_v35 = vpack.c.bf16 %v1243_v31, %v1243_v31  ;;  %v782_v9 = vadd.f32 %v781_v1, %v612_v32 }
 0x110   :  { %1403 = vst.msk [vmem:[%s2792_s3 + $0xac] sm:$0xf] %vm1359_vm3, %v1338_v30 }
 0x111   :  { %1372 = vst.msk [vmem:[%s2792_s3 + $0x30] sm:$0xf] %vm1359_vm3, %v1307_v35  ;;  %v1015_v22 = vld [vmem:[#allocation2 + $0x160] sm:$0xff]  ;;  %651 = vmatmul.bf16.gmra.mxu0 %v1551_v29 }
 0x112   :  { %v1083_v39 = vadd.f32 %v2173_v6, %v1015_v22  ;;  %v984_v40 = vld [vmem:[#allocation2 + $0x68] sm:$0xff]  ;;  %952 = vst.msk [vmem:[#allocation2 + $0x168] sm:$0xff] %vm906_vm1, %v859_v5  ;;  %731 = vmatmul.bf16.gmra.mxu2 %v1679_v34  ;;  %v2527_v43 = vpop.f32.mrf.mxu3 }
 0x113   :  { %v1052_v44 = vadd.f32 %v2173_v6, %v984_v40  ;;  %921 = vst.msk [vmem:[#allocation2 + $0x70] sm:$0xff] %vm906_vm1, %v782_v9  ;;  %v786_v45 = vpop.f32.mrf.mxu1 }
 0x114   :  { %vm1147_vm13 = vcmp.ge.f32.partialorder %v1083_v39, 0.0  ;;  %v1211_v33 = vmul.f32 0.2, %v1083_v39 }
 0x115   :  { %vm1116_vm14 = vcmp.ge.f32.partialorder %v1052_v44, 0.0  ;;  %v1180_v46 = vmul.f32 0.2, %v1052_v44  ;;  %v692_v47 = vpop.f32.mrf.mxu2 }
 0x116   :  { %v1275_v49 = vsel %vm1147_vm13, %v1083_v39, %v1211_v33  ;;  %v862_v50 = vadd.f32 %v2456_v42, %v692_v47  ;;  %1752 = vmatmul.msk.bf16.gmra.mxu1 %vm471_vm0, %v1563_v41  ;;  %v614_v51 = vpop.f32.mrf.mxu0 }
 0x117   :  { %v1339_v28 = vpack.c.bf16 %v1275_v49, %v1275_v49  ;;  %v1244_v53 = vsel %vm1116_vm14, %v1052_v44, %v1180_v46  ;;  %v784_v54 = vadd.f32 %v783_v23, %v614_v51 }
 0x118   :  { %v1308_v55 = vpack.c.bf16 %v1244_v53, %v1244_v53  ;;  %953 = vst.msk [vmem:[#allocation2 + $0x170] sm:$0xff] %vm906_vm1, %v862_v50 }
 0x119   :  { %1404 = vst.msk [vmem:[%s2792_s3 + $0xb0] sm:$0xf] %vm1359_vm3, %v1339_v28  ;;  %v1016_v57 = vld [vmem:[#allocation2 + $0x168] sm:$0xff] }
 0x11a   :  { %1373 = vst.msk [vmem:[%s2792_s3 + $0x34] sm:$0xf] %vm1359_vm3, %v1308_v55  ;;  %v1084_v42 = vadd.f32 %v2173_v6, %v1016_v57  ;;  %v985_v58 = vld [vmem:[#allocation2 + $0x70] sm:$0xff]  ;;  %v2545_v60 = vpop.f32.mrf.mxu3 }
 0x11b   :  { %v1053_v37 = vadd.f32 %v2173_v6, %v985_v58  ;;  %922 = vst.msk [vmem:[#allocation2 + $0x78] sm:$0xff] %vm906_vm1, %v784_v54  ;;  %v788_v59 = vpop.f32.mrf.mxu1 }
 0x11c   :  { %vm1148_vm0 = vcmp.ge.f32.partialorder %v1084_v42, 0.0  ;;  %v1212_v61 = vmul.f32 0.2, %v1084_v42 }
 0x11d   :  { %vm1117_vm15 = vcmp.ge.f32.partialorder %v1053_v37, 0.0  ;;  %v1181_v62 = vmul.f32 0.2, %v1053_v37  ;;  %v694_v0 = vpop.f32.mrf.mxu2 }
 0x11e   :  { %v1276_v1 = vsel %vm1148_vm0, %v1084_v42, %v1212_v61  ;;  %v864_v2 = vadd.f32 %v2480_v63, %v694_v0  ;;  %v617_v48 = vpop.f32.mrf.mxu0 }
 0x11f   :  { %v1340_v3 = vpack.c.bf16 %v1276_v1, %v1276_v1  ;;  %v1245_v4 = vsel %vm1117_vm15, %v1053_v37, %v1181_v62  ;;  %v1017_v8 = vld [vmem:[#allocation2 + $0x170] sm:$0xff]  ;;  %v787_v10 = vadd.f32 %v786_v45, %v617_v48 }
 0x120   :  { %v1309_v11 = vpack.c.bf16 %v1245_v4, %v1245_v4  ;;  %v1085_v12 = vadd.f32 %v2173_v6, %v1017_v8  ;;  %954 = vst.msk [vmem:[#allocation2 + $0x178] sm:$0xff] %vm906_vm1, %v864_v2 }
 0x121   :  { %1405 = vst.msk [vmem:[%s2792_s3 + $0xb4] sm:$0xf] %vm1359_vm3, %v1340_v3 }
 0x122   :  { %1374 = vst.msk [vmem:[%s2792_s3 + $0x38] sm:$0xf] %vm1359_vm3, %v1309_v11  ;;  %vm1149_vm2 = vcmp.ge.f32.partialorder %v1085_v12, 0.0  ;;  %v1213_v63 = vmul.f32 0.2, %v1085_v12  ;;  %v986_v13 = vld [vmem:[#allocation2 + $0x78] sm:$0xff]  ;;  %v2560_v19 = vpop.f32.mrf.mxu3 }
 0x123   :  { %v1054_v52 = vadd.f32 %v2173_v6, %v986_v13  ;;  %923 = vst.msk [vmem:[#allocation2 + $0x80] sm:$0xff] %vm906_vm1, %v787_v10  ;;  %v791_v14 = vpop.f32.mrf.mxu1 }
 0x124   :  { %v1277_v16 = vsel %vm1149_vm2, %v1085_v12, %v1213_v63 }
 0x125   :  { %v1341_v56 = vpack.c.bf16 %v1277_v16, %v1277_v16  ;;  %vm1118_vm4 = vcmp.ge.f32.partialorder %v1054_v52, 0.0  ;;  %v1182_v17 = vmul.f32 0.2, %v1054_v52  ;;  %v697_v18 = vpop.f32.mrf.mxu2 }
 0x126   :  { %v867_v15 = vadd.f32 %v2504_v21, %v697_v18  ;;  %v619_v23 = vpop.f32.mrf.mxu0 }
 0x127   :  { %1406 = vst.msk [vmem:[%s2792_s3 + $0xb8] sm:$0xf] %vm1359_vm3, %v1341_v56  ;;  %v1246_v24 = vsel %vm1118_vm4, %v1054_v52, %v1182_v17  ;;  %v1018_v25 = vld [vmem:[#allocation2 + $0x178] sm:$0xff]  ;;  %v789_v26 = vadd.f32 %v788_v59, %v619_v23 }
 0x128   :  { %v1310_v27 = vpack.c.bf16 %v1246_v24, %v1246_v24  ;;  %v1086_v29 = vadd.f32 %v2173_v6, %v1018_v25  ;;  %955 = vst.msk [vmem:[#allocation2 + $0x180] sm:$0xff] %vm906_vm1, %v867_v15 }
 0x129   :  { %924 = vst.msk [vmem:[#allocation2 + $0x88] sm:$0xff] %vm906_vm1, %v789_v26 }
 0x12a   :  { %1375 = vst.msk [vmem:[%s2792_s3 + $0x3c] sm:$0xf] %vm1359_vm3, %v1310_v27  ;;  %vm1150_vm5 = vcmp.ge.f32.partialorder %v1086_v29, 0.0  ;;  %v1214_v21 = vmul.f32 0.2, %v1086_v29  ;;  %v987_v30 = vld [vmem:[#allocation2 + $0x80] sm:$0xff]  ;;  %v876_v41 = vpop.f32.mrf.mxu3 }
 0x12b   :  { %v1055_v31 = vadd.f32 %v2173_v6, %v987_v30  ;;  %v793_v5 = vpop.f32.mrf.mxu1 }
 0x12c   :  { %v1278_v32 = vsel %vm1150_vm5, %v1086_v29, %v1214_v21  ;;  %v2625_v21 = vld [vmem:[%s2791_s2] ss:$0 sm:$0xff] }
 0x12d   :  { %v1342_v34 = vpack.c.bf16 %v1278_v32, %v1278_v32  ;;  %vm1119_vm6 = vcmp.ge.f32.partialorder %v1055_v31, 0.0  ;;  %v1183_v35 = vmul.f32 0.2, %v1055_v31  ;;  %v699_v9 = vpop.f32.mrf.mxu2 }
 0x12e   :  { %v869_v36 = vadd.f32 %v2527_v43, %v699_v9  ;;  %v622_v38 = vpop.f32.mrf.mxu0 }
 0x12f   :  { %1407 = vst.msk [vmem:[%s2792_s3 + $0xbc] sm:$0xf] %vm1359_vm3, %v1342_v34  ;;  %v1247_v22 = vsel %vm1119_vm6, %v1055_v31, %v1183_v35  ;;  %v1019_v39 = vld [vmem:[#allocation2 + $0x180] sm:$0xff]  ;;  %v792_v40 = vadd.f32 %v791_v14, %v622_v38 }
 0x130   :  { %v1311_v44 = vpack.c.bf16 %v1247_v22, %v1247_v22  ;;  %v1087_v45 = vadd.f32 %v2173_v6, %v1019_v39  ;;  %v988_v33 = vld [vmem:[#allocation2 + $0x88] sm:$0xff]  ;;  %956 = vst.msk [vmem:[#allocation2 + $0x188] sm:$0xff] %vm906_vm1, %v869_v36 }
 0x131   :  { %v1056_v46 = vadd.f32 %v2173_v6, %v988_v33  ;;  %925 = vst.msk [vmem:[#allocation2 + $0x90] sm:$0xff] %vm906_vm1, %v792_v40 }
 0x132   :  { %1376 = vst.msk [vmem:[%s2792_s3 + $0x40] sm:$0xf] %vm1359_vm3, %v1311_v44  ;;  %vm1151_vm7 = vcmp.ge.f32.partialorder %v1087_v45, 0.0  ;;  %v1215_v43 = vmul.f32 0.2, %v1087_v45 }
 0x133   :  { %vm1120_vm8 = vcmp.ge.f32.partialorder %v1056_v46, 0.0  ;;  %v1184_v47 = vmul.f32 0.2, %v1056_v46  ;;  %v796_v49 = vpop.f32.mrf.mxu1 }
 0x134   :  { %v1279_v50 = vsel %vm1151_vm7, %v1087_v45, %v1215_v43 }
 0x135   :  { %v1343_v51 = vpack.c.bf16 %v1279_v50, %v1279_v50  ;;  %v1248_v28 = vsel %vm1120_vm8, %v1056_v46, %v1184_v47  ;;  %v702_v53 = vpop.f32.mrf.mxu2 }
 0x136   :  { %v1312_v54 = vpack.c.bf16 %v1248_v28, %v1248_v28  ;;  %v872_v55 = vadd.f32 %v2545_v60, %v702_v53  ;;  %v624_v57 = vpop.f32.mrf.mxu0  ;;  %v878_v60 = vpop.f32.mrf.mxu3 }
 0x137   :  { %1408 = vst.msk [vmem:[%s2792_s3 + $0xc0] sm:$0xf] %vm1359_vm3, %v1343_v51  ;;  %v1020_v42 = vld [vmem:[#allocation2 + $0x188] sm:$0xff]  ;;  %v794_v58 = vadd.f32 %v793_v5, %v624_v57 }
 0x138   :  { %1377 = vst.msk [vmem:[%s2792_s3 + $0x44] sm:$0xf] %vm1359_vm3, %v1312_v54  ;;  %v1088_v37 = vadd.f32 %v2173_v6, %v1020_v42  ;;  %v989_v59 = vld [vmem:[#allocation2 + $0x90] sm:$0xff] }
 0x139   :  { %v1057_v61 = vadd.f32 %v2173_v6, %v989_v59  ;;  %957 = vst.msk [vmem:[#allocation2 + $0x190] sm:$0xff] %vm906_vm1, %v872_v55 }
 0x13a   :  { %vm1152_vm9 = vcmp.ge.f32.partialorder %v1088_v37, 0.0  ;;  %v1216_v62 = vmul.f32 0.2, %v1088_v37  ;;  %926 = vst.msk [vmem:[#allocation2 + $0x98] sm:$0xff] %vm906_vm1, %v794_v58 }
 0x13b   :  { %vm1121_vm10 = vcmp.ge.f32.partialorder %v1057_v61, 0.0  ;;  %v1185_v0 = vmul.f32 0.2, %v1057_v61  ;;  %v798_v1 = vpop.f32.mrf.mxu1 }
 0x13c   :  { %v1280_v2 = vsel %vm1152_vm9, %v1088_v37, %v1216_v62 }
 0x13d   :  { %v1344_v48 = vpack.c.bf16 %v1280_v2, %v1280_v2  ;;  %v1249_v3 = vsel %vm1121_vm10, %v1057_v61, %v1185_v0  ;;  %v704_v4 = vpop.f32.mrf.mxu2 }
 0x13e   :  { %v1313_v8 = vpack.c.bf16 %v1249_v3, %v1249_v3  ;;  %v874_v10 = vadd.f32 %v2560_v19, %v704_v4  ;;  %v627_v11 = vpop.f32.mrf.mxu0  ;;  %v881_v17 = vpop.f32.mrf.mxu3 }
 0x13f   :  { %1409 = vst.msk [vmem:[%s2792_s3 + $0xc4] sm:$0xf] %vm1359_vm3, %v1344_v48  ;;  %v797_v12 = vadd.f32 %v796_v49, %v627_v11 }
 0x140   :  { %1378 = vst.msk [vmem:[%s2792_s3 + $0x48] sm:$0xf] %vm1359_vm3, %v1313_v8  ;;  %v1021_v63 = vld [vmem:[#allocation2 + $0x190] sm:$0xff] }
 0x141   :  { %v1089_v13 = vadd.f32 %v2173_v6, %v1021_v63  ;;  %v990_v52 = vld [vmem:[#allocation2 + $0x98] sm:$0xff]  ;;  %958 = vst.msk [vmem:[#allocation2 + $0x198] sm:$0xff] %vm906_vm1, %v874_v10 }
 0x142   :  { %v1058_v14 = vadd.f32 %v2173_v6, %v990_v52  ;;  %927 = vst.msk [vmem:[#allocation2 + $0xa0] sm:$0xff] %vm906_vm1, %v797_v12 }
 0x143   :  { %vm1153_vm11 = vcmp.ge.f32.partialorder %v1089_v13, 0.0  ;;  %v1217_v16 = vmul.f32 0.2, %v1089_v13  ;;  %v801_v56 = vpop.f32.mrf.mxu1 }
 0x144   :  { %vm1122_vm12 = vcmp.ge.f32.partialorder %v1058_v14, 0.0  ;;  %v1186_v18 = vmul.f32 0.2, %v1058_v14 }
 0x145   :  { %v1281_v19 = vsel %vm1153_vm11, %v1089_v13, %v1217_v16  ;;  %v707_v15 = vpop.f32.mrf.mxu2 }
 0x146   :  { %v1345_v23 = vpack.c.bf16 %v1281_v19, %v1281_v19  ;;  %v1250_v24 = vsel %vm1122_vm12, %v1058_v14, %v1186_v18  ;;  %v877_v25 = vadd.f32 %v876_v41, %v707_v15  ;;  %v629_v26 = vpop.f32.mrf.mxu0  ;;  %v883_v38 = vpop.f32.mrf.mxu3 }
 0x147   :  { %v1314_v27 = vpack.c.bf16 %v1250_v24, %v1250_v24  ;;  %v799_v29 = vadd.f32 %v798_v1, %v629_v26 }
 0x148   :  { %1410 = vst.msk [vmem:[%s2792_s3 + $0xc8] sm:$0xf] %vm1359_vm3, %v1345_v23  ;;  %v1022_v6 = vld [vmem:[#allocation2 + $0x198] sm:$0xff] }
 0x149   :  { %1379 = vst.msk [vmem:[%s2792_s3 + $0x4c] sm:$0xf] %vm1359_vm3, %v1314_v27  ;;  %v1090_v30 = vadd.f32 %v2625_v21, %v1022_v6  ;;  %v991_v31 = vld [vmem:[#allocation2 + $0xa0] sm:$0xff] }
 0x14a   :  { %v1059_v5 = vadd.f32 %v2625_v21, %v991_v31  ;;  %959 = vst.msk [vmem:[#allocation2 + $0x1a0] sm:$0xff] %vm906_vm1, %v877_v25 }
 0x14b   :  { %vm1154_vm13 = vcmp.ge.f32.partialorder %v1090_v30, 0.0  ;;  %v1218_v32 = vmul.f32 0.2, %v1090_v30  ;;  %928 = vst.msk [vmem:[#allocation2 + $0xa8] sm:$0xff] %vm906_vm1, %v799_v29  ;;  %v803_v34 = vpop.f32.mrf.mxu1 }
 0x14c   :  { %vm1123_vm14 = vcmp.ge.f32.partialorder %v1059_v5, 0.0  ;;  %v1187_v35 = vmul.f32 0.2, %v1059_v5 }
 0x14d   :  { %v1282_v9 = vsel %vm1154_vm13, %v1090_v30, %v1218_v32  ;;  %v709_v36 = vpop.f32.mrf.mxu2 }
 0x14e   :  { %v1346_v22 = vpack.c.bf16 %v1282_v9, %v1282_v9  ;;  %v1251_v39 = vsel %vm1123_vm14, %v1059_v5, %v1187_v35  ;;  %v879_v40 = vadd.f32 %v878_v60, %v709_v36  ;;  %v632_v41 = vpop.f32.mrf.mxu0  ;;  %v886_v37 = vpop.f32.mrf.mxu3 }
 0x14f   :  { %v1315_v44 = vpack.c.bf16 %v1251_v39, %v1251_v39  ;;  %v802_v45 = vadd.f32 %v801_v56, %v632_v41 }
 0x150   :  { %1411 = vst.msk [vmem:[%s2792_s3 + $0xcc] sm:$0xf] %vm1359_vm3, %v1346_v22 }
 0x151   :  { %1380 = vst.msk [vmem:[%s2792_s3 + $0x50] sm:$0xf] %vm1359_vm3, %v1315_v44  ;;  %v1023_v33 = vld [vmem:[#allocation2 + $0x1a0] sm:$0xff] }
 0x152   :  { %v1091_v46 = vadd.f32 %v2625_v21, %v1023_v33  ;;  %v992_v43 = vld [vmem:[#allocation2 + $0xa8] sm:$0xff]  ;;  %960 = vst.msk [vmem:[#allocation2 + $0x1a8] sm:$0xff] %vm906_vm1, %v879_v40 }
 0x153   :  { %v1060_v47 = vadd.f32 %v2625_v21, %v992_v43  ;;  %929 = vst.msk [vmem:[#allocation2 + $0xb0] sm:$0xff] %vm906_vm1, %v802_v45  ;;  %v806_v49 = vpop.f32.mrf.mxu1 }
 0x154   :  { %vm1155_vm0 = vcmp.ge.f32.partialorder %v1091_v46, 0.0  ;;  %v1219_v50 = vmul.f32 0.2, %v1091_v46 }
 0x155   :  { %vm1124_vm15 = vcmp.ge.f32.partialorder %v1060_v47, 0.0  ;;  %v1188_v51 = vmul.f32 0.2, %v1060_v47  ;;  %v712_v28 = vpop.f32.mrf.mxu2 }
 0x156   :  { %v1283_v53 = vsel %vm1155_vm0, %v1091_v46, %v1219_v50  ;;  %v882_v54 = vadd.f32 %v881_v17, %v712_v28  ;;  %v634_v55 = vpop.f32.mrf.mxu0  ;;  %v888_v16 = vpop.f32.mrf.mxu3 }
 0x157   :  { %v1347_v57 = vpack.c.bf16 %v1283_v53, %v1283_v53  ;;  %v1252_v42 = vsel %vm1124_vm15, %v1060_v47, %v1188_v51  ;;  %v804_v58 = vadd.f32 %v803_v34, %v634_v55 }
 0x158   :  { %v1316_v59 = vpack.c.bf16 %v1252_v42, %v1252_v42  ;;  %961 = vst.msk [vmem:[#allocation2 + $0x1b0] sm:$0xff] %vm906_vm1, %v882_v54 }
 0x159   :  { %1412 = vst.msk [vmem:[%s2792_s3 + $0xd0] sm:$0xf] %vm1359_vm3, %v1347_v57  ;;  %v1024_v61 = vld [vmem:[#allocation2 + $0x1a8] sm:$0xff] }
 0x15a   :  { %1381 = vst.msk [vmem:[%s2792_s3 + $0x54] sm:$0xf] %vm1359_vm3, %v1316_v59  ;;  %v1092_v60 = vadd.f32 %v2625_v21, %v1024_v61  ;;  %v993_v62 = vld [vmem:[#allocation2 + $0xb0] sm:$0xff] }
 0x15b   :  { %v1061_v0 = vadd.f32 %v2625_v21, %v993_v62  ;;  %930 = vst.msk [vmem:[#allocation2 + $0xb8] sm:$0xff] %vm906_vm1, %v804_v58  ;;  %v808_v1 = vpop.f32.mrf.mxu1 }
 0x15c   :  { %vm1156_vm2 = vcmp.ge.f32.partialorder %v1092_v60, 0.0  ;;  %v1220_v2 = vmul.f32 0.2, %v1092_v60 }
 0x15d   :  { %vm1125_vm4 = vcmp.ge.f32.partialorder %v1061_v0, 0.0  ;;  %v1189_v48 = vmul.f32 0.2, %v1061_v0  ;;  %v714_v3 = vpop.f32.mrf.mxu2 }
 0x15e   :  { %v1284_v4 = vsel %vm1156_vm2, %v1092_v60, %v1220_v2  ;;  %v884_v8 = vadd.f32 %v883_v38, %v714_v3  ;;  %v637_v10 = vpop.f32.mrf.mxu0  ;;  %v891_v36 = vpop.f32.mrf.mxu3 }
 0x15f   :  { %v1348_v11 = vpack.c.bf16 %v1284_v4, %v1284_v4  ;;  %v1253_v12 = vsel %vm1125_vm4, %v1061_v0, %v1189_v48  ;;  %v1025_v63 = vld [vmem:[#allocation2 + $0x1b0] sm:$0xff]  ;;  %v807_v13 = vadd.f32 %v806_v49, %v637_v10 }
 0x160   :  { %v1317_v52 = vpack.c.bf16 %v1253_v12, %v1253_v12  ;;  %v1093_v14 = vadd.f32 %v2625_v21, %v1025_v63  ;;  %962 = vst.msk [vmem:[#allocation2 + $0x1b8] sm:$0xff] %vm906_vm1, %v884_v8 }
 0x161   :  { %1413 = vst.msk [vmem:[%s2792_s3 + $0xd4] sm:$0xf] %vm1359_vm3, %v1348_v11 }
 0x162   :  { %1382 = vst.msk [vmem:[%s2792_s3 + $0x58] sm:$0xf] %vm1359_vm3, %v1317_v52  ;;  %vm1157_vm5 = vcmp.ge.f32.partialorder %v1093_v14, 0.0  ;;  %v1221_v56 = vmul.f32 0.2, %v1093_v14  ;;  %v994_v17 = vld [vmem:[#allocation2 + $0xb8] sm:$0xff] }
 0x163   :  { %v1062_v18 = vadd.f32 %v2625_v21, %v994_v17  ;;  %931 = vst.msk [vmem:[#allocation2 + $0xc0] sm:$0xff] %vm906_vm1, %v807_v13  ;;  %v811_v19 = vpop.f32.mrf.mxu1 }
 0x164   :  { %v1285_v15 = vsel %vm1157_vm5, %v1093_v14, %v1221_v56 }
 0x165   :  { %v1349_v23 = vpack.c.bf16 %v1285_v15, %v1285_v15  ;;  %vm1126_vm6 = vcmp.ge.f32.partialorder %v1062_v18, 0.0  ;;  %v1190_v24 = vmul.f32 0.2, %v1062_v18  ;;  %v717_v25 = vpop.f32.mrf.mxu2 }
 0x166   :  { %v887_v26 = vadd.f32 %v886_v37, %v717_v25  ;;  %v639_v27 = vpop.f32.mrf.mxu0  ;;  %v893_v58 = vpop.f32.mrf.mxu3 }
 0x167   :  { %1414 = vst.msk [vmem:[%s2792_s3 + $0xd8] sm:$0xf] %vm1359_vm3, %v1349_v23  ;;  %v1254_v29 = vsel %vm1126_vm6, %v1062_v18, %v1190_v24  ;;  %v1026_v6 = vld [vmem:[#allocation2 + $0x1b8] sm:$0xff]  ;;  %v809_v30 = vadd.f32 %v808_v1, %v639_v27 }
 0x168   :  { %v1318_v31 = vpack.c.bf16 %v1254_v29, %v1254_v29  ;;  %v1094_v5 = vadd.f32 %v2625_v21, %v1026_v6  ;;  %963 = vst.msk [vmem:[#allocation2 + $0x1c0] sm:$0xff] %vm906_vm1, %v887_v26 }
 0x169   :  { %932 = vst.msk [vmem:[#allocation2 + $0xc8] sm:$0xff] %vm906_vm1, %v809_v30 }
 0x16a   :  { %1383 = vst.msk [vmem:[%s2792_s3 + $0x5c] sm:$0xf] %vm1359_vm3, %v1318_v31  ;;  %vm1158_vm7 = vcmp.ge.f32.partialorder %v1094_v5, 0.0  ;;  %v1222_v32 = vmul.f32 0.2, %v1094_v5  ;;  %v995_v34 = vld [vmem:[#allocation2 + $0xc0] sm:$0xff] }
 0x16b   :  { %v1063_v35 = vadd.f32 %v2625_v21, %v995_v34  ;;  %v813_v9 = vpop.f32.mrf.mxu1 }
 0x16c   :  { %v1286_v38 = vsel %vm1158_vm7, %v1094_v5, %v1222_v32 }
 0x16d   :  { %v1350_v22 = vpack.c.bf16 %v1286_v38, %v1286_v38  ;;  %vm1127_vm8 = vcmp.ge.f32.partialorder %v1063_v35, 0.0  ;;  %v1191_v39 = vmul.f32 0.2, %v1063_v35  ;;  %v719_v40 = vpop.f32.mrf.mxu2 }
 0x16e   :  { %v889_v41 = vadd.f32 %v888_v16, %v719_v40  ;;  %v642_v44 = vpop.f32.mrf.mxu0  ;;  %v896_v14 = vpop.f32.mrf.mxu3 }
 0x16f   :  { %1415 = vst.msk [vmem:[%s2792_s3 + $0xdc] sm:$0xf] %vm1359_vm3, %v1350_v22  ;;  %v1255_v45 = vsel %vm1127_vm8, %v1063_v35, %v1191_v39  ;;  %v1027_v33 = vld [vmem:[#allocation2 + $0x1c0] sm:$0xff]  ;;  %v812_v46 = vadd.f32 %v811_v19, %v642_v44 }
 0x170   :  { %v1319_v43 = vpack.c.bf16 %v1255_v45, %v1255_v45  ;;  %v1095_v47 = vadd.f32 %v2625_v21, %v1027_v33  ;;  %v996_v49 = vld [vmem:[#allocation2 + $0xc8] sm:$0xff]  ;;  %964 = vst.msk [vmem:[#allocation2 + $0x1c8] sm:$0xff] %vm906_vm1, %v889_v41 }
 0x171   :  { %v1064_v50 = vadd.f32 %v2625_v21, %v996_v49  ;;  %933 = vst.msk [vmem:[#allocation2 + $0xd0] sm:$0xff] %vm906_vm1, %v812_v46 }
 0x172   :  { %1384 = vst.msk [vmem:[%s2792_s3 + $0x60] sm:$0xf] %vm1359_vm3, %v1319_v43  ;;  %vm1159_vm9 = vcmp.ge.f32.partialorder %v1095_v47, 0.0  ;;  %v1223_v51 = vmul.f32 0.2, %v1095_v47 }
 0x173   :  { %vm1128_vm10 = vcmp.ge.f32.partialorder %v1064_v50, 0.0  ;;  %v1192_v28 = vmul.f32 0.2, %v1064_v50  ;;  %v816_v53 = vpop.f32.mrf.mxu1 }
 0x174   :  { %v1287_v54 = vsel %vm1159_vm9, %v1095_v47, %v1223_v51 }
 0x175   :  { %v1351_v55 = vpack.c.bf16 %v1287_v54, %v1287_v54  ;;  %v1256_v57 = vsel %vm1128_vm10, %v1064_v50, %v1192_v28  ;;  %v722_v42 = vpop.f32.mrf.mxu2 }
 0x176   :  { %v1320_v37 = vpack.c.bf16 %v1256_v57, %v1256_v57  ;;  %v892_v59 = vadd.f32 %v891_v36, %v722_v42  ;;  %v644_v61 = vpop.f32.mrf.mxu0 }
 0x177   :  { %1416 = vst.msk [vmem:[%s2792_s3 + $0xe0] sm:$0xf] %vm1359_vm3, %v1351_v55  ;;  %v1028_v60 = vld [vmem:[#allocation2 + $0x1c8] sm:$0xff]  ;;  %v814_v62 = vadd.f32 %v813_v9, %v644_v61  ;;  %v898_v9 = vpop.f32.mrf.mxu3 }
 0x178   :  { %1385 = vst.msk [vmem:[%s2792_s3 + $0x64] sm:$0xf] %vm1359_vm3, %v1320_v37  ;;  %v1096_v0 = vadd.f32 %v2625_v21, %v1028_v60  ;;  %v997_v1 = vld [vmem:[#allocation2 + $0xd0] sm:$0xff] }
 0x179   :  { %v1065_v2 = vadd.f32 %v2625_v21, %v997_v1  ;;  %965 = vst.msk [vmem:[#allocation2 + $0x1d0] sm:$0xff] %vm906_vm1, %v892_v59 }
 0x17a   :  { %vm1160_vm11 = vcmp.ge.f32.partialorder %v1096_v0, 0.0  ;;  %v1224_v48 = vmul.f32 0.2, %v1096_v0  ;;  %934 = vst.msk [vmem:[#allocation2 + $0xd8] sm:$0xff] %vm906_vm1, %v814_v62 }
 0x17b   :  { %vm1129_vm12 = vcmp.ge.f32.partialorder %v1065_v2, 0.0  ;;  %v1193_v3 = vmul.f32 0.2, %v1065_v2  ;;  %v818_v4 = vpop.f32.mrf.mxu1 }
 0x17c   :  { %v1288_v8 = vsel %vm1160_vm11, %v1096_v0, %v1224_v48 }
 0x17d   :  { %v1352_v10 = vpack.c.bf16 %v1288_v8, %v1288_v8  ;;  %v1257_v11 = vsel %vm1129_vm12, %v1065_v2, %v1193_v3  ;;  %v724_v12 = vpop.f32.mrf.mxu2 }
 0x17e   :  { %v1321_v63 = vpack.c.bf16 %v1257_v11, %v1257_v11  ;;  %v894_v13 = vadd.f32 %v893_v58, %v724_v12  ;;  %v647_v52 = vpop.f32.mrf.mxu0 }
 0x17f   :  { %1417 = vst.msk [vmem:[%s2792_s3 + $0xe4] sm:$0xf] %vm1359_vm3, %v1352_v10  ;;  %v817_v16 = vadd.f32 %v816_v53, %v647_v52  ;;  %v901_v53 = vpop.f32.mrf.mxu3 }
 0x180   :  { %1386 = vst.msk [vmem:[%s2792_s3 + $0x68] sm:$0xf] %vm1359_vm3, %v1321_v63  ;;  %v1029_v56 = vld [vmem:[#allocation2 + $0x1d0] sm:$0xff] }
 0x181   :  { %v1097_v17 = vadd.f32 %v2625_v21, %v1029_v56  ;;  %v998_v18 = vld [vmem:[#allocation2 + $0xd8] sm:$0xff]  ;;  %966 = vst.msk [vmem:[#allocation2 + $0x1d8] sm:$0xff] %vm906_vm1, %v894_v13 }
 0x182   :  { %v1066_v19 = vadd.f32 %v2625_v21, %v998_v18  ;;  %935 = vst.msk [vmem:[#allocation2 + $0xe0] sm:$0xff] %vm906_vm1, %v817_v16 }
 0x183   :  { %vm1161_vm13 = vcmp.ge.f32.partialorder %v1097_v17, 0.0  ;;  %v1225_v15 = vmul.f32 0.2, %v1097_v17  ;;  %v821_v23 = vpop.f32.mrf.mxu1 }
 0x184   :  { %vm1130_vm14 = vcmp.ge.f32.partialorder %v1066_v19, 0.0  ;;  %v1194_v24 = vmul.f32 0.2, %v1066_v19 }
 0x185   :  { %v1289_v25 = vsel %vm1161_vm13, %v1097_v17, %v1225_v15  ;;  %v727_v26 = vpop.f32.mrf.mxu2 }
 0x186   :  { %v1353_v27 = vpack.c.bf16 %v1289_v25, %v1289_v25  ;;  %v1258_v29 = vsel %vm1130_vm14, %v1066_v19, %v1194_v24  ;;  %v897_v6 = vadd.f32 %v896_v14, %v727_v26  ;;  %v649_v30 = vpop.f32.mrf.mxu0 }
 0x187   :  { %v1322_v31 = vpack.c.bf16 %v1258_v29, %v1258_v29  ;;  %v819_v5 = vadd.f32 %v818_v4, %v649_v30  ;;  %v903_v63 = vpop.f32.mrf.mxu3 }
 0x188   :  { %1418 = vst.msk [vmem:[%s2792_s3 + $0xe8] sm:$0xf] %vm1359_vm3, %v1353_v27  ;;  %v1030_v32 = vld [vmem:[#allocation2 + $0x1d8] sm:$0xff] }
 0x189   :  { %1387 = vst.msk [vmem:[%s2792_s3 + $0x6c] sm:$0xf] %vm1359_vm3, %v1322_v31  ;;  %v1098_v34 = vadd.f32 %v2625_v21, %v1030_v32  ;;  %v999_v35 = vld [vmem:[#allocation2 + $0xe0] sm:$0xff] }
 0x18a   :  { %v1067_v36 = vadd.f32 %v2625_v21, %v999_v35  ;;  %967 = vst.msk [vmem:[#allocation2 + $0x1e0] sm:$0xff] %vm906_vm1, %v897_v6 }
 0x18b   :  { %vm1162_vm0 = vcmp.ge.f32.partialorder %v1098_v34, 0.0  ;;  %v1226_v38 = vmul.f32 0.2, %v1098_v34  ;;  %936 = vst.msk [vmem:[#allocation2 + $0xe8] sm:$0xff] %vm906_vm1, %v819_v5  ;;  %v823_v22 = vpop.f32.mrf.mxu1 }
 0x18c   :  { %vm1131_vm15 = vcmp.ge.f32.partialorder %v1067_v36, 0.0  ;;  %v1195_v39 = vmul.f32 0.2, %v1067_v36 }
 0x18d   :  { %v1290_v40 = vsel %vm1162_vm0, %v1098_v34, %v1226_v38  ;;  %v729_v41 = vpop.f32.mrf.mxu2 }
 0x18e   :  { %v1354_v44 = vpack.c.bf16 %v1290_v40, %v1290_v40  ;;  %v1259_v45 = vsel %vm1131_vm15, %v1067_v36, %v1195_v39  ;;  %v899_v33 = vadd.f32 %v898_v9, %v729_v41  ;;  %v652_v46 = vpop.f32.mrf.mxu0 }
 0x18f   :  { %v1323_v43 = vpack.c.bf16 %v1259_v45, %v1259_v45  ;;  %v822_v47 = vadd.f32 %v821_v23, %v652_v46 }
 0x190   :  { %1419 = vst.msk [vmem:[%s2792_s3 + $0xec] sm:$0xf] %vm1359_vm3, %v1354_v44 }
 0x191   :  { %1388 = vst.msk [vmem:[%s2792_s3 + $0x70] sm:$0xf] %vm1359_vm3, %v1323_v43  ;;  %v1031_v49 = vld [vmem:[#allocation2 + $0x1e0] sm:$0xff] }
 0x192   :  { %v1099_v50 = vadd.f32 %v2625_v21, %v1031_v49  ;;  %v1000_v51 = vld [vmem:[#allocation2 + $0xe8] sm:$0xff]  ;;  %968 = vst.msk [vmem:[#allocation2 + $0x1e8] sm:$0xff] %vm906_vm1, %v899_v33 }
 0x193   :  { %v1068_v28 = vadd.f32 %v2625_v21, %v1000_v51  ;;  %937 = vst.msk [vmem:[#allocation2 + $0xf0] sm:$0xff] %vm906_vm1, %v822_v47  ;;  %v826_v54 = vpop.f32.mrf.mxu1 }
 0x194   :  { %vm1163_vm2 = vcmp.ge.f32.partialorder %v1099_v50, 0.0  ;;  %v1227_v55 = vmul.f32 0.2, %v1099_v50  ;;  %v827_v57 = vadd.f32 %v826_v54, %v2175_v7 }
 0x195   :  { %vm1132_vm4 = vcmp.ge.f32.partialorder %v1068_v28, 0.0  ;;  %v1196_v42 = vmul.f32 0.2, %v1068_v28  ;;  %v732_v58 = vpop.f32.mrf.mxu2 }
 0x196   :  { %v1291_v37 = vsel %vm1163_vm2, %v1099_v50, %v1227_v55  ;;  %939 = vst.msk [vmem:[#allocation2 + $0x100] sm:$0xff] %vm906_vm1, %v827_v57  ;;  %v902_v59 = vadd.f32 %v901_v53, %v732_v58  ;;  %v654_v61 = vpop.f32.mrf.mxu0 }
 0x197   :  { %v1355_v60 = vpack.c.bf16 %v1291_v37, %v1291_v37  ;;  %v1260_v62 = vsel %vm1132_vm4, %v1068_v28, %v1196_v42  ;;  %v824_v0 = vadd.f32 %v823_v22, %v654_v61 }
 0x198   :  { %v1324_v1 = vpack.c.bf16 %v1260_v62, %v1260_v62  ;;  %969 = vst.msk [vmem:[#allocation2 + $0x1f0] sm:$0xff] %vm906_vm1, %v902_v59 }
 0x199   :  { %1420 = vst.msk [vmem:[%s2792_s3 + $0xf0] sm:$0xf] %vm1359_vm3, %v1355_v60  ;;  %v1032_v7 = vld [vmem:[#allocation2 + $0x1e8] sm:$0xff] }
 0x19a   :  { %1389 = vst.msk [vmem:[%s2792_s3 + $0x74] sm:$0xf] %vm1359_vm3, %v1324_v1  ;;  %v1100_v2 = vadd.f32 %v2625_v21, %v1032_v7  ;;  %v1001_v48 = vld [vmem:[#allocation2 + $0xf0] sm:$0xff] }
 0x19b   :  { %v1069_v3 = vadd.f32 %v2625_v21, %v1001_v48  ;;  %938 = vst.msk [vmem:[#allocation2 + $0xf8] sm:$0xff] %vm906_vm1, %v824_v0  ;;  %v828_v4 = vpop.f32.mrf.mxu1 }
 0x19c   :  { %vm1164_vm5 = vcmp.ge.f32.partialorder %v1100_v2, 0.0  ;;  %v1228_v8 = vmul.f32 0.2, %v1100_v2  ;;  %v829_v10 = vadd.f32 %v828_v4, %v2195_v20 }
 0x19d   :  { %vm1133_vm6 = vcmp.ge.f32.partialorder %v1069_v3, 0.0  ;;  %v1197_v11 = vmul.f32 0.2, %v1069_v3  ;;  %v1003_v12 = vld [vmem:[#allocation2 + $0x100] sm:$0xff]  ;;  %v734_v13 = vpop.f32.mrf.mxu2 }
 0x19e   :  { %v1292_v52 = vsel %vm1164_vm5, %v1100_v2, %v1228_v8  ;;  %v1071_v14 = vadd.f32 %v2625_v21, %v1003_v12  ;;  %940 = vst.msk [vmem:[#allocation2 + $0x108] sm:$0xff] %vm906_vm1, %v829_v10  ;;  %v904_v16 = vadd.f32 %v903_v63, %v734_v13 }
 0x19f   :  { %v1356_v56 = vpack.c.bf16 %v1292_v52, %v1292_v52  ;;  %v1261_v17 = vsel %vm1133_vm6, %v1069_v3, %v1197_v11  ;;  %v1033_v18 = vld [vmem:[#allocation2 + $0x1f0] sm:$0xff] }
 0x1a0   :  { %v1325_v19 = vpack.c.bf16 %v1261_v17, %v1261_v17  ;;  %vm1135_vm7 = vcmp.ge.f32.partialorder %v1071_v14, 0.0  ;;  %v1199_v15 = vmul.f32 0.2, %v1071_v14  ;;  %v1101_v23 = vadd.f32 %v2625_v21, %v1033_v18  ;;  %970 = vst.msk [vmem:[#allocation2 + $0x1f8] sm:$0xff] %vm906_vm1, %v904_v16 }
 0x1a1   :  { %1421 = vst.msk [vmem:[%s2792_s3 + $0xf4] sm:$0xf] %vm1359_vm3, %v1356_v56 }
 0x1a2   :  { %1390 = vst.msk [vmem:[%s2792_s3 + $0x78] sm:$0xf] %vm1359_vm3, %v1325_v19  ;;  %v1263_v20 = vsel %vm1135_vm7, %v1071_v14, %v1199_v15  ;;  %vm1165_vm8 = vcmp.ge.f32.partialorder %v1101_v23, 0.0  ;;  %v1229_v24 = vmul.f32 0.2, %v1101_v23  ;;  %v1002_v25 = vld [vmem:[#allocation2 + $0xf8] sm:$0xff] }
 0x1a3   :  { %v1327_v26 = vpack.c.bf16 %v1263_v20, %v1263_v20  ;;  %v1070_v27 = vadd.f32 %v2625_v21, %v1002_v25 }
 0x1a4   :  { %v1293_v29 = vsel %vm1165_vm8, %v1101_v23, %v1229_v24 }
 0x1a5   :  { %1392 = vst.msk [vmem:[%s2792_s3 + $0x80] sm:$0xf] %vm1359_vm3, %v1327_v26  ;;  %v1357_v6 = vpack.c.bf16 %v1293_v29, %v1293_v29  ;;  %vm1134_vm1 = vcmp.ge.f32.partialorder %v1070_v27, 0.0  ;;  %v1198_v30 = vmul.f32 0.2, %v1070_v27  ;;  %v1004_v31 = vld [vmem:[#allocation2 + $0x108] sm:$0xff] }
 0x1a6   :  { %v1072_v5 = vadd.f32 %v2625_v21, %v1004_v31 }
 0x1a7   :  { %1422 = vst.msk [vmem:[%s2792_s3 + $0xf8] sm:$0xf] %vm1359_vm3, %v1357_v6  ;;  %v1262_v32 = vsel %vm1134_vm1, %v1070_v27, %v1198_v30  ;;  %v1034_v34 = vld [vmem:[#allocation2 + $0x1f8] sm:$0xff] }
 0x1a8   :  { %v1326_v35 = vpack.c.bf16 %v1262_v32, %v1262_v32  ;;  %vm1136_vm9 = vcmp.ge.f32.partialorder %v1072_v5, 0.0  ;;  %v1200_v9 = vmul.f32 0.2, %v1072_v5  ;;  %v1102_v36 = vadd.f32 %v2625_v21, %v1034_v34 }
 0x1aa   :  { %1391 = vst.msk [vmem:[%s2792_s3 + $0x7c] sm:$0xf] %vm1359_vm3, %v1326_v35  ;;  %v1264_v38 = vsel %vm1136_vm9, %v1072_v5, %v1200_v9  ;;  %vm1166_vm10 = vcmp.ge.f32.partialorder %v1102_v36, 0.0  ;;  %v1230_v22 = vmul.f32 0.2, %v1102_v36 }
 0x1ab   :  { %v1328_v39 = vpack.c.bf16 %v1264_v38, %v1264_v38 }
 0x1ac   :  { %v1294_v40 = vsel %vm1166_vm10, %v1102_v36, %v1230_v22 }
 0x1ad   :  { %1393 = vst.msk [vmem:[%s2792_s3 + $0x84] sm:$0xf] %vm1359_vm3, %v1328_v39  ;;  %v1358_v41 = vpack.c.bf16 %v1294_v40, %v1294_v40 }
 0x1af   :  { %1423 = vst.msk [vmem:[%s2792_s3 + $0xfc] sm:$0xf] %vm1359_vm3, %v1358_v41 }

// kernel: discriminator_forward.8
= control target key start
LH: loop header
LB: loop body
LE: loop exit
PB: predicated region body
PF: predicated region fallthrough
CT: control target
= control target key end

     0   :  { %vm150_vm0 = vcmask 257024   ;;  %s362_s0 = inlined_call_operand.vmem [shape: bf16[128,32], index: 0, kind: input, shape index: {}]   ;;  %s363_s1 = inlined_call_operand.vmem [shape: f32[1,32], index: 1, kind: input, shape index: {}]   ;;  %s364_s2 = inlined_call_operand.vmem [shape: f32[1,32], index: 2, kind: input, shape index: {}]   ;;  %s365_s3 = inlined_call_operand.vmem [shape: bf16[128,32], index: 3, kind: output, shape index: {}]  }
   0x1   :  { %v172_v0 = vld [vmem:[%s362_s0] sm:$0xff]   ;;  %v203_v5 = vld [vmem:[%s362_s0 + $0x8] sm:$0xff]   ;;  %v204_v8 = vld [vmem:[%s362_s0 + $0x10] sm:$0xff]  }
   0x2   :  { %v238_v1 = vld [vmem:[%s363_s1] ss:$0 sm:$0xff]  ;;  %v173_v2 = vunpack.c.l.bf16 %v172_v0  ;;  %v174_v4 = vunpack.c.h.bf16 %v172_v0  ;;  %v177_v6 = vunpack.c.l.bf16 %v203_v5  ;;  %v178_v7 = vunpack.c.h.bf16 %v203_v5  ;;  %v205_v9 = vld [vmem:[%s362_s0 + $0x18] sm:$0xff]   ;;  %v207_v39 = vld [vmem:[%s362_s0 + $0x28] sm:$0xff]  }
   0x3   :  { %v243_v3 = vld [vmem:[%s364_s2] ss:$0 sm:$0xff]  ;;  %v181_v12 = vunpack.c.l.bf16 %v204_v8  ;;  %v182_v13 = vunpack.c.h.bf16 %v204_v8  ;;  %v185_v16 = vunpack.c.l.bf16 %v205_v9  ;;  %v186_v17 = vunpack.c.h.bf16 %v205_v9  ;;  %v208_v53 = vld [vmem:[%s362_s0 + $0x30] sm:$0xff]  }
   0x4   :  { %v50_v10 = vmul.f32 %v238_v1, %v173_v2  ;;  %v51_v11 = vmul.f32 %v238_v1, %v174_v4  ;;  %v52_v14 = vmul.f32 %v238_v1, %v177_v6  ;;  %v53_v15 = vmul.f32 %v238_v1, %v178_v7  ;;  %v206_v38 = vld [vmem:[%s362_s0 + $0x20] sm:$0xff]  }
   0x5   :  { %v54_v20 = vmul.f32 %v238_v1, %v181_v12  ;;  %v55_v21 = vmul.f32 %v238_v1, %v182_v13  ;;  %v56_v24 = vmul.f32 %v238_v1, %v185_v16  ;;  %v57_v25 = vmul.f32 %v238_v1, %v186_v17  ;;  %v209_v16 = vld [vmem:[%s362_s0 + $0x38] sm:$0xff]  }
   0x6   :  { %v70_v18 = vadd.f32 %v243_v3, %v50_v10  ;;  %v71_v19 = vadd.f32 %v243_v3, %v51_v11  ;;  %v72_v22 = vadd.f32 %v243_v3, %v52_v14  ;;  %v73_v23 = vadd.f32 %v243_v3, %v53_v15 }
   0x7   :  { %v74_v32 = vadd.f32 %v243_v3, %v54_v20  ;;  %v75_v33 = vadd.f32 %v243_v3, %v55_v21  ;;  %v76_v44 = vadd.f32 %v243_v3, %v56_v24  ;;  %v77_v45 = vadd.f32 %v243_v3, %v57_v25 }
   0x8   :  { %vm86_vm1 = vcmp.ge.f32.partialorder %v70_v18, 0.0  ;;  %v102_v26 = vmul.f32 0.2, %v70_v18  ;;  %vm87_vm2 = vcmp.ge.f32.partialorder %v71_v19, 0.0  ;;  %v103_v27 = vmul.f32 0.2, %v71_v19 }
   0x9   :  { %vm88_vm3 = vcmp.ge.f32.partialorder %v72_v22, 0.0  ;;  %v104_v28 = vmul.f32 0.2, %v72_v22  ;;  %vm89_vm4 = vcmp.ge.f32.partialorder %v73_v23, 0.0  ;;  %v105_v29 = vmul.f32 0.2, %v73_v23 }
   0xa   :  { %v118_v30 = vsel %vm86_vm1, %v70_v18, %v102_v26  ;;  %v119_v31 = vsel %vm87_vm2, %v71_v19, %v103_v27  ;;  %vm90_vm5 = vcmp.ge.f32.partialorder %v74_v32, 0.0  ;;  %v106_v42 = vmul.f32 0.2, %v74_v32 }
   0xb   :  { %v134_v34 = vpack.c.bf16 %v118_v30, %v118_v30  ;;  %v135_v35 = vpack.c.bf16 %v119_v31, %v119_v31  ;;  %v120_v36 = vsel %vm88_vm3, %v72_v22, %v104_v28  ;;  %v121_v37 = vsel %vm89_vm4, %v73_v23, %v105_v29 }
   0xc   :  { %v136_v40 = vpack.c.bf16 %v120_v36, %v120_v36  ;;  %v137_v41 = vpack.c.bf16 %v121_v37, %v121_v37  ;;  %vm91_vm6 = vcmp.ge.f32.partialorder %v75_v33, 0.0  ;;  %v107_v43 = vmul.f32 0.2, %v75_v33 }
   0xd   :  { %151 = vst.msk [vmem:[%s365_s3] sm:$0xf] %vm150_vm0, %v134_v34  ;;  %v122_v46 = vsel %vm90_vm5, %v74_v32, %v106_v42  ;;  %v189_v47 = vunpack.c.l.bf16 %v206_v38  ;;  %v190_v48 = vunpack.c.h.bf16 %v206_v38  ;;  %v193_v49 = vunpack.c.l.bf16 %v207_v39 }
   0xe   :  { %152 = vst.msk [vmem:[%s365_s3 + $0x4] sm:$0xf] %vm150_vm0, %v135_v35  ;;  %v138_v50 = vpack.c.bf16 %v122_v46, %v122_v46  ;;  %v123_v51 = vsel %vm91_vm6, %v75_v33, %v107_v43  ;;  %vm92_vm7 = vcmp.ge.f32.partialorder %v76_v44, 0.0  ;;  %v108_v52 = vmul.f32 0.2, %v76_v44 }
   0xf   :  { %153 = vst.msk [vmem:[%s365_s3 + $0x8] sm:$0xf] %vm150_vm0, %v136_v40  ;;  %v139_v54 = vpack.c.bf16 %v123_v51, %v123_v51  ;;  %vm93_vm8 = vcmp.ge.f32.partialorder %v77_v45, 0.0  ;;  %v109_v55 = vmul.f32 0.2, %v77_v45  ;;  %v58_v56 = vmul.f32 %v238_v1, %v189_v47 }
  0x10   :  { %154 = vst.msk [vmem:[%s365_s3 + $0xc] sm:$0xf] %vm150_vm0, %v137_v41  ;;  %v124_v57 = vsel %vm92_vm7, %v76_v44, %v108_v52  ;;  %v59_v58 = vmul.f32 %v238_v1, %v190_v48  ;;  %v60_v59 = vmul.f32 %v238_v1, %v193_v49  ;;  %v194_v60 = vunpack.c.h.bf16 %v207_v39 }
  0x11   :  { %155 = vst.msk [vmem:[%s365_s3 + $0x10] sm:$0xf] %vm150_vm0, %v138_v50  ;;  %v140_v61 = vpack.c.bf16 %v124_v57, %v124_v57  ;;  %v125_v62 = vsel %vm93_vm8, %v77_v45, %v109_v55  ;;  %v78_v63 = vadd.f32 %v243_v3, %v58_v56  ;;  %v197_v0 = vunpack.c.l.bf16 %v208_v53 }
  0x12   :  { %156 = vst.msk [vmem:[%s365_s3 + $0x14] sm:$0xf] %vm150_vm0, %v139_v54  ;;  %v141_v2 = vpack.c.bf16 %v125_v62, %v125_v62  ;;  %v79_v4 = vadd.f32 %v243_v3, %v59_v58  ;;  %v80_v5 = vadd.f32 %v243_v3, %v60_v59  ;;  %v61_v6 = vmul.f32 %v238_v1, %v194_v60 }
  0x13   :  { %157 = vst.msk [vmem:[%s365_s3 + $0x18] sm:$0xf] %vm150_vm0, %v140_v61  ;;  %vm94_vm9 = vcmp.ge.f32.partialorder %v78_v63, 0.0  ;;  %v110_v7 = vmul.f32 0.2, %v78_v63  ;;  %v62_v8 = vmul.f32 %v238_v1, %v197_v0  ;;  %v198_v9 = vunpack.c.h.bf16 %v208_v53 }
  0x14   :  { %158 = vst.msk [vmem:[%s365_s3 + $0x1c] sm:$0xf] %vm150_vm0, %v141_v2  ;;  %vm95_vm10 = vcmp.ge.f32.partialorder %v79_v4, 0.0  ;;  %v111_v10 = vmul.f32 0.2, %v79_v4  ;;  %vm96_vm11 = vcmp.ge.f32.partialorder %v80_v5, 0.0  ;;  %v81_v11 = vadd.f32 %v243_v3, %v61_v6 }
  0x15   :  { %v126_v12 = vsel %vm94_vm9, %v78_v63, %v110_v7  ;;  %v112_v13 = vmul.f32 0.2, %v80_v5  ;;  %v82_v14 = vadd.f32 %v243_v3, %v62_v8  ;;  %v63_v15 = vmul.f32 %v238_v1, %v198_v9 }
  0x16   :  { %v142_v17 = vpack.c.bf16 %v126_v12, %v126_v12  ;;  %v127_v18 = vsel %vm95_vm10, %v79_v4, %v111_v10  ;;  %vm97_vm12 = vcmp.ge.f32.partialorder %v81_v11, 0.0  ;;  %v113_v19 = vmul.f32 0.2, %v81_v11 }
  0x17   :  { %v143_v20 = vpack.c.bf16 %v127_v18, %v127_v18  ;;  %v128_v21 = vsel %vm96_vm11, %v80_v5, %v112_v13  ;;  %vm98_vm13 = vcmp.ge.f32.partialorder %v82_v14, 0.0  ;;  %v114_v22 = vmul.f32 0.2, %v82_v14 }
  0x18   :  { %159 = vst.msk [vmem:[%s365_s3 + $0x20] sm:$0xf] %vm150_vm0, %v142_v17  ;;  %v144_v23 = vpack.c.bf16 %v128_v21, %v128_v21  ;;  %v129_v24 = vsel %vm97_vm12, %v81_v11, %v113_v19  ;;  %v83_v25 = vadd.f32 %v243_v3, %v63_v15  ;;  %v201_v26 = vunpack.c.l.bf16 %v209_v16 }
  0x19   :  { %160 = vst.msk [vmem:[%s365_s3 + $0x24] sm:$0xf] %vm150_vm0, %v143_v20  ;;  %v145_v27 = vpack.c.bf16 %v129_v24, %v129_v24  ;;  %v130_v28 = vsel %vm98_vm13, %v82_v14, %v114_v22  ;;  %v202_v29 = vunpack.c.h.bf16 %v209_v16 }
  0x1a   :  { %161 = vst.msk [vmem:[%s365_s3 + $0x28] sm:$0xf] %vm150_vm0, %v144_v23  ;;  %v146_v30 = vpack.c.bf16 %v130_v28, %v130_v28  ;;  %vm99_vm14 = vcmp.ge.f32.partialorder %v83_v25, 0.0  ;;  %v115_v31 = vmul.f32 0.2, %v83_v25  ;;  %v64_v32 = vmul.f32 %v238_v1, %v201_v26 }
  0x1b   :  { %162 = vst.msk [vmem:[%s365_s3 + $0x2c] sm:$0xf] %vm150_vm0, %v145_v27  ;;  %v65_v33 = vmul.f32 %v238_v1, %v202_v29 }
  0x1c   :  { %163 = vst.msk [vmem:[%s365_s3 + $0x30] sm:$0xf] %vm150_vm0, %v146_v30  ;;  %v131_v34 = vsel %vm99_vm14, %v83_v25, %v115_v31  ;;  %v84_v35 = vadd.f32 %v243_v3, %v64_v32 }
  0x1d   :  { %v147_v36 = vpack.c.bf16 %v131_v34, %v131_v34  ;;  %v85_v37 = vadd.f32 %v243_v3, %v65_v33 }
  0x1e   :  { %vm100_vm15 = vcmp.ge.f32.partialorder %v84_v35, 0.0  ;;  %v116_v38 = vmul.f32 0.2, %v84_v35 }
  0x1f   :  { %164 = vst.msk [vmem:[%s365_s3 + $0x34] sm:$0xf] %vm150_vm0, %v147_v36  ;;  %vm101_vm1 = vcmp.ge.f32.partialorder %v85_v37, 0.0  ;;  %v117_v1 = vmul.f32 0.2, %v85_v37 }
  0x20   :  { %v132_v39 = vsel %vm100_vm15, %v84_v35, %v116_v38 }
  0x21   :  { %v148_v40 = vpack.c.bf16 %v132_v39, %v132_v39  ;;  %v133_v41 = vsel %vm101_vm1, %v85_v37, %v117_v1 }
  0x22   :  { %v149_v42 = vpack.c.bf16 %v133_v41, %v133_v41 }
  0x23   :  { %165 = vst.msk [vmem:[%s365_s3 + $0x38] sm:$0xf] %vm150_vm0, %v148_v40 }
  0x24   :  { %166 = vst.msk [vmem:[%s365_s3 + $0x3c] sm:$0xf] %vm150_vm0, %v149_v42 }

// kernel: discriminator_forward.7
= control target key start
LH: loop header
LB: loop body
LE: loop exit
PB: predicated region body
PF: predicated region fallthrough
CT: control target
= control target key end

     0   :  { %vm106_vm0 = vcmask 523264   ;;  %vm180_vm1 = vcmask 261120   ;;  %vm3507_vm2 = vcmask 257024   ;;  %vm3435_vm3 = vcmask 253952   ;;  %s6153_s1 = inlined_call_operand.vmem [shape: bf16[16,64,32], index: 1, kind: input, shape index: {}]   ;;  %s6154_s0 = inlined_call_operand.vmem [shape: bf16[2,72,8,64], index: 0, kind: input, shape index: {}]   ;;  %s6155_s2 = inlined_call_operand.vmem [shape: f32[1,32], index: 2, kind: input, shape index: {}]   ;;  %s6156_s3 = inlined_call_operand.vmem [shape: bf16[128,32], index: 3, kind: output, shape index: {0}]   ;;  %s6157_s4 = inlined_call_operand.vmem [shape: f32[1,1,32], index: 4, kind: output, shape index: {1}]   ;;  %s6158_s5 = inlined_call_operand.vmem [shape: f32[1,1,32], index: 5, kind: output, shape index: {2}]  }
   0x1   :  { %v4803_v0 = vld [vmem:[%s6153_s1 + $0x18] sm:$0xff]  ;;  %v4802_v3 = vld [vmem:[%s6153_s1 + $0x10] sm:$0xff]  ;;  %v4801_v7 = vld [vmem:[%s6153_s1 + $0x8] sm:$0xff] }
   0x2   :  { %v4815_v1 = vld [vmem:[%s6153_s1 + $0x38] sm:$0xff]  ;;  %135 = vmatpush.bf16.msra.mxu0 %v4803_v0  ;;  %v4814_v4 = vld [vmem:[%s6153_s1 + $0x30] sm:$0xff]  ;;  %v4813_v8 = vld [vmem:[%s6153_s1 + $0x28] sm:$0xff] }
   0x3   :  { %v4827_v2 = vld [vmem:[%s6153_s1 + $0x58] sm:$0xff]  ;;  %315 = vmatpush.bf16.msra.mxu1 %v4815_v1  ;;  %v4826_v5 = vld [vmem:[%s6153_s1 + $0x50] sm:$0xff]  ;;  %v4825_v9 = vld [vmem:[%s6153_s1 + $0x48] sm:$0xff] }
   0x4   :  { %526 = vmatpush.bf16.msra.mxu2 %v4827_v2  ;;  %v4839_v6 = vld [vmem:[%s6153_s1 + $0x78] sm:$0xff]  ;;  %v4838_v10 = vld [vmem:[%s6153_s1 + $0x70] sm:$0xff]  ;;  %v4800_v11 = vld [vmem:[%s6153_s1] sm:$0xff] }
   0x5   :  { %737 = vmatpush.bf16.msra.mxu3 %v4839_v6  ;;  %v4812_v12 = vld [vmem:[%s6153_s1 + $0x20] sm:$0xff]  ;;  %v4851_v13 = vld [vmem:[%s6153_s1 + $0x98] sm:$0xff]  ;;  %v4837_v15 = vld [vmem:[%s6153_s1 + $0x68] sm:$0xff] }
   0x6   :  { %136 = vmatpush.bf16.msra.mxu0 %v4802_v3  ;;  %v4824_v14 = vld [vmem:[%s6153_s1 + $0x40] sm:$0xff]  ;;  %v4863_v16 = vld [vmem:[%s6153_s1 + $0xb8] sm:$0xff]  ;;  %v4804_v18 = vld [vmem:[%s6154_s0 + $0x48] sm:$0xff] }
   0x7   :  { %316 = vmatpush.bf16.msra.mxu1 %v4814_v4  ;;  %v4792_v17 = vld [vmem:[%s6154_s0] sm:$0xff]  ;;  %v4875_v20 = vld [vmem:[%s6153_s1 + $0xd8] sm:$0xff]  ;;  %v4850_v23 = vld [vmem:[%s6153_s1 + $0x90] sm:$0xff] }
   0x8   :  { %527 = vmatpush.bf16.msra.mxu2 %v4826_v5  ;;  %v4816_v19 = vld [vmem:[%s6154_s0 + $0x24] sm:$0xff]  ;;  %v4887_v22 = vld [vmem:[%s6153_s1 + $0xf8] sm:$0xff]  ;;  %v4862_v24 = vld [vmem:[%s6153_s1 + $0xb0] sm:$0xff] }
   0x9   :  { %738 = vmatpush.bf16.msra.mxu3 %v4838_v10  ;;  %v4836_v21 = vld [vmem:[%s6153_s1 + $0x60] sm:$0xff]  ;;  %v4828_v25 = vld [vmem:[%s6154_s0 + $0x6c] sm:$0xff]  ;;  %v4829_v31 = vld [vmem:[%s6154_s0 + $0x74] sm:$0xff] }
   0xa   :  { %137 = vmatpush.bf16.msra.mxu0 %v4801_v7  ;;  %v4874_v26 = vld [vmem:[%s6153_s1 + $0xd0] sm:$0xff]  ;;  %v4793_v27 = vld [vmem:[%s6154_s0 + $0x8] sm:$0xff]  ;;  %v4806_v33 = vld [vmem:[%s6154_s0 + $0x58] sm:$0xff] }
   0xb   :  { %317 = vmatpush.bf16.msra.mxu1 %v4813_v8  ;;  %v4805_v28 = vld [vmem:[%s6154_s0 + $0x50] sm:$0xff]  ;;  %v4849_v35 = vld [vmem:[%s6153_s1 + $0x88] sm:$0xff]  ;;  %v4830_v38 = vld [vmem:[%s6154_s0 + $0x7c] sm:$0xff] }
   0xc   :  { %528 = vmatpush.bf16.msra.mxu2 %v4825_v9  ;;  %v4817_v29 = vld [vmem:[%s6154_s0 + $0x2c] sm:$0xff]  ;;  %v4818_v34 = vld [vmem:[%s6154_s0 + $0x34] sm:$0xff]  ;;  %v4807_v40 = vld [vmem:[%s6154_s0 + $0x60] sm:$0xff] }
   0xd   :  { %739 = vmatpush.bf16.msra.mxu3 %v4837_v15  ;;  %v4886_v30 = vld [vmem:[%s6153_s1 + $0xf0] sm:$0xff]  ;;  %v4861_v36 = vld [vmem:[%s6153_s1 + $0xa8] sm:$0xff]  ;;  %v4795_v39 = vld [vmem:[%s6154_s0 + $0x18] sm:$0xff] }
   0xe   :  { %138 = vmatpush.bf16.msra.mxu0 %v4800_v11  ;;  %v4794_v32 = vld [vmem:[%s6154_s0 + $0x10] sm:$0xff]  ;;  %v4873_v37 = vld [vmem:[%s6153_s1 + $0xc8] sm:$0xff]  ;;  %v4819_v41 = vld [vmem:[%s6154_s0 + $0x3c] sm:$0xff] }
   0xf   :  { %318 = vmatpush.bf16.msra.mxu1 %v4812_v12  ;;  %v4885_v42 = vld [vmem:[%s6153_s1 + $0xe8] sm:$0xff]  ;;  %v4796_v44 = vld [vmem:[%s6154_s0 + $0x120] sm:$0xff]  ;;  %v4809_v52 = vld [vmem:[%s6154_s0 + $0x170] sm:$0xff] }
  0x10   :  { %529 = vmatpush.bf16.msra.mxu2 %v4824_v14  ;;  %v4831_v43 = vld [vmem:[%s6154_s0 + $0x84] sm:$0xff]  ;;  %v4832_v50 = vld [vmem:[%s6154_s0 + $0x18c] sm:$0xff]  ;;  %v4833_v55 = vld [vmem:[%s6154_s0 + $0x194] sm:$0xff] }
  0x11   :  { %3584 = vmatmul.msk.bf16.vlgmr.msra.gmra.mxu0 %vm106_vm0, %v4792_v17  ;;  %740 = vmatpush.bf16.msra.mxu3 %v4836_v21  ;;  %v4808_v45 = vld [vmem:[%s6154_s0 + $0x168] sm:$0xff]  ;;  %v4848_v47 = vld [vmem:[%s6153_s1 + $0x80] sm:$0xff]  ;;  %v4798_v56 = vld [vmem:[%s6154_s0 + $0x130] sm:$0xff] }
  0x12   :  { %948 = vmatpush.bf16.msrb.mxu0 %v4851_v13  ;;  %3664 = vmatmul.msk.bf16.vlgmr.msra.gmra.mxu1 %vm106_vm0, %v4804_v18  ;;  %v4820_v46 = vld [vmem:[%s6154_s0 + $0x144] sm:$0xff]  ;;  %v4821_v53 = vld [vmem:[%s6154_s0 + $0x14c] sm:$0xff]  ;;  %v4810_v57 = vld [vmem:[%s6154_s0 + $0x178] sm:$0xff] }
  0x13   :  { %1159 = vmatpush.bf16.msrb.mxu1 %v4863_v16  ;;  %3744 = vmatmul.msk.bf16.vlgmr.msra.gmra.mxu2 %vm106_vm0, %v4816_v19  ;;  %v4860_v48 = vld [vmem:[%s6153_s1 + $0xa0] sm:$0xff]  ;;  %v4797_v51 = vld [vmem:[%s6154_s0 + $0x128] sm:$0xff]  ;;  %v4822_v58 = vld [vmem:[%s6154_s0 + $0x154] sm:$0xff] }
  0x14   :  { %1370 = vmatpush.bf16.msrb.mxu2 %v4875_v20  ;;  %3824 = vmatmul.msk.bf16.vlgmr.msra.gmra.mxu3 %vm106_vm0, %v4828_v25  ;;  %v4872_v49 = vld [vmem:[%s6153_s1 + $0xc0] sm:$0xff]  ;;  %v4899_v60 = vld [vmem:[%s6153_s1 + $0x118] sm:$0xff]  ;;  %v4840_v3 = vld [vmem:[%s6154_s0 + $0x90] sm:$0xff] }
  0x15   :  { %1581 = vmatpush.bf16.msrb.mxu3 %v4887_v22  ;;  %v4884_v54 = vld [vmem:[%s6153_s1 + $0xe0] sm:$0xff]  ;;  %v4799_v61 = vld [vmem:[%s6154_s0 + $0x138] sm:$0xff]  ;;  %v4898_v15 = vld [vmem:[%s6153_s1 + $0x110] sm:$0xff] }
  0x16   :  { %949 = vmatpush.bf16.msrb.mxu0 %v4850_v23  ;;  %v4834_v59 = vld [vmem:[%s6154_s0 + $0x19c] sm:$0xff]  ;;  %v4835_v0 = vld [vmem:[%s6154_s0 + $0x1a4] sm:$0xff]  ;;  %v4864_v7 = vld [vmem:[%s6154_s0 + $0xb4] sm:$0xff] }
  0x17   :  { %1160 = vmatpush.bf16.msrb.mxu1 %v4862_v24  ;;  %v4811_v62 = vld [vmem:[%s6154_s0 + $0x180] sm:$0xff]  ;;  %v4911_v1 = vld [vmem:[%s6153_s1 + $0x138] sm:$0xff] }
  0x18   :  { %1371 = vmatpush.bf16.msrb.mxu2 %v4874_v26  ;;  %v4823_v63 = vld [vmem:[%s6154_s0 + $0x15c] sm:$0xff] }
  0x19   :  { %1582 = vmatpush.bf16.msrb.mxu3 %v4886_v30  ;;  %v4923_v2 = vld [vmem:[%s6153_s1 + $0x158] sm:$0xff]  ;;  %v4853_v19 = vld [vmem:[%s6154_s0 + $0xe0] sm:$0xff] }
  0x1a   :  { %950 = vmatpush.bf16.msrb.mxu0 %v4849_v35  ;;  %v4852_v4 = vld [vmem:[%s6154_s0 + $0xd8] sm:$0xff] }
  0x1b   :  { %1161 = vmatpush.bf16.msrb.mxu1 %v4861_v36  ;;  %v4935_v8 = vld [vmem:[%s6153_s1 + $0x178] sm:$0xff] }
  0x1c   :  { %1372 = vmatpush.bf16.msrb.mxu2 %v4873_v37  ;;  %v4876_v9 = vld [vmem:[%s6154_s0 + $0xfc] sm:$0xff] }
  0x1d   :  { %1583 = vmatpush.bf16.msrb.mxu3 %v4885_v42  ;;  %v4841_v17 = vld [vmem:[%s6154_s0 + $0x98] sm:$0xff] }
  0x1e   :  { %951 = vmatpush.bf16.msrb.mxu0 %v4848_v47  ;;  %v4865_v23 = vld [vmem:[%s6154_s0 + $0xbc] sm:$0xff]  ;;  %v4866_v47 = vld [vmem:[%s6154_s0 + $0xc4] sm:$0xff] }
  0x1f   :  { %1162 = vmatpush.bf16.msrb.mxu1 %v4860_v48 }
  0x20   :  { %1373 = vmatpush.bf16.msrb.mxu2 %v4872_v49 }
  0x21   :  { %3585 = vmatmul.msk.bf16.gmra.mxu0 %vm106_vm0, %v4793_v27  ;;  %1584 = vmatpush.bf16.msrb.mxu3 %v4884_v54 }
  0x22   :  { %3665 = vmatmul.msk.bf16.gmra.mxu1 %vm106_vm0, %v4805_v28  ;;  %1792 = vmatpush.bf16.msra.mxu0 %v4899_v60  ;;  %v4877_v28 = vld [vmem:[%s6154_s0 + $0x104] sm:$0xff] }
  0x23   :  { %3745 = vmatmul.msk.bf16.gmra.mxu2 %vm106_vm0, %v4817_v29  ;;  %2003 = vmatpush.bf16.msra.mxu1 %v4911_v1  ;;  %v4910_v29 = vld [vmem:[%s6153_s1 + $0x130] sm:$0xff] }
  0x24   :  { %3825 = vmatmul.msk.bf16.gmra.mxu3 %vm106_vm0, %v4829_v31  ;;  %2214 = vmatpush.bf16.msra.mxu2 %v4923_v2  ;;  %v4922_v31 = vld [vmem:[%s6153_s1 + $0x150] sm:$0xff] }
  0x25   :  { %2425 = vmatpush.bf16.msra.mxu3 %v4935_v8 }
  0x26   :  { %1793 = vmatpush.bf16.msra.mxu0 %v4898_v15 }
  0x27   :  { %2004 = vmatpush.bf16.msra.mxu1 %v4910_v29  ;;  %v4844_v29 = vld [vmem:[%s6154_s0 + $0x1b0] sm:$0xff] }
  0x28   :  { %2215 = vmatpush.bf16.msra.mxu2 %v4922_v31  ;;  %v4856_v31 = vld [vmem:[%s6154_s0 + $0x1f8] sm:$0xff] }
  0x31   :  { %3586 = vmatmul.msk.bf16.gmra.mxu0 %vm106_vm0, %v4794_v32 }
  0x32   :  { %3666 = vmatmul.msk.bf16.gmra.mxu1 %vm106_vm0, %v4806_v33 }
  0x33   :  { %3746 = vmatmul.msk.bf16.gmra.mxu2 %vm106_vm0, %v4818_v34 }
  0x34   :  { %3826 = vmatmul.msk.bf16.gmra.mxu3 %vm106_vm0, %v4830_v38 }
  0x41   :  { %3587 = vmatmul.msk.bf16.gmra.mxu0 %vm106_vm0, %v4795_v39 }
  0x42   :  { %3667 = vmatmul.msk.bf16.gmra.mxu1 %vm106_vm0, %v4807_v40 }
  0x43   :  { %3747 = vmatmul.msk.bf16.gmra.mxu2 %vm106_vm0, %v4819_v41  ;;  %v4842_v41 = vld [vmem:[%s6154_s0 + $0xa0] sm:$0xff] }
  0x44   :  { %3827 = vmatmul.msk.bf16.gmra.mxu3 %vm106_vm0, %v4831_v43  ;;  %v4854_v43 = vld [vmem:[%s6154_s0 + $0xe8] sm:$0xff] }
  0x51   :  { %3588 = vmatmul.msk.bf16.gmra.mxu0 %vm106_vm0, %v4796_v44 }
  0x52   :  { %3668 = vmatmul.msk.bf16.gmra.mxu1 %vm106_vm0, %v4808_v45 }
  0x53   :  { %3748 = vmatmul.msk.bf16.gmra.mxu2 %vm106_vm0, %v4820_v46 }
  0x54   :  { %3828 = vmatmul.msk.bf16.gmra.mxu3 %vm106_vm0, %v4832_v50 }
  0x61   :  { %3589 = vmatmul.msk.bf16.gmra.mxu0 %vm106_vm0, %v4797_v51  ;;  %v4934_v51 = vld [vmem:[%s6153_s1 + $0x170] sm:$0xff] }
  0x62   :  { %3669 = vmatmul.msk.bf16.gmra.mxu1 %vm106_vm0, %v4809_v52  ;;  %2426 = vmatpush.bf16.msra.mxu3 %v4934_v51  ;;  %v4896_v51 = vld [vmem:[%s6153_s1 + $0x100] sm:$0xff] }
  0x63   :  { %3749 = vmatmul.msk.bf16.gmra.mxu2 %vm106_vm0, %v4821_v53 }
  0x64   :  { %3829 = vmatmul.msk.bf16.gmra.mxu3 %vm106_vm0, %v4833_v55  ;;  %v4878_v55 = vld [vmem:[%s6154_s0 + $0x10c] sm:$0xff] }
  0x71   :  { %3590 = vmatmul.msk.bf16.gmra.mxu0 %vm106_vm0, %v4798_v56 }
  0x72   :  { %3670 = vmatmul.msk.bf16.gmra.mxu1 %vm106_vm0, %v4810_v57 }
  0x73   :  { %3750 = vmatmul.msk.bf16.gmra.mxu2 %vm106_vm0, %v4822_v58 }
  0x74   :  { %3830 = vmatmul.msk.bf16.gmra.mxu3 %vm106_vm0, %v4834_v59 }
  0x81   :  { %3591 = vmatmul.msk.bf16.gmra.mxu0 %vm106_vm0, %v4799_v61 }
  0x82   :  { %3671 = vmatmul.msk.bf16.gmra.mxu1 %vm106_vm0, %v4811_v62 }
  0x83   :  { %3751 = vmatmul.msk.bf16.gmra.mxu2 %vm106_vm0, %v4823_v63  ;;  %v4897_v63 = vld [vmem:[%s6153_s1 + $0x108] sm:$0xff] }
  0x84   :  { %3831 = vmatmul.msk.bf16.gmra.mxu3 %vm106_vm0, %v4835_v0  ;;  %1794 = vmatpush.bf16.msra.mxu0 %v4897_v63 }
  0x88   :  { %1795 = vmatpush.bf16.msra.mxu0 %v4896_v51 }
  0x8e   :  { %v140_v5 = vpop.f32.mrf.mxu0 }
  0x8f   :  { %v320_v6 = vpop.f32.mrf.mxu1  ;;  %181 = vst.msk [vmem:[#allocation2] sm:$0xff] %vm180_vm1, %v140_v5  ;;  %v4855_v5 = vld [vmem:[%s6154_s0 + $0xf0] sm:$0xff] }
  0x91   :  { %3904 = vmatmul.msk.bf16.vlgmr.msrb.gmra.mxu0 %vm106_vm0, %v4840_v3  ;;  %v4843_v3 = vld [vmem:[%s6154_s0 + $0xa8] sm:$0xff] }
  0x92   :  { %3984 = vmatmul.msk.bf16.vlgmr.msrb.gmra.mxu1 %vm106_vm0, %v4852_v4 }
  0x93   :  { %4064 = vmatmul.msk.bf16.vlgmr.msrb.gmra.mxu2 %vm106_vm0, %v4864_v7 }
  0x94   :  { %4144 = vmatmul.msk.bf16.vlgmr.msrb.gmra.mxu3 %vm106_vm0, %v4876_v9  ;;  %v4867_v9 = vld [vmem:[%s6154_s0 + $0xcc] sm:$0xff] }
  0x96   :  { %v531_v10 = vpop.f32.mrf.mxu2  ;;  %v360_v11 = vld [vmem:[#allocation2] sm:$0xff]  ;;  %v142_v12 = vpop.f32.mrf.mxu0 }
  0x97   :  { %v322_v13 = vpop.f32.mrf.mxu1  ;;  %v376_v14 = vadd.f32 %v360_v11, %v320_v6  ;;  %182 = vst.msk [vmem:[#allocation2 + $0x8] sm:$0xff] %vm180_vm1, %v142_v12  ;;  %v742_v16 = vpop.f32.mrf.mxu3 }
  0x99   :  { %392 = vst.msk [vmem:[#allocation2] sm:$0xff] %vm180_vm1, %v376_v14 }
  0x9e   :  { %v533_v18 = vpop.f32.mrf.mxu2  ;;  %v361_v20 = vld [vmem:[#allocation2 + $0x8] sm:$0xff]  ;;  %v145_v21 = vpop.f32.mrf.mxu0 }
  0x9f   :  { %v325_v22 = vpop.f32.mrf.mxu1  ;;  %v377_v24 = vadd.f32 %v361_v20, %v322_v13  ;;  %183 = vst.msk [vmem:[#allocation2 + $0x10] sm:$0xff] %vm180_vm1, %v145_v21  ;;  %v744_v27 = vpop.f32.mrf.mxu3 }
  0xa0   :  { %v571_v25 = vld [vmem:[#allocation2] sm:$0xff] }
  0xa1   :  { %393 = vst.msk [vmem:[#allocation2 + $0x8] sm:$0xff] %vm180_vm1, %v377_v24  ;;  %v587_v26 = vadd.f32 %v571_v25, %v531_v10  ;;  %3905 = vmatmul.msk.bf16.gmra.mxu0 %vm106_vm0, %v4841_v17  ;;  %v4909_v17 = vld [vmem:[%s6153_s1 + $0x128] sm:$0xff] }
  0xa2   :  { %3985 = vmatmul.msk.bf16.gmra.mxu1 %vm106_vm0, %v4853_v19  ;;  %v4921_v19 = vld [vmem:[%s6153_s1 + $0x148] sm:$0xff] }
  0xa3   :  { %4065 = vmatmul.msk.bf16.gmra.mxu2 %vm106_vm0, %v4865_v23  ;;  %603 = vst.msk [vmem:[#allocation2] sm:$0xff] %vm180_vm1, %v587_v26  ;;  %2005 = vmatpush.bf16.msra.mxu1 %v4909_v17  ;;  %v4846_v17 = vld [vmem:[%s6154_s0 + $0x1c0] sm:$0xff] }
  0xa4   :  { %4145 = vmatmul.msk.bf16.gmra.mxu3 %vm106_vm0, %v4877_v28  ;;  %2216 = vmatpush.bf16.msra.mxu2 %v4921_v19  ;;  %v4858_v19 = vld [vmem:[%s6154_s0 + $0x208] sm:$0xff] }
  0xa6   :  { %v536_v30 = vpop.f32.mrf.mxu2  ;;  %v362_v32 = vld [vmem:[#allocation2 + $0x10] sm:$0xff]  ;;  %v147_v33 = vpop.f32.mrf.mxu0 }
  0xa7   :  { %v327_v34 = vpop.f32.mrf.mxu1  ;;  %v378_v35 = vadd.f32 %v362_v32, %v325_v22  ;;  %184 = vst.msk [vmem:[#allocation2 + $0x18] sm:$0xff] %vm180_vm1, %v147_v33  ;;  %v747_v39 = vpop.f32.mrf.mxu3 }
  0xa8   :  { %v572_v36 = vld [vmem:[#allocation2 + $0x8] sm:$0xff] }
  0xa9   :  { %394 = vst.msk [vmem:[#allocation2 + $0x10] sm:$0xff] %vm180_vm1, %v378_v35  ;;  %v588_v37 = vadd.f32 %v572_v36, %v533_v18  ;;  %v4868_v35 = vld [vmem:[%s6154_s0 + $0x1d4] sm:$0xff] }
  0xaa   :  { %v782_v38 = vld [vmem:[#allocation2] sm:$0xff] }
  0xab   :  { %604 = vst.msk [vmem:[#allocation2 + $0x8] sm:$0xff] %vm180_vm1, %v588_v37  ;;  %v798_v40 = vadd.f32 %v782_v38, %v742_v16  ;;  %v4879_v16 = vld [vmem:[%s6154_s0 + $0x114] sm:$0xff] }
  0xad   :  { %814 = vst.msk [vmem:[#allocation2] sm:$0xff] %vm180_vm1, %v798_v40 }
  0xae   :  { %v538_v42 = vpop.f32.mrf.mxu2  ;;  %v363_v44 = vld [vmem:[#allocation2 + $0x18] sm:$0xff]  ;;  %v150_v45 = vpop.f32.mrf.mxu0 }
  0xaf   :  { %v330_v46 = vpop.f32.mrf.mxu1  ;;  %v379_v48 = vadd.f32 %v363_v44, %v327_v34  ;;  %185 = vst.msk [vmem:[#allocation2 + $0x20] sm:$0xff] %vm180_vm1, %v150_v45  ;;  %v749_v53 = vpop.f32.mrf.mxu3 }
  0xb0   :  { %v573_v49 = vld [vmem:[#allocation2 + $0x10] sm:$0xff] }
  0xb1   :  { %395 = vst.msk [vmem:[#allocation2 + $0x18] sm:$0xff] %vm180_vm1, %v379_v48  ;;  %v589_v50 = vadd.f32 %v573_v49, %v536_v30  ;;  %3906 = vmatmul.msk.bf16.gmra.mxu0 %vm106_vm0, %v4842_v41 }
  0xb2   :  { %3986 = vmatmul.msk.bf16.gmra.mxu1 %vm106_vm0, %v4854_v43  ;;  %v783_v52 = vld [vmem:[#allocation2 + $0x8] sm:$0xff]  ;;  %v4880_v43 = vld [vmem:[%s6154_s0 + $0x21c] sm:$0xff] }
  0xb3   :  { %4066 = vmatmul.msk.bf16.gmra.mxu2 %vm106_vm0, %v4866_v47  ;;  %605 = vst.msk [vmem:[#allocation2 + $0x10] sm:$0xff] %vm180_vm1, %v589_v50  ;;  %v799_v54 = vadd.f32 %v783_v52, %v744_v27 }
  0xb4   :  { %4146 = vmatmul.msk.bf16.gmra.mxu3 %vm106_vm0, %v4878_v55  ;;  %v4845_v55 = vld [vmem:[%s6154_s0 + $0x1b8] sm:$0xff] }
  0xb5   :  { %815 = vst.msk [vmem:[#allocation2 + $0x8] sm:$0xff] %vm180_vm1, %v799_v54 }
  0xb6   :  { %v541_v56 = vpop.f32.mrf.mxu2  ;;  %v364_v57 = vld [vmem:[#allocation2 + $0x20] sm:$0xff]  ;;  %v152_v58 = vpop.f32.mrf.mxu0 }
  0xb7   :  { %v332_v59 = vpop.f32.mrf.mxu1  ;;  %v380_v60 = vadd.f32 %v364_v57, %v330_v46  ;;  %186 = vst.msk [vmem:[#allocation2 + $0x28] sm:$0xff] %vm180_vm1, %v152_v58  ;;  %v752_v1 = vpop.f32.mrf.mxu3  ;;  %v4857_v57 = vld [vmem:[%s6154_s0 + $0x200] sm:$0xff] }
  0xb8   :  { %v574_v61 = vld [vmem:[#allocation2 + $0x18] sm:$0xff] }
  0xb9   :  { %396 = vst.msk [vmem:[#allocation2 + $0x20] sm:$0xff] %vm180_vm1, %v380_v60  ;;  %v590_v62 = vadd.f32 %v574_v61, %v538_v42  ;;  %v4869_v61 = vld [vmem:[%s6154_s0 + $0x1dc] sm:$0xff] }
  0xba   :  { %v784_v0 = vld [vmem:[#allocation2 + $0x10] sm:$0xff] }
  0xbb   :  { %606 = vst.msk [vmem:[#allocation2 + $0x18] sm:$0xff] %vm180_vm1, %v590_v62  ;;  %v800_v2 = vadd.f32 %v784_v0, %v747_v39  ;;  %v4933_v39 = vld [vmem:[%s6153_s1 + $0x168] sm:$0xff] }
  0xbc   :  { %2427 = vmatpush.bf16.msra.mxu3 %v4933_v39 }
  0xbd   :  { %816 = vst.msk [vmem:[#allocation2 + $0x10] sm:$0xff] %vm180_vm1, %v800_v2 }
  0xbe   :  { %v543_v4 = vpop.f32.mrf.mxu2  ;;  %v365_v6 = vld [vmem:[#allocation2 + $0x28] sm:$0xff]  ;;  %v155_v7 = vpop.f32.mrf.mxu0 }
  0xbf   :  { %v335_v8 = vpop.f32.mrf.mxu1  ;;  %v381_v10 = vadd.f32 %v365_v6, %v332_v59  ;;  %187 = vst.msk [vmem:[#allocation2 + $0x30] sm:$0xff] %vm180_vm1, %v155_v7  ;;  %v754_v14 = vpop.f32.mrf.mxu3  ;;  %v4920_v7 = vld [vmem:[%s6153_s1 + $0x140] sm:$0xff] }
  0xc0   :  { %v575_v11 = vld [vmem:[#allocation2 + $0x20] sm:$0xff]  ;;  %2217 = vmatpush.bf16.msra.mxu2 %v4920_v7  ;;  %v4900_v7 = vld [vmem:[%s6154_s0 + $0x4c] sm:$0xff] }
  0xc1   :  { %397 = vst.msk [vmem:[#allocation2 + $0x28] sm:$0xff] %vm180_vm1, %v381_v10  ;;  %v591_v12 = vadd.f32 %v575_v11, %v541_v56  ;;  %3907 = vmatmul.msk.bf16.gmra.mxu0 %vm106_vm0, %v4843_v3 }
  0xc2   :  { %3987 = vmatmul.msk.bf16.gmra.mxu1 %vm106_vm0, %v4855_v5  ;;  %v785_v13 = vld [vmem:[#allocation2 + $0x18] sm:$0xff]  ;;  %v4908_v5 = vld [vmem:[%s6153_s1 + $0x120] sm:$0xff] }
  0xc3   :  { %4067 = vmatmul.msk.bf16.gmra.mxu2 %vm106_vm0, %v4867_v9  ;;  %607 = vst.msk [vmem:[#allocation2 + $0x20] sm:$0xff] %vm180_vm1, %v591_v12  ;;  %v801_v15 = vadd.f32 %v785_v13, %v749_v53  ;;  %2006 = vmatpush.bf16.msra.mxu1 %v4908_v5  ;;  %v4888_v5 = vld [vmem:[%s6154_s0 + $0x4] sm:$0xff] }
  0xc4   :  { %4147 = vmatmul.msk.bf16.gmra.mxu3 %vm106_vm0, %v4879_v16 }
  0xc5   :  { %817 = vst.msk [vmem:[#allocation2 + $0x18] sm:$0xff] %vm180_vm1, %v801_v15 }
  0xc6   :  { %v546_v18 = vpop.f32.mrf.mxu2  ;;  %v366_v20 = vld [vmem:[#allocation2 + $0x30] sm:$0xff]  ;;  %v157_v21 = vpop.f32.mrf.mxu0 }
  0xc7   :  { %v337_v22 = vpop.f32.mrf.mxu1  ;;  %v382_v23 = vadd.f32 %v366_v20, %v335_v8  ;;  %188 = vst.msk [vmem:[#allocation2 + $0x38] sm:$0xff] %vm180_vm1, %v157_v21  ;;  %v757_v27 = vpop.f32.mrf.mxu3 }
  0xc8   :  { %v576_v24 = vld [vmem:[#allocation2 + $0x28] sm:$0xff] }
  0xc9   :  { %398 = vst.msk [vmem:[#allocation2 + $0x30] sm:$0xff] %vm180_vm1, %v382_v23  ;;  %v592_v25 = vadd.f32 %v576_v24, %v543_v4  ;;  %v4881_v4 = vld [vmem:[%s6154_s0 + $0x224] sm:$0xff] }
  0xca   :  { %v786_v26 = vld [vmem:[#allocation2 + $0x20] sm:$0xff] }
  0xcb   :  { %608 = vst.msk [vmem:[#allocation2 + $0x28] sm:$0xff] %vm180_vm1, %v592_v25  ;;  %v802_v28 = vadd.f32 %v786_v26, %v752_v1  ;;  %v4870_v23 = vld [vmem:[%s6154_s0 + $0x1e4] sm:$0xff] }
  0xcd   :  { %818 = vst.msk [vmem:[#allocation2 + $0x20] sm:$0xff] %vm180_vm1, %v802_v28 }
  0xce   :  { %v548_v30 = vpop.f32.mrf.mxu2  ;;  %v367_v32 = vld [vmem:[#allocation2 + $0x38] sm:$0xff]  ;;  %v160_v33 = vpop.f32.mrf.mxu0 }
  0xcf   :  { %v340_v34 = vpop.f32.mrf.mxu1  ;;  %v383_v36 = vadd.f32 %v367_v32, %v337_v22  ;;  %189 = vst.msk [vmem:[#allocation2 + $0x40] sm:$0xff] %vm180_vm1, %v160_v33  ;;  %v759_v41 = vpop.f32.mrf.mxu3 }
  0xd0   :  { %v577_v37 = vld [vmem:[#allocation2 + $0x30] sm:$0xff] }
  0xd1   :  { %399 = vst.msk [vmem:[#allocation2 + $0x38] sm:$0xff] %vm180_vm1, %v383_v36  ;;  %v593_v38 = vadd.f32 %v577_v37, %v546_v18  ;;  %3908 = vmatmul.msk.bf16.gmra.mxu0 %vm106_vm0, %v4844_v29 }
  0xd2   :  { %3988 = vmatmul.msk.bf16.gmra.mxu1 %vm106_vm0, %v4856_v31  ;;  %v787_v40 = vld [vmem:[#allocation2 + $0x28] sm:$0xff] }
  0xd3   :  { %4068 = vmatmul.msk.bf16.gmra.mxu2 %vm106_vm0, %v4868_v35  ;;  %609 = vst.msk [vmem:[#allocation2 + $0x30] sm:$0xff] %vm180_vm1, %v593_v38  ;;  %v803_v42 = vadd.f32 %v787_v40, %v754_v14  ;;  %v4882_v31 = vld [vmem:[%s6154_s0 + $0x22c] sm:$0xff] }
  0xd4   :  { %4148 = vmatmul.msk.bf16.gmra.mxu3 %vm106_vm0, %v4880_v43  ;;  %v4847_v43 = vld [vmem:[%s6154_s0 + $0x1c8] sm:$0xff] }
  0xd5   :  { %819 = vst.msk [vmem:[#allocation2 + $0x28] sm:$0xff] %vm180_vm1, %v803_v42  ;;  %v4947_v42 = vld [vmem:[%s6153_s1 + $0x198] sm:$0xff] }
  0xd6   :  { %v551_v44 = vpop.f32.mrf.mxu2  ;;  %v368_v45 = vld [vmem:[#allocation2 + $0x40] sm:$0xff]  ;;  %v162_v46 = vpop.f32.mrf.mxu0  ;;  %2636 = vmatpush.bf16.msrb.mxu0 %v4947_v42 }
  0xd7   :  { %v342_v47 = vpop.f32.mrf.mxu1  ;;  %v384_v48 = vadd.f32 %v368_v45, %v340_v34  ;;  %190 = vst.msk [vmem:[#allocation2 + $0x48] sm:$0xff] %vm180_vm1, %v162_v46  ;;  %v762_v53 = vpop.f32.mrf.mxu3  ;;  %v4859_v45 = vld [vmem:[%s6154_s0 + $0x210] sm:$0xff] }
  0xd8   :  { %v578_v49 = vld [vmem:[#allocation2 + $0x38] sm:$0xff] }
  0xd9   :  { %400 = vst.msk [vmem:[#allocation2 + $0x40] sm:$0xff] %vm180_vm1, %v384_v48  ;;  %v594_v50 = vadd.f32 %v578_v49, %v548_v30  ;;  %v4871_v49 = vld [vmem:[%s6154_s0 + $0x1ec] sm:$0xff] }
  0xda   :  { %v788_v52 = vld [vmem:[#allocation2 + $0x30] sm:$0xff] }
  0xdb   :  { %610 = vst.msk [vmem:[#allocation2 + $0x38] sm:$0xff] %vm180_vm1, %v594_v50  ;;  %v804_v54 = vadd.f32 %v788_v52, %v757_v27  ;;  %v4932_v27 = vld [vmem:[%s6153_s1 + $0x160] sm:$0xff] }
  0xdc   :  { %2428 = vmatpush.bf16.msra.mxu3 %v4932_v27 }
  0xdd   :  { %820 = vst.msk [vmem:[#allocation2 + $0x30] sm:$0xff] %vm180_vm1, %v804_v54 }
  0xde   :  { %v553_v56 = vpop.f32.mrf.mxu2  ;;  %v369_v58 = vld [vmem:[#allocation2 + $0x48] sm:$0xff]  ;;  %v165_v59 = vpop.f32.mrf.mxu0 }
  0xdf   :  { %v345_v60 = vpop.f32.mrf.mxu1  ;;  %v385_v62 = vadd.f32 %v369_v58, %v342_v47  ;;  %191 = vst.msk [vmem:[#allocation2 + $0x50] sm:$0xff] %vm180_vm1, %v165_v59  ;;  %v764_v2 = vpop.f32.mrf.mxu3 }
  0xe0   :  { %v579_v63 = vld [vmem:[#allocation2 + $0x40] sm:$0xff] }
  0xe1   :  { %401 = vst.msk [vmem:[#allocation2 + $0x48] sm:$0xff] %vm180_vm1, %v385_v62  ;;  %v595_v0 = vadd.f32 %v579_v63, %v551_v44  ;;  %3909 = vmatmul.msk.bf16.gmra.mxu0 %vm106_vm0, %v4845_v55  ;;  %v4971_v62 = vld [vmem:[%s6153_s1 + $0x1d8] sm:$0xff] }
  0xe2   :  { %3989 = vmatmul.msk.bf16.gmra.mxu1 %vm106_vm0, %v4857_v57  ;;  %v789_v1 = vld [vmem:[#allocation2 + $0x38] sm:$0xff]  ;;  %3058 = vmatpush.bf16.msrb.mxu2 %v4971_v62 }
  0xe3   :  { %4069 = vmatmul.msk.bf16.gmra.mxu2 %vm106_vm0, %v4869_v61  ;;  %611 = vst.msk [vmem:[#allocation2 + $0x40] sm:$0xff] %vm180_vm1, %v595_v0  ;;  %v805_v3 = vadd.f32 %v789_v1, %v759_v41  ;;  %v4959_v61 = vld [vmem:[%s6153_s1 + $0x1b8] sm:$0xff] }
  0xe4   :  { %4149 = vmatmul.msk.bf16.gmra.mxu3 %vm106_vm0, %v4881_v4  ;;  %2847 = vmatpush.bf16.msrb.mxu1 %v4959_v61 }
  0xe5   :  { %821 = vst.msk [vmem:[#allocation2 + $0x38] sm:$0xff] %vm180_vm1, %v805_v3 }
  0xe6   :  { %v556_v6 = vpop.f32.mrf.mxu2  ;;  %v370_v8 = vld [vmem:[#allocation2 + $0x50] sm:$0xff]  ;;  %v167_v9 = vpop.f32.mrf.mxu0 }
  0xe7   :  { %v347_v10 = vpop.f32.mrf.mxu1  ;;  %v386_v11 = vadd.f32 %v370_v8, %v345_v60  ;;  %192 = vst.msk [vmem:[#allocation2 + $0x58] sm:$0xff] %vm180_vm1, %v167_v9  ;;  %v767_v15 = vpop.f32.mrf.mxu3 }
  0xe8   :  { %v580_v12 = vld [vmem:[#allocation2 + $0x48] sm:$0xff] }
  0xe9   :  { %402 = vst.msk [vmem:[#allocation2 + $0x50] sm:$0xff] %vm180_vm1, %v386_v11  ;;  %v596_v13 = vadd.f32 %v580_v12, %v553_v56  ;;  %v4883_v56 = vld [vmem:[%s6154_s0 + $0x234] sm:$0xff]  ;;  %v4912_v12 = vld [vmem:[%s6154_s0 + $0x28] sm:$0xff] }
  0xea   :  { %v790_v14 = vld [vmem:[#allocation2 + $0x40] sm:$0xff] }
  0xeb   :  { %612 = vst.msk [vmem:[#allocation2 + $0x48] sm:$0xff] %vm180_vm1, %v596_v13  ;;  %v806_v16 = vadd.f32 %v790_v14, %v762_v53 }
  0xed   :  { %822 = vst.msk [vmem:[#allocation2 + $0x40] sm:$0xff] %vm180_vm1, %v806_v16 }
  0xee   :  { %v558_v18 = vpop.f32.mrf.mxu2  ;;  %v371_v20 = vld [vmem:[#allocation2 + $0x58] sm:$0xff]  ;;  %v170_v21 = vpop.f32.mrf.mxu0 }
  0xef   :  { %v350_v22 = vpop.f32.mrf.mxu1  ;;  %v387_v24 = vadd.f32 %v371_v20, %v347_v10  ;;  %193 = vst.msk [vmem:[#allocation2 + $0x60] sm:$0xff] %vm180_vm1, %v170_v21  ;;  %v769_v29 = vpop.f32.mrf.mxu3  ;;  %v993_v10 = vld [vmem:[#allocation2] sm:$0xff]  ;;  %v4924_v20 = vld [vmem:[%s6154_s0 + $0x70] sm:$0xff]  ;;  %v4983_v21 = vld [vmem:[%s6153_s1 + $0x1f8] sm:$0xff] }
  0xf0   :  { %v581_v25 = vld [vmem:[#allocation2 + $0x50] sm:$0xff]  ;;  %3269 = vmatpush.bf16.msrb.mxu3 %v4983_v21 }
  0xf1   :  { %403 = vst.msk [vmem:[#allocation2 + $0x58] sm:$0xff] %vm180_vm1, %v387_v24  ;;  %v597_v26 = vadd.f32 %v581_v25, %v556_v6  ;;  %3910 = vmatmul.msk.bf16.gmra.mxu0 %vm106_vm0, %v4846_v17  ;;  %v994_v24 = vld [vmem:[#allocation2 + $0x8] sm:$0xff] }
  0xf2   :  { %3990 = vmatmul.msk.bf16.gmra.mxu1 %vm106_vm0, %v4858_v19  ;;  %v791_v28 = vld [vmem:[#allocation2 + $0x48] sm:$0xff] }
  0xf3   :  { %4070 = vmatmul.msk.bf16.gmra.mxu2 %vm106_vm0, %v4870_v23  ;;  %613 = vst.msk [vmem:[#allocation2 + $0x50] sm:$0xff] %vm180_vm1, %v597_v26  ;;  %v807_v30 = vadd.f32 %v791_v28, %v764_v2 }
  0xf4   :  { %4150 = vmatmul.msk.bf16.gmra.mxu3 %vm106_vm0, %v4882_v31 }
  0xf5   :  { %823 = vst.msk [vmem:[#allocation2 + $0x48] sm:$0xff] %vm180_vm1, %v807_v30 }
  0xf6   :  { %v561_v32 = vpop.f32.mrf.mxu2  ;;  %v372_v33 = vld [vmem:[#allocation2 + $0x60] sm:$0xff]  ;;  %v172_v34 = vpop.f32.mrf.mxu0 }
  0xf7   :  { %v352_v35 = vpop.f32.mrf.mxu1  ;;  %v388_v36 = vadd.f32 %v372_v33, %v350_v22  ;;  %194 = vst.msk [vmem:[#allocation2 + $0x68] sm:$0xff] %vm180_vm1, %v172_v34  ;;  %v772_v40 = vpop.f32.mrf.mxu3  ;;  %v4946_v34 = vld [vmem:[%s6153_s1 + $0x190] sm:$0xff] }
  0xf8   :  { %v582_v37 = vld [vmem:[#allocation2 + $0x58] sm:$0xff]  ;;  %2637 = vmatpush.bf16.msrb.mxu0 %v4946_v34 }
  0xf9   :  { %404 = vst.msk [vmem:[#allocation2 + $0x60] sm:$0xff] %vm180_vm1, %v388_v36  ;;  %v598_v38 = vadd.f32 %v582_v37, %v558_v18  ;;  %v4901_v37 = vld [vmem:[%s6154_s0 + $0x54] sm:$0xff] }
  0xfa   :  { %v792_v39 = vld [vmem:[#allocation2 + $0x50] sm:$0xff] }
  0xfb   :  { %614 = vst.msk [vmem:[#allocation2 + $0x58] sm:$0xff] %vm180_vm1, %v598_v38  ;;  %v808_v41 = vadd.f32 %v792_v39, %v767_v15  ;;  %v995_v39 = vld [vmem:[#allocation2 + $0x10] sm:$0xff] }
  0xfd   :  { %824 = vst.msk [vmem:[#allocation2 + $0x50] sm:$0xff] %vm180_vm1, %v808_v41  ;;  %v4913_v41 = vld [vmem:[%s6154_s0 + $0x30] sm:$0xff] }
  0xfe   :  { %v563_v44 = vpop.f32.mrf.mxu2  ;;  %v373_v46 = vld [vmem:[#allocation2 + $0x68] sm:$0xff]  ;;  %v175_v47 = vpop.f32.mrf.mxu0 }
  0xff   :  { %v355_v48 = vpop.f32.mrf.mxu1  ;;  %v389_v50 = vadd.f32 %v373_v46, %v352_v35  ;;  %195 = vst.msk [vmem:[#allocation2 + $0x70] sm:$0xff] %vm180_vm1, %v175_v47  ;;  %v774_v54 = vpop.f32.mrf.mxu3  ;;  %v4889_v35 = vld [vmem:[%s6154_s0 + $0xc] sm:$0xff] }
 0x100   :  { %v583_v51 = vld [vmem:[#allocation2 + $0x60] sm:$0xff] }
 0x101   :  { %405 = vst.msk [vmem:[#allocation2 + $0x68] sm:$0xff] %vm180_vm1, %v389_v50  ;;  %v599_v52 = vadd.f32 %v583_v51, %v561_v32  ;;  %3911 = vmatmul.msk.bf16.gmra.mxu0 %vm106_vm0, %v4847_v43 }
 0x102   :  { %3991 = vmatmul.msk.bf16.gmra.mxu1 %vm106_vm0, %v4859_v45  ;;  %v793_v53 = vld [vmem:[#allocation2 + $0x58] sm:$0xff] }
 0x103   :  { %4071 = vmatmul.msk.bf16.gmra.mxu2 %vm106_vm0, %v4871_v49  ;;  %615 = vst.msk [vmem:[#allocation2 + $0x60] sm:$0xff] %vm180_vm1, %v599_v52  ;;  %v809_v55 = vadd.f32 %v793_v53, %v769_v29  ;;  %v4925_v49 = vld [vmem:[%s6154_s0 + $0x78] sm:$0xff]  ;;  %v4958_v52 = vld [vmem:[%s6153_s1 + $0x1b0] sm:$0xff] }
 0x104   :  { %4151 = vmatmul.msk.bf16.gmra.mxu3 %vm106_vm0, %v4883_v56  ;;  %2848 = vmatpush.bf16.msrb.mxu1 %v4958_v52 }
 0x105   :  { %825 = vst.msk [vmem:[#allocation2 + $0x58] sm:$0xff] %vm180_vm1, %v809_v55 }
 0x106   :  { %v566_v57 = vpop.f32.mrf.mxu2  ;;  %v374_v58 = vld [vmem:[#allocation2 + $0x70] sm:$0xff]  ;;  %v177_v59 = vpop.f32.mrf.mxu0 }
 0x107   :  { %v357_v60 = vpop.f32.mrf.mxu1  ;;  %v390_v63 = vadd.f32 %v374_v58, %v355_v48  ;;  %196 = vst.msk [vmem:[#allocation2 + $0x78] sm:$0xff] %vm180_vm1, %v177_v59  ;;  %v777_v3 = vpop.f32.mrf.mxu3 }
 0x108   :  { %v584_v0 = vld [vmem:[#allocation2 + $0x68] sm:$0xff] }
 0x109   :  { %406 = vst.msk [vmem:[#allocation2 + $0x70] sm:$0xff] %vm180_vm1, %v390_v63  ;;  %v600_v1 = vadd.f32 %v584_v0, %v563_v44  ;;  %v4890_v0 = vld [vmem:[%s6154_s0 + $0x14] sm:$0xff] }
 0x10a   :  { %v794_v2 = vld [vmem:[#allocation2 + $0x60] sm:$0xff] }
 0x10b   :  { %616 = vst.msk [vmem:[#allocation2 + $0x68] sm:$0xff] %vm180_vm1, %v600_v1  ;;  %v810_v4 = vadd.f32 %v794_v2, %v772_v40  ;;  %v4902_v2 = vld [vmem:[%s6154_s0 + $0x5c] sm:$0xff] }
 0x10d   :  { %826 = vst.msk [vmem:[#allocation2 + $0x60] sm:$0xff] %vm180_vm1, %v810_v4 }
 0x10e   :  { %v568_v6 = vpop.f32.mrf.mxu2  ;;  %v375_v8 = vld [vmem:[#allocation2 + $0x78] sm:$0xff]  ;;  %v953_v9 = vpop.f32.mrf.mxu0 }
 0x10f   :  { %v1164_v11 = vpop.f32.mrf.mxu1  ;;  %v391_v13 = vadd.f32 %v375_v8, %v357_v60  ;;  %v1009_v14 = vadd.f32 %v993_v10, %v953_v9  ;;  %v779_v18 = vpop.f32.mrf.mxu3 }
 0x110   :  { %v585_v15 = vld [vmem:[#allocation2 + $0x70] sm:$0xff] }
 0x111   :  { %407 = vst.msk [vmem:[#allocation2 + $0x78] sm:$0xff] %vm180_vm1, %v391_v13  ;;  %v601_v16 = vadd.f32 %v585_v15, %v566_v57  ;;  %4224 = vmatmul.msk.bf16.vlgmr.msra.gmra.mxu0 %vm106_vm0, %v4888_v5  ;;  %v4970_v57 = vld [vmem:[%s6153_s1 + $0x1d0] sm:$0xff]  ;;  %v997_v5 = vld [vmem:[#allocation2 + $0x20] sm:$0xff] }
 0x112   :  { %4304 = vmatmul.msk.bf16.vlgmr.msra.gmra.mxu1 %vm106_vm0, %v4900_v7  ;;  %v795_v17 = vld [vmem:[#allocation2 + $0x68] sm:$0xff]  ;;  %1025 = vst.msk [vmem:[#allocation2] sm:$0xff] %vm180_vm1, %v1009_v14  ;;  %3059 = vmatpush.bf16.msrb.mxu2 %v4970_v57  ;;  %v4914_v7 = vld [vmem:[%s6154_s0 + $0x38] sm:$0xff]  ;;  %v4926_v14 = vld [vmem:[%s6154_s0 + $0x80] sm:$0xff] }
 0x113   :  { %4384 = vmatmul.msk.bf16.vlgmr.msra.gmra.mxu2 %vm106_vm0, %v4912_v12  ;;  %617 = vst.msk [vmem:[#allocation2 + $0x70] sm:$0xff] %vm180_vm1, %v601_v16  ;;  %v811_v19 = vadd.f32 %v795_v17, %v774_v54  ;;  %v996_v54 = vld [vmem:[#allocation2 + $0x18] sm:$0xff]  ;;  %v4982_v15 = vld [vmem:[%s6153_s1 + $0x1f0] sm:$0xff] }
 0x114   :  { %4464 = vmatmul.msk.bf16.vlgmr.msra.gmra.mxu3 %vm106_vm0, %v4924_v20  ;;  %v998_v20 = vld [vmem:[#allocation2 + $0x28] sm:$0xff] }
 0x115   :  { %827 = vst.msk [vmem:[#allocation2 + $0x68] sm:$0xff] %vm180_vm1, %v811_v19  ;;  %3270 = vmatpush.bf16.msrb.mxu3 %v4982_v15 }
 0x116   :  { %v1375_v22 = vpop.f32.mrf.mxu2  ;;  %v955_v23 = vpop.f32.mrf.mxu0 }
 0x117   :  { %v1166_v25 = vpop.f32.mrf.mxu1  ;;  %v1010_v26 = vadd.f32 %v994_v24, %v955_v23  ;;  %v1586_v32 = vpop.f32.mrf.mxu3 }
 0x118   :  { %v586_v27 = vld [vmem:[#allocation2 + $0x78] sm:$0xff] }
 0x119   :  { %v1204_v28 = vld [vmem:[#allocation2] sm:$0xff]  ;;  %v602_v29 = vadd.f32 %v586_v27, %v568_v6  ;;  %1026 = vst.msk [vmem:[#allocation2 + $0x8] sm:$0xff] %vm180_vm1, %v1010_v26 }
 0x11a   :  { %v1220_v30 = vadd.f32 %v1204_v28, %v1164_v11  ;;  %v796_v31 = vld [vmem:[#allocation2 + $0x70] sm:$0xff]  ;;  %v4945_v28 = vld [vmem:[%s6153_s1 + $0x188] sm:$0xff] }
 0x11b   :  { %618 = vst.msk [vmem:[#allocation2 + $0x78] sm:$0xff] %vm180_vm1, %v602_v29  ;;  %v812_v33 = vadd.f32 %v796_v31, %v777_v3  ;;  %v4891_v31 = vld [vmem:[%s6154_s0 + $0x1c] sm:$0xff]  ;;  %2638 = vmatpush.bf16.msrb.mxu0 %v4945_v28 }
 0x11c   :  { %1236 = vst.msk [vmem:[#allocation2] sm:$0xff] %vm180_vm1, %v1220_v30 }
 0x11d   :  { %828 = vst.msk [vmem:[#allocation2 + $0x70] sm:$0xff] %vm180_vm1, %v812_v33  ;;  %v4903_v33 = vld [vmem:[%s6154_s0 + $0x64] sm:$0xff] }
 0x11e   :  { %v1377_v36 = vpop.f32.mrf.mxu2  ;;  %v958_v38 = vpop.f32.mrf.mxu0 }
 0x11f   :  { %v1169_v40 = vpop.f32.mrf.mxu1  ;;  %v1011_v42 = vadd.f32 %v995_v39, %v958_v38  ;;  %v1588_v46 = vpop.f32.mrf.mxu3 }
 0x120   :  { %v1205_v43 = vld [vmem:[#allocation2 + $0x8] sm:$0xff] }
 0x121   :  { %v1221_v44 = vadd.f32 %v1205_v43, %v1166_v25  ;;  %1027 = vst.msk [vmem:[#allocation2 + $0x10] sm:$0xff] %vm180_vm1, %v1011_v42  ;;  %4225 = vmatmul.msk.bf16.gmra.mxu0 %vm106_vm0, %v4889_v35  ;;  %v999_v35 = vld [vmem:[#allocation2 + $0x30] sm:$0xff] }
 0x122   :  { %4305 = vmatmul.msk.bf16.gmra.mxu1 %vm106_vm0, %v4901_v37  ;;  %v797_v45 = vld [vmem:[#allocation2 + $0x78] sm:$0xff]  ;;  %v4915_v37 = vld [vmem:[%s6154_s0 + $0x40] sm:$0xff] }
 0x123   :  { %4385 = vmatmul.msk.bf16.gmra.mxu2 %vm106_vm0, %v4913_v41  ;;  %1237 = vst.msk [vmem:[#allocation2 + $0x8] sm:$0xff] %vm180_vm1, %v1221_v44  ;;  %v1415_v47 = vld [vmem:[#allocation2] sm:$0xff]  ;;  %v813_v48 = vadd.f32 %v797_v45, %v779_v18  ;;  %v4927_v44 = vld [vmem:[%s6154_s0 + $0x88] sm:$0xff] }
 0x124   :  { %v1431_v50 = vadd.f32 %v1415_v47, %v1375_v22  ;;  %4465 = vmatmul.msk.bf16.gmra.mxu3 %vm106_vm0, %v4925_v49 }
 0x125   :  { %829 = vst.msk [vmem:[#allocation2 + $0x78] sm:$0xff] %vm180_vm1, %v813_v48  ;;  %v4957_v48 = vld [vmem:[%s6153_s1 + $0x1a8] sm:$0xff] }
 0x126   :  { %v1380_v51 = vpop.f32.mrf.mxu2  ;;  %1447 = vst.msk [vmem:[#allocation2] sm:$0xff] %vm180_vm1, %v1431_v50  ;;  %v960_v53 = vpop.f32.mrf.mxu0  ;;  %v1000_v50 = vld [vmem:[#allocation2 + $0x38] sm:$0xff]  ;;  %2849 = vmatpush.bf16.msrb.mxu1 %v4957_v48 }
 0x127   :  { %v1171_v55 = vpop.f32.mrf.mxu1  ;;  %v1012_v56 = vadd.f32 %v996_v54, %v960_v53  ;;  %v1591_v61 = vpop.f32.mrf.mxu3  ;;  %v4969_v53 = vld [vmem:[%s6153_s1 + $0x1c8] sm:$0xff] }
 0x128   :  { %v1206_v58 = vld [vmem:[#allocation2 + $0x10] sm:$0xff]  ;;  %3060 = vmatpush.bf16.msrb.mxu2 %v4969_v53 }
 0x129   :  { %v1222_v59 = vadd.f32 %v1206_v58, %v1169_v40  ;;  %1028 = vst.msk [vmem:[#allocation2 + $0x18] sm:$0xff] %vm180_vm1, %v1012_v56 }
 0x12a   :  { %v1416_v60 = vld [vmem:[#allocation2 + $0x8] sm:$0xff] }
 0x12b   :  { %1238 = vst.msk [vmem:[#allocation2 + $0x10] sm:$0xff] %vm180_vm1, %v1222_v59  ;;  %v1432_v62 = vadd.f32 %v1416_v60, %v1377_v36 }
 0x12d   :  { %1448 = vst.msk [vmem:[#allocation2 + $0x8] sm:$0xff] %vm180_vm1, %v1432_v62  ;;  %v1626_v63 = vld [vmem:[#allocation2] sm:$0xff] }
 0x12e   :  { %v1382_v1 = vpop.f32.mrf.mxu2  ;;  %v1642_v3 = vadd.f32 %v1626_v63, %v1586_v32  ;;  %v963_v4 = vpop.f32.mrf.mxu0  ;;  %v4904_v63 = vld [vmem:[%s6154_s0 + $0x16c] sm:$0xff] }
 0x12f   :  { %v1174_v6 = vpop.f32.mrf.mxu1  ;;  %v1013_v8 = vadd.f32 %v997_v5, %v963_v4  ;;  %v1593_v12 = vpop.f32.mrf.mxu3 }
 0x130   :  { %1658 = vst.msk [vmem:[#allocation2] sm:$0xff] %vm180_vm1, %v1642_v3  ;;  %v1207_v9 = vld [vmem:[#allocation2 + $0x18] sm:$0xff]  ;;  %v4916_v3 = vld [vmem:[%s6154_s0 + $0x148] sm:$0xff] }
 0x131   :  { %v1223_v10 = vadd.f32 %v1207_v9, %v1171_v55  ;;  %1029 = vst.msk [vmem:[#allocation2 + $0x20] sm:$0xff] %vm180_vm1, %v1013_v8  ;;  %4226 = vmatmul.msk.bf16.gmra.mxu0 %vm106_vm0, %v4890_v0 }
 0x132   :  { %4306 = vmatmul.msk.bf16.gmra.mxu1 %vm106_vm0, %v4902_v2  ;;  %v1417_v11 = vld [vmem:[#allocation2 + $0x10] sm:$0xff] }
 0x133   :  { %4386 = vmatmul.msk.bf16.gmra.mxu2 %vm106_vm0, %v4914_v7  ;;  %1239 = vst.msk [vmem:[#allocation2 + $0x18] sm:$0xff] %vm180_vm1, %v1223_v10  ;;  %v1433_v13 = vadd.f32 %v1417_v11, %v1380_v51  ;;  %v4928_v10 = vld [vmem:[%s6154_s0 + $0x190] sm:$0xff]  ;;  %v4981_v11 = vld [vmem:[%s6153_s1 + $0x1e8] sm:$0xff] }
 0x134   :  { %v1627_v16 = vld [vmem:[#allocation2 + $0x8] sm:$0xff]  ;;  %4466 = vmatmul.msk.bf16.gmra.mxu3 %vm106_vm0, %v4926_v14 }
 0x135   :  { %1449 = vst.msk [vmem:[#allocation2 + $0x10] sm:$0xff] %vm180_vm1, %v1433_v13  ;;  %v1643_v17 = vadd.f32 %v1627_v16, %v1588_v46  ;;  %3271 = vmatpush.bf16.msrb.mxu3 %v4981_v11  ;;  %v1002_v16 = vld [vmem:[#allocation2 + $0x48] sm:$0xff] }
 0x136   :  { %v1385_v18 = vpop.f32.mrf.mxu2  ;;  %v965_v19 = vpop.f32.mrf.mxu0 }
 0x137   :  { %v1176_v21 = vpop.f32.mrf.mxu1  ;;  %1659 = vst.msk [vmem:[#allocation2 + $0x8] sm:$0xff] %vm180_vm1, %v1643_v17  ;;  %v1014_v22 = vadd.f32 %v998_v20, %v965_v19  ;;  %v1596_v26 = vpop.f32.mrf.mxu3 }
 0x138   :  { %v1208_v23 = vld [vmem:[#allocation2 + $0x20] sm:$0xff] }
 0x139   :  { %v1224_v24 = vadd.f32 %v1208_v23, %v1174_v6  ;;  %1030 = vst.msk [vmem:[#allocation2 + $0x28] sm:$0xff] %vm180_vm1, %v1014_v22 }
 0x13a   :  { %v1418_v25 = vld [vmem:[#allocation2 + $0x18] sm:$0xff] }
 0x13b   :  { %1240 = vst.msk [vmem:[#allocation2 + $0x20] sm:$0xff] %vm180_vm1, %v1224_v24  ;;  %v1434_v27 = vadd.f32 %v1418_v25, %v1382_v1  ;;  %v1001_v1 = vld [vmem:[#allocation2 + $0x40] sm:$0xff] }
 0x13c   :  { %v1628_v29 = vld [vmem:[#allocation2 + $0x10] sm:$0xff]  ;;  %v4944_v24 = vld [vmem:[%s6153_s1 + $0x180] sm:$0xff] }
 0x13d   :  { %1450 = vst.msk [vmem:[#allocation2 + $0x18] sm:$0xff] %vm180_vm1, %v1434_v27  ;;  %v1644_v30 = vadd.f32 %v1628_v29, %v1591_v61  ;;  %v4892_v61 = vld [vmem:[%s6154_s0 + $0x124] sm:$0xff]  ;;  %v4893_v27 = vld [vmem:[%s6154_s0 + $0x12c] sm:$0xff]  ;;  %v4905_v29 = vld [vmem:[%s6154_s0 + $0x174] sm:$0xff]  ;;  %2639 = vmatpush.bf16.msrb.mxu0 %v4944_v24 }
 0x13e   :  { %v1387_v32 = vpop.f32.mrf.mxu2  ;;  %v968_v34 = vpop.f32.mrf.mxu0  ;;  %v4907_v24 = vld [vmem:[%s6154_s0 + $0x184] sm:$0xff] }
 0x13f   :  { %v1179_v36 = vpop.f32.mrf.mxu1  ;;  %1660 = vst.msk [vmem:[#allocation2 + $0x10] sm:$0xff] %vm180_vm1, %v1644_v30  ;;  %v1015_v38 = vadd.f32 %v999_v35, %v968_v34  ;;  %v1598_v42 = vpop.f32.mrf.mxu3 }
 0x140   :  { %v1209_v39 = vld [vmem:[#allocation2 + $0x28] sm:$0xff] }
 0x141   :  { %v1225_v40 = vadd.f32 %v1209_v39, %v1176_v21  ;;  %1031 = vst.msk [vmem:[#allocation2 + $0x30] sm:$0xff] %vm180_vm1, %v1015_v38  ;;  %4227 = vmatmul.msk.bf16.gmra.mxu0 %vm106_vm0, %v4891_v31  ;;  %v1003_v31 = vld [vmem:[#allocation2 + $0x50] sm:$0xff] }
 0x142   :  { %4307 = vmatmul.msk.bf16.gmra.mxu1 %vm106_vm0, %v4903_v33  ;;  %v1419_v41 = vld [vmem:[#allocation2 + $0x20] sm:$0xff]  ;;  %v4917_v33 = vld [vmem:[%s6154_s0 + $0x150] sm:$0xff] }
 0x143   :  { %4387 = vmatmul.msk.bf16.gmra.mxu2 %vm106_vm0, %v4915_v37  ;;  %1241 = vst.msk [vmem:[#allocation2 + $0x28] sm:$0xff] %vm180_vm1, %v1225_v40  ;;  %v1435_v43 = vadd.f32 %v1419_v41, %v1385_v18  ;;  %v4929_v40 = vld [vmem:[%s6154_s0 + $0x198] sm:$0xff] }
 0x144   :  { %v1629_v45 = vld [vmem:[#allocation2 + $0x18] sm:$0xff]  ;;  %4467 = vmatmul.msk.bf16.gmra.mxu3 %vm106_vm0, %v4927_v44  ;;  %v4956_v44 = vld [vmem:[%s6153_s1 + $0x1a0] sm:$0xff] }
 0x145   :  { %1451 = vst.msk [vmem:[#allocation2 + $0x20] sm:$0xff] %vm180_vm1, %v1435_v43  ;;  %v1645_v46 = vadd.f32 %v1629_v45, %v1593_v12  ;;  %2850 = vmatpush.bf16.msrb.mxu1 %v4956_v44 }
 0x146   :  { %v1390_v47 = vpop.f32.mrf.mxu2  ;;  %v970_v49 = vpop.f32.mrf.mxu0 }
 0x147   :  { %v1181_v51 = vpop.f32.mrf.mxu1  ;;  %1661 = vst.msk [vmem:[#allocation2 + $0x18] sm:$0xff] %vm180_vm1, %v1645_v46  ;;  %v1016_v52 = vadd.f32 %v1000_v50, %v970_v49  ;;  %v1601_v57 = vpop.f32.mrf.mxu3  ;;  %v1004_v46 = vld [vmem:[#allocation2 + $0x58] sm:$0xff]  ;;  %v4968_v49 = vld [vmem:[%s6153_s1 + $0x1c0] sm:$0xff] }
 0x148   :  { %v1210_v54 = vld [vmem:[#allocation2 + $0x30] sm:$0xff]  ;;  %3061 = vmatpush.bf16.msrb.mxu2 %v4968_v49 }
 0x149   :  { %v1226_v55 = vadd.f32 %v1210_v54, %v1179_v36  ;;  %1032 = vst.msk [vmem:[#allocation2 + $0x38] sm:$0xff] %vm180_vm1, %v1016_v52 }
 0x14a   :  { %v1420_v56 = vld [vmem:[#allocation2 + $0x28] sm:$0xff] }
 0x14b   :  { %1242 = vst.msk [vmem:[#allocation2 + $0x30] sm:$0xff] %vm180_vm1, %v1226_v55  ;;  %v1436_v58 = vadd.f32 %v1420_v56, %v1387_v32 }
 0x14c   :  { %v1630_v59 = vld [vmem:[#allocation2 + $0x20] sm:$0xff] }
 0x14d   :  { %1452 = vst.msk [vmem:[#allocation2 + $0x28] sm:$0xff] %vm180_vm1, %v1436_v58  ;;  %v1646_v60 = vadd.f32 %v1630_v59, %v1596_v26  ;;  %v4906_v59 = vld [vmem:[%s6154_s0 + $0x17c] sm:$0xff] }
 0x14e   :  { %v1392_v62 = vpop.f32.mrf.mxu2  ;;  %v973_v0 = vpop.f32.mrf.mxu0 }
 0x14f   :  { %v1184_v2 = vpop.f32.mrf.mxu1  ;;  %1662 = vst.msk [vmem:[#allocation2 + $0x20] sm:$0xff] %vm180_vm1, %v1646_v60  ;;  %v1017_v4 = vadd.f32 %v1001_v1, %v973_v0  ;;  %v1603_v8 = vpop.f32.mrf.mxu3 }
 0x150   :  { %v1211_v5 = vld [vmem:[#allocation2 + $0x38] sm:$0xff] }
 0x151   :  { %v1227_v6 = vadd.f32 %v1211_v5, %v1181_v51  ;;  %1033 = vst.msk [vmem:[#allocation2 + $0x40] sm:$0xff] %vm180_vm1, %v1017_v4  ;;  %4228 = vmatmul.msk.bf16.gmra.mxu0 %vm106_vm0, %v4892_v61  ;;  %v1005_v61 = vld [vmem:[#allocation2 + $0x60] sm:$0xff] }
 0x152   :  { %4308 = vmatmul.msk.bf16.gmra.mxu1 %vm106_vm0, %v4904_v63  ;;  %v1421_v7 = vld [vmem:[#allocation2 + $0x30] sm:$0xff]  ;;  %v4918_v63 = vld [vmem:[%s6154_s0 + $0x158] sm:$0xff] }
 0x153   :  { %4388 = vmatmul.msk.bf16.gmra.mxu2 %vm106_vm0, %v4916_v3  ;;  %1243 = vst.msk [vmem:[#allocation2 + $0x38] sm:$0xff] %vm180_vm1, %v1227_v6  ;;  %v1437_v9 = vadd.f32 %v1421_v7, %v1390_v47  ;;  %v4930_v6 = vld [vmem:[%s6154_s0 + $0x1a0] sm:$0xff] }
 0x154   :  { %v1631_v12 = vld [vmem:[#allocation2 + $0x28] sm:$0xff]  ;;  %4468 = vmatmul.msk.bf16.gmra.mxu3 %vm106_vm0, %v4928_v10  ;;  %v4980_v7 = vld [vmem:[%s6153_s1 + $0x1e0] sm:$0xff] }
 0x155   :  { %1453 = vst.msk [vmem:[#allocation2 + $0x30] sm:$0xff] %vm180_vm1, %v1437_v9  ;;  %v1647_v13 = vadd.f32 %v1631_v12, %v1598_v42  ;;  %3272 = vmatpush.bf16.msrb.mxu3 %v4980_v7  ;;  %v1006_v12 = vld [vmem:[#allocation2 + $0x68] sm:$0xff] }
 0x156   :  { %v1395_v14 = vpop.f32.mrf.mxu2  ;;  %v975_v15 = vpop.f32.mrf.mxu0 }
 0x157   :  { %v1186_v17 = vpop.f32.mrf.mxu1  ;;  %1663 = vst.msk [vmem:[#allocation2 + $0x28] sm:$0xff] %vm180_vm1, %v1647_v13  ;;  %v1018_v18 = vadd.f32 %v1002_v16, %v975_v15  ;;  %v1606_v22 = vpop.f32.mrf.mxu3 }
 0x158   :  { %v1212_v19 = vld [vmem:[#allocation2 + $0x40] sm:$0xff] }
 0x159   :  { %v1228_v20 = vadd.f32 %v1212_v19, %v1184_v2  ;;  %1034 = vst.msk [vmem:[#allocation2 + $0x48] sm:$0xff] %vm180_vm1, %v1018_v18 }
 0x15a   :  { %v1422_v21 = vld [vmem:[#allocation2 + $0x38] sm:$0xff] }
 0x15b   :  { %1244 = vst.msk [vmem:[#allocation2 + $0x40] sm:$0xff] %vm180_vm1, %v1228_v20  ;;  %v1438_v23 = vadd.f32 %v1422_v21, %v1392_v62 }
 0x15c   :  { %v1632_v25 = vld [vmem:[#allocation2 + $0x30] sm:$0xff] }
 0x15d   :  { %1454 = vst.msk [vmem:[#allocation2 + $0x38] sm:$0xff] %vm180_vm1, %v1438_v23  ;;  %v1648_v26 = vadd.f32 %v1632_v25, %v1601_v57  ;;  %v4894_v57 = vld [vmem:[%s6154_s0 + $0x134] sm:$0xff] }
 0x15e   :  { %v1397_v28 = vpop.f32.mrf.mxu2  ;;  %v978_v30 = vpop.f32.mrf.mxu0 }
 0x15f   :  { %v1189_v32 = vpop.f32.mrf.mxu1  ;;  %1664 = vst.msk [vmem:[#allocation2 + $0x30] sm:$0xff] %vm180_vm1, %v1648_v26  ;;  %v1019_v34 = vadd.f32 %v1003_v31, %v978_v30  ;;  %v1608_v38 = vpop.f32.mrf.mxu3  ;;  %v1007_v26 = vld [vmem:[#allocation2 + $0x70] sm:$0xff] }
 0x160   :  { %v1213_v35 = vld [vmem:[#allocation2 + $0x48] sm:$0xff] }
 0x161   :  { %v1229_v36 = vadd.f32 %v1213_v35, %v1186_v17  ;;  %1035 = vst.msk [vmem:[#allocation2 + $0x50] sm:$0xff] %vm180_vm1, %v1019_v34  ;;  %4229 = vmatmul.msk.bf16.gmra.mxu0 %vm106_vm0, %v4893_v27  ;;  %v4931_v35 = vld [vmem:[%s6154_s0 + $0x1a8] sm:$0xff] }
 0x162   :  { %4309 = vmatmul.msk.bf16.gmra.mxu1 %vm106_vm0, %v4905_v29  ;;  %v1423_v37 = vld [vmem:[#allocation2 + $0x40] sm:$0xff] }
 0x163   :  { %4389 = vmatmul.msk.bf16.gmra.mxu2 %vm106_vm0, %v4917_v33  ;;  %1245 = vst.msk [vmem:[#allocation2 + $0x48] sm:$0xff] %vm180_vm1, %v1229_v36  ;;  %v1439_v39 = vadd.f32 %v1423_v37, %v1395_v14 }
 0x164   :  { %v1633_v41 = vld [vmem:[#allocation2 + $0x38] sm:$0xff]  ;;  %4469 = vmatmul.msk.bf16.gmra.mxu3 %vm106_vm0, %v4929_v40 }
 0x165   :  { %1455 = vst.msk [vmem:[#allocation2 + $0x40] sm:$0xff] %vm180_vm1, %v1439_v39  ;;  %v1649_v42 = vadd.f32 %v1633_v41, %v1603_v8  ;;  %v1008_v40 = vld [vmem:[#allocation2 + $0x78] sm:$0xff] }
 0x166   :  { %v1400_v43 = vpop.f32.mrf.mxu2  ;;  %v980_v45 = vpop.f32.mrf.mxu0 }
 0x167   :  { %v1191_v47 = vpop.f32.mrf.mxu1  ;;  %1665 = vst.msk [vmem:[#allocation2 + $0x38] sm:$0xff] %vm180_vm1, %v1649_v42  ;;  %v1020_v48 = vadd.f32 %v1004_v46, %v980_v45  ;;  %v1611_v53 = vpop.f32.mrf.mxu3 }
 0x168   :  { %v1214_v50 = vld [vmem:[#allocation2 + $0x50] sm:$0xff] }
 0x169   :  { %v1230_v51 = vadd.f32 %v1214_v50, %v1189_v32  ;;  %1036 = vst.msk [vmem:[#allocation2 + $0x58] sm:$0xff] %vm180_vm1, %v1020_v48  ;;  %v4936_v50 = vld [vmem:[%s6154_s0 + $0x94] sm:$0xff] }
 0x16a   :  { %v1424_v52 = vld [vmem:[#allocation2 + $0x48] sm:$0xff] }
 0x16b   :  { %1246 = vst.msk [vmem:[#allocation2 + $0x50] sm:$0xff] %vm180_vm1, %v1230_v51  ;;  %v1440_v54 = vadd.f32 %v1424_v52, %v1397_v28  ;;  %v4919_v28 = vld [vmem:[%s6154_s0 + $0x160] sm:$0xff] }
 0x16c   :  { %v1634_v55 = vld [vmem:[#allocation2 + $0x40] sm:$0xff] }
 0x16d   :  { %1456 = vst.msk [vmem:[#allocation2 + $0x48] sm:$0xff] %vm180_vm1, %v1440_v54  ;;  %v1650_v56 = vadd.f32 %v1634_v55, %v1606_v22  ;;  %v4895_v22 = vld [vmem:[%s6154_s0 + $0x13c] sm:$0xff] }
 0x16e   :  { %v1402_v58 = vpop.f32.mrf.mxu2  ;;  %v983_v60 = vpop.f32.mrf.mxu0  ;;  %v4948_v52 = vld [vmem:[%s6154_s0 + $0xdc] sm:$0xff] }
 0x16f   :  { %v1194_v62 = vpop.f32.mrf.mxu1  ;;  %1666 = vst.msk [vmem:[#allocation2 + $0x40] sm:$0xff] %vm180_vm1, %v1650_v56  ;;  %v1021_v0 = vadd.f32 %v1005_v61, %v983_v60  ;;  %v1613_v4 = vpop.f32.mrf.mxu3  ;;  %v1837_v54 = vld [vmem:[#allocation2] sm:$0xff]  ;;  %v4960_v56 = vld [vmem:[%s6154_s0 + $0xb8] sm:$0xff] }
 0x170   :  { %v1215_v1 = vld [vmem:[#allocation2 + $0x58] sm:$0xff] }
 0x171   :  { %v1231_v2 = vadd.f32 %v1215_v1, %v1191_v47  ;;  %1037 = vst.msk [vmem:[#allocation2 + $0x60] sm:$0xff] %vm180_vm1, %v1021_v0  ;;  %4230 = vmatmul.msk.bf16.gmra.mxu0 %vm106_vm0, %v4894_v57 }
 0x172   :  { %4310 = vmatmul.msk.bf16.gmra.mxu1 %vm106_vm0, %v4906_v59  ;;  %v1425_v3 = vld [vmem:[#allocation2 + $0x50] sm:$0xff] }
 0x173   :  { %4390 = vmatmul.msk.bf16.gmra.mxu2 %vm106_vm0, %v4918_v63  ;;  %1247 = vst.msk [vmem:[#allocation2 + $0x58] sm:$0xff] %vm180_vm1, %v1231_v2  ;;  %v1441_v5 = vadd.f32 %v1425_v3, %v1400_v43  ;;  %v4972_v63 = vld [vmem:[%s6154_s0 + $0x100] sm:$0xff] }
 0x174   :  { %v1635_v8 = vld [vmem:[#allocation2 + $0x48] sm:$0xff]  ;;  %4470 = vmatmul.msk.bf16.gmra.mxu3 %vm106_vm0, %v4930_v6 }
 0x175   :  { %1457 = vst.msk [vmem:[#allocation2 + $0x50] sm:$0xff] %vm180_vm1, %v1441_v5  ;;  %v1651_v9 = vadd.f32 %v1635_v8, %v1608_v38 }
 0x176   :  { %v1405_v10 = vpop.f32.mrf.mxu2  ;;  %v985_v11 = vpop.f32.mrf.mxu0 }
 0x177   :  { %v1196_v13 = vpop.f32.mrf.mxu1  ;;  %1667 = vst.msk [vmem:[#allocation2 + $0x48] sm:$0xff] %vm180_vm1, %v1651_v9  ;;  %v1022_v14 = vadd.f32 %v1006_v12, %v985_v11  ;;  %v1616_v18 = vpop.f32.mrf.mxu3 }
 0x178   :  { %v1216_v15 = vld [vmem:[#allocation2 + $0x60] sm:$0xff] }
 0x179   :  { %v1232_v16 = vadd.f32 %v1216_v15, %v1194_v62  ;;  %1038 = vst.msk [vmem:[#allocation2 + $0x68] sm:$0xff] %vm180_vm1, %v1022_v14  ;;  %v4937_v14 = vld [vmem:[%s6154_s0 + $0x9c] sm:$0xff] }
 0x17a   :  { %v1426_v17 = vld [vmem:[#allocation2 + $0x58] sm:$0xff] }
 0x17b   :  { %1248 = vst.msk [vmem:[#allocation2 + $0x60] sm:$0xff] %vm180_vm1, %v1232_v16  ;;  %v1442_v19 = vadd.f32 %v1426_v17, %v1402_v58  ;;  %v4949_v16 = vld [vmem:[%s6154_s0 + $0xe4] sm:$0xff] }
 0x17c   :  { %v1636_v20 = vld [vmem:[#allocation2 + $0x50] sm:$0xff] }
 0x17d   :  { %1458 = vst.msk [vmem:[#allocation2 + $0x58] sm:$0xff] %vm180_vm1, %v1442_v19  ;;  %v1652_v21 = vadd.f32 %v1636_v20, %v1611_v53  ;;  %v4961_v20 = vld [vmem:[%s6154_s0 + $0xc0] sm:$0xff] }
 0x17e   :  { %v1407_v23 = vpop.f32.mrf.mxu2  ;;  %v988_v25 = vpop.f32.mrf.mxu0 }
 0x17f   :  { %v1199_v27 = vpop.f32.mrf.mxu1  ;;  %1668 = vst.msk [vmem:[#allocation2 + $0x50] sm:$0xff] %vm180_vm1, %v1652_v21  ;;  %v1023_v29 = vadd.f32 %v1007_v26, %v988_v25  ;;  %v1618_v33 = vpop.f32.mrf.mxu3 }
 0x180   :  { %v1217_v30 = vld [vmem:[#allocation2 + $0x68] sm:$0xff] }
 0x181   :  { %v1233_v31 = vadd.f32 %v1217_v30, %v1196_v13  ;;  %1039 = vst.msk [vmem:[#allocation2 + $0x70] sm:$0xff] %vm180_vm1, %v1023_v29  ;;  %4231 = vmatmul.msk.bf16.gmra.mxu0 %vm106_vm0, %v4895_v22 }
 0x182   :  { %4311 = vmatmul.msk.bf16.gmra.mxu1 %vm106_vm0, %v4907_v24  ;;  %v1427_v32 = vld [vmem:[#allocation2 + $0x60] sm:$0xff] }
 0x183   :  { %4391 = vmatmul.msk.bf16.gmra.mxu2 %vm106_vm0, %v4919_v28  ;;  %1249 = vst.msk [vmem:[#allocation2 + $0x68] sm:$0xff] %vm180_vm1, %v1233_v31  ;;  %v1443_v34 = vadd.f32 %v1427_v32, %v1405_v10  ;;  %v1840_v32 = vld [vmem:[#allocation2 + $0x18] sm:$0xff] }
 0x184   :  { %v1637_v36 = vld [vmem:[#allocation2 + $0x58] sm:$0xff]  ;;  %4471 = vmatmul.msk.bf16.gmra.mxu3 %vm106_vm0, %v4931_v35 }
 0x185   :  { %1459 = vst.msk [vmem:[#allocation2 + $0x60] sm:$0xff] %vm180_vm1, %v1443_v34  ;;  %v1653_v37 = vadd.f32 %v1637_v36, %v1613_v4  ;;  %v1838_v4 = vld [vmem:[#allocation2 + $0x8] sm:$0xff] }
 0x186   :  { %v1410_v38 = vpop.f32.mrf.mxu2  ;;  %v990_v39 = vpop.f32.mrf.mxu0 }
 0x187   :  { %v1201_v41 = vpop.f32.mrf.mxu1  ;;  %1669 = vst.msk [vmem:[#allocation2 + $0x58] sm:$0xff] %vm180_vm1, %v1653_v37  ;;  %v1024_v42 = vadd.f32 %v1008_v40, %v990_v39  ;;  %v1621_v46 = vpop.f32.mrf.mxu3 }
 0x188   :  { %v1218_v43 = vld [vmem:[#allocation2 + $0x70] sm:$0xff] }
 0x189   :  { %v1234_v44 = vadd.f32 %v1218_v43, %v1199_v27  ;;  %1040 = vst.msk [vmem:[#allocation2 + $0x78] sm:$0xff] %vm180_vm1, %v1024_v42  ;;  %v4973_v27 = vld [vmem:[%s6154_s0 + $0x108] sm:$0xff] }
 0x18a   :  { %v1428_v45 = vld [vmem:[#allocation2 + $0x68] sm:$0xff] }
 0x18b   :  { %1250 = vst.msk [vmem:[#allocation2 + $0x70] sm:$0xff] %vm180_vm1, %v1234_v44  ;;  %v1444_v47 = vadd.f32 %v1428_v45, %v1407_v23  ;;  %v4938_v42 = vld [vmem:[%s6154_s0 + $0xa4] sm:$0xff]  ;;  %v4950_v44 = vld [vmem:[%s6154_s0 + $0xec] sm:$0xff] }
 0x18c   :  { %v1638_v48 = vld [vmem:[#allocation2 + $0x60] sm:$0xff] }
 0x18d   :  { %1460 = vst.msk [vmem:[#allocation2 + $0x68] sm:$0xff] %vm180_vm1, %v1444_v47  ;;  %v1654_v49 = vadd.f32 %v1638_v48, %v1616_v18  ;;  %v1839_v18 = vld [vmem:[#allocation2 + $0x10] sm:$0xff]  ;;  %v4962_v48 = vld [vmem:[%s6154_s0 + $0xc8] sm:$0xff] }
 0x18e   :  { %v1412_v51 = vpop.f32.mrf.mxu2  ;;  %v1797_v53 = vpop.f32.mrf.mxu0 }
 0x18f   :  { %v2008_v55 = vpop.f32.mrf.mxu1  ;;  %1670 = vst.msk [vmem:[#allocation2 + $0x60] sm:$0xff] %vm180_vm1, %v1654_v49  ;;  %v1853_v57 = vadd.f32 %v1837_v54, %v1797_v53  ;;  %v1623_v61 = vpop.f32.mrf.mxu3 }
 0x190   :  { %v1219_v58 = vld [vmem:[#allocation2 + $0x78] sm:$0xff] }
 0x191   :  { %v1235_v59 = vadd.f32 %v1219_v58, %v1201_v41  ;;  %1869 = vst.msk [vmem:[#allocation2] sm:$0xff] %vm180_vm1, %v1853_v57  ;;  %4544 = vmatmul.msk.bf16.vlgmr.msrb.gmra.mxu0 %vm106_vm0, %v4936_v50 }
 0x192   :  { %4624 = vmatmul.msk.bf16.vlgmr.msrb.gmra.mxu1 %vm106_vm0, %v4948_v52  ;;  %v1429_v60 = vld [vmem:[#allocation2 + $0x70] sm:$0xff] }
 0x193   :  { %4704 = vmatmul.msk.bf16.vlgmr.msrb.gmra.mxu2 %vm106_vm0, %v4960_v56  ;;  %1251 = vst.msk [vmem:[#allocation2 + $0x78] sm:$0xff] %vm180_vm1, %v1235_v59  ;;  %v1445_v62 = vadd.f32 %v1429_v60, %v1410_v38  ;;  %v1842_v60 = vld [vmem:[#allocation2 + $0x28] sm:$0xff] }
 0x194   :  { %v1639_v0 = vld [vmem:[#allocation2 + $0x68] sm:$0xff]  ;;  %4784 = vmatmul.msk.bf16.vlgmr.msrb.gmra.mxu3 %vm106_vm0, %v4972_v63 }
 0x195   :  { %1461 = vst.msk [vmem:[#allocation2 + $0x70] sm:$0xff] %vm180_vm1, %v1445_v62  ;;  %v1655_v1 = vadd.f32 %v1639_v0, %v1618_v33 }
 0x196   :  { %v2219_v2 = vpop.f32.mrf.mxu2  ;;  %v1799_v3 = vpop.f32.mrf.mxu0 }
 0x197   :  { %v2010_v5 = vpop.f32.mrf.mxu1  ;;  %1671 = vst.msk [vmem:[#allocation2 + $0x68] sm:$0xff] %vm180_vm1, %v1655_v1  ;;  %v1854_v6 = vadd.f32 %v1838_v4, %v1799_v3  ;;  %v2430_v10 = vpop.f32.mrf.mxu3 }
 0x198   :  { %v2048_v7 = vld [vmem:[#allocation2] sm:$0xff] }
 0x199   :  { %v2064_v8 = vadd.f32 %v2048_v7, %v2008_v55  ;;  %1870 = vst.msk [vmem:[#allocation2 + $0x8] sm:$0xff] %vm180_vm1, %v1854_v6  ;;  %v4974_v55 = vld [vmem:[%s6154_s0 + $0x110] sm:$0xff] }
 0x19a   :  { %v1430_v9 = vld [vmem:[#allocation2 + $0x78] sm:$0xff]  ;;  %v4939_v6 = vld [vmem:[%s6154_s0 + $0xac] sm:$0xff] }
 0x19b   :  { %2080 = vst.msk [vmem:[#allocation2] sm:$0xff] %vm180_vm1, %v2064_v8  ;;  %v1446_v11 = vadd.f32 %v1430_v9, %v1412_v51  ;;  %v4951_v8 = vld [vmem:[%s6154_s0 + $0xf4] sm:$0xff] }
 0x19c   :  { %v1640_v12 = vld [vmem:[#allocation2 + $0x70] sm:$0xff] }
 0x19d   :  { %1462 = vst.msk [vmem:[#allocation2 + $0x78] sm:$0xff] %vm180_vm1, %v1446_v11  ;;  %v1656_v13 = vadd.f32 %v1640_v12, %v1621_v46  ;;  %v1841_v46 = vld [vmem:[#allocation2 + $0x20] sm:$0xff]  ;;  %v4963_v12 = vld [vmem:[%s6154_s0 + $0xd0] sm:$0xff] }
 0x19e   :  { %v2221_v15 = vpop.f32.mrf.mxu2  ;;  %v1802_v17 = vpop.f32.mrf.mxu0 }
 0x19f   :  { %v2013_v19 = vpop.f32.mrf.mxu1  ;;  %1672 = vst.msk [vmem:[#allocation2 + $0x70] sm:$0xff] %vm180_vm1, %v1656_v13  ;;  %v1855_v21 = vadd.f32 %v1839_v18, %v1802_v17  ;;  %v2432_v25 = vpop.f32.mrf.mxu3 }
 0x1a0   :  { %v2049_v22 = vld [vmem:[#allocation2 + $0x8] sm:$0xff] }
 0x1a1   :  { %v2065_v23 = vadd.f32 %v2049_v22, %v2010_v5  ;;  %1871 = vst.msk [vmem:[#allocation2 + $0x10] sm:$0xff] %vm180_vm1, %v1855_v21  ;;  %4545 = vmatmul.msk.bf16.gmra.mxu0 %vm106_vm0, %v4937_v14 }
 0x1a2   :  { %4625 = vmatmul.msk.bf16.gmra.mxu1 %vm106_vm0, %v4949_v16  ;;  %v2259_v24 = vld [vmem:[#allocation2] sm:$0xff] }
 0x1a3   :  { %4705 = vmatmul.msk.bf16.gmra.mxu2 %vm106_vm0, %v4961_v20  ;;  %2081 = vst.msk [vmem:[#allocation2 + $0x8] sm:$0xff] %vm180_vm1, %v2065_v23  ;;  %v2275_v26 = vadd.f32 %v2259_v24, %v2219_v2  ;;  %v1844_v24 = vld [vmem:[#allocation2 + $0x38] sm:$0xff] }
 0x1a4   :  { %v1641_v28 = vld [vmem:[#allocation2 + $0x78] sm:$0xff]  ;;  %4785 = vmatmul.msk.bf16.gmra.mxu3 %vm106_vm0, %v4973_v27 }
 0x1a5   :  { %2291 = vst.msk [vmem:[#allocation2] sm:$0xff] %vm180_vm1, %v2275_v26  ;;  %v1657_v29 = vadd.f32 %v1641_v28, %v1623_v61 }
 0x1a6   :  { %v2224_v30 = vpop.f32.mrf.mxu2  ;;  %v1804_v31 = vpop.f32.mrf.mxu0 }
 0x1a7   :  { %v2015_v33 = vpop.f32.mrf.mxu1  ;;  %1673 = vst.msk [vmem:[#allocation2 + $0x78] sm:$0xff] %vm180_vm1, %v1657_v29  ;;  %v1856_v34 = vadd.f32 %v1840_v32, %v1804_v31  ;;  %v2435_v38 = vpop.f32.mrf.mxu3 }
 0x1a8   :  { %v2050_v35 = vld [vmem:[#allocation2 + $0x10] sm:$0xff] }
 0x1a9   :  { %v2066_v36 = vadd.f32 %v2050_v35, %v2013_v19  ;;  %1872 = vst.msk [vmem:[#allocation2 + $0x18] sm:$0xff] %vm180_vm1, %v1856_v34  ;;  %v4975_v19 = vld [vmem:[%s6154_s0 + $0x118] sm:$0xff] }
 0x1aa   :  { %v2260_v37 = vld [vmem:[#allocation2 + $0x8] sm:$0xff]  ;;  %v4940_v34 = vld [vmem:[%s6154_s0 + $0x1b4] sm:$0xff] }
 0x1ab   :  { %2082 = vst.msk [vmem:[#allocation2 + $0x10] sm:$0xff] %vm180_vm1, %v2066_v36  ;;  %v2276_v39 = vadd.f32 %v2260_v37, %v2221_v15  ;;  %v4952_v36 = vld [vmem:[%s6154_s0 + $0x1fc] sm:$0xff] }
 0x1ac   :  { %v2470_v40 = vld [vmem:[#allocation2] sm:$0xff] }
 0x1ad   :  { %2292 = vst.msk [vmem:[#allocation2 + $0x8] sm:$0xff] %vm180_vm1, %v2276_v39  ;;  %v2486_v41 = vadd.f32 %v2470_v40, %v2430_v10  ;;  %v1843_v10 = vld [vmem:[#allocation2 + $0x30] sm:$0xff]  ;;  %v4964_v40 = vld [vmem:[%s6154_s0 + $0x1d8] sm:$0xff] }
 0x1ae   :  { %v2226_v43 = vpop.f32.mrf.mxu2  ;;  %v1807_v45 = vpop.f32.mrf.mxu0 }
 0x1af   :  { %v2018_v47 = vpop.f32.mrf.mxu1  ;;  %2502 = vst.msk [vmem:[#allocation2] sm:$0xff] %vm180_vm1, %v2486_v41  ;;  %v1857_v49 = vadd.f32 %v1841_v46, %v1807_v45  ;;  %v2437_v53 = vpop.f32.mrf.mxu3 }
 0x1b0   :  { %v2051_v50 = vld [vmem:[#allocation2 + $0x18] sm:$0xff] }
 0x1b1   :  { %v2067_v51 = vadd.f32 %v2051_v50, %v2015_v33  ;;  %1873 = vst.msk [vmem:[#allocation2 + $0x20] sm:$0xff] %vm180_vm1, %v1857_v49  ;;  %4546 = vmatmul.msk.bf16.gmra.mxu0 %vm106_vm0, %v4938_v42 }
 0x1b2   :  { %4626 = vmatmul.msk.bf16.gmra.mxu1 %vm106_vm0, %v4950_v44  ;;  %v2261_v52 = vld [vmem:[#allocation2 + $0x10] sm:$0xff] }
 0x1b3   :  { %4706 = vmatmul.msk.bf16.gmra.mxu2 %vm106_vm0, %v4962_v48  ;;  %2083 = vst.msk [vmem:[#allocation2 + $0x18] sm:$0xff] %vm180_vm1, %v2067_v51  ;;  %v2277_v54 = vadd.f32 %v2261_v52, %v2224_v30  ;;  %v1846_v52 = vld [vmem:[#allocation2 + $0x48] sm:$0xff] }
 0x1b4   :  { %v2471_v56 = vld [vmem:[#allocation2 + $0x8] sm:$0xff]  ;;  %4786 = vmatmul.msk.bf16.gmra.mxu3 %vm106_vm0, %v4974_v55 }
 0x1b5   :  { %2293 = vst.msk [vmem:[#allocation2 + $0x10] sm:$0xff] %vm180_vm1, %v2277_v54  ;;  %v2487_v57 = vadd.f32 %v2471_v56, %v2432_v25 }
 0x1b6   :  { %v2229_v58 = vpop.f32.mrf.mxu2  ;;  %v1809_v59 = vpop.f32.mrf.mxu0 }
 0x1b7   :  { %v2020_v61 = vpop.f32.mrf.mxu1  ;;  %2503 = vst.msk [vmem:[#allocation2 + $0x8] sm:$0xff] %vm180_vm1, %v2487_v57  ;;  %v1858_v62 = vadd.f32 %v1842_v60, %v1809_v59  ;;  %v2440_v2 = vpop.f32.mrf.mxu3 }
 0x1b8   :  { %v2052_v63 = vld [vmem:[#allocation2 + $0x20] sm:$0xff] }
 0x1b9   :  { %v2068_v0 = vadd.f32 %v2052_v63, %v2018_v47  ;;  %1874 = vst.msk [vmem:[#allocation2 + $0x28] sm:$0xff] %vm180_vm1, %v1858_v62  ;;  %v4976_v47 = vld [vmem:[%s6154_s0 + $0x220] sm:$0xff] }
 0x1ba   :  { %v2262_v1 = vld [vmem:[#allocation2 + $0x18] sm:$0xff] }
 0x1bb   :  { %2084 = vst.msk [vmem:[#allocation2 + $0x20] sm:$0xff] %vm180_vm1, %v2068_v0  ;;  %v2278_v3 = vadd.f32 %v2262_v1, %v2226_v43  ;;  %v4941_v62 = vld [vmem:[%s6154_s0 + $0x1bc] sm:$0xff]  ;;  %v4953_v0 = vld [vmem:[%s6154_s0 + $0x204] sm:$0xff] }
 0x1bc   :  { %v2472_v4 = vld [vmem:[#allocation2 + $0x10] sm:$0xff] }
 0x1bd   :  { %2294 = vst.msk [vmem:[#allocation2 + $0x18] sm:$0xff] %vm180_vm1, %v2278_v3  ;;  %v2488_v5 = vadd.f32 %v2472_v4, %v2435_v38  ;;  %v1845_v38 = vld [vmem:[#allocation2 + $0x40] sm:$0xff] }
 0x1be   :  { %v2231_v7 = vpop.f32.mrf.mxu2  ;;  %v1812_v9 = vpop.f32.mrf.mxu0  ;;  %v4965_v4 = vld [vmem:[%s6154_s0 + $0x1e0] sm:$0xff] }
 0x1bf   :  { %v2023_v11 = vpop.f32.mrf.mxu1  ;;  %2504 = vst.msk [vmem:[#allocation2 + $0x10] sm:$0xff] %vm180_vm1, %v2488_v5  ;;  %v1859_v13 = vadd.f32 %v1843_v10, %v1812_v9  ;;  %v2442_v17 = vpop.f32.mrf.mxu3 }
 0x1c0   :  { %v2053_v14 = vld [vmem:[#allocation2 + $0x28] sm:$0xff] }
 0x1c1   :  { %v2069_v15 = vadd.f32 %v2053_v14, %v2020_v61  ;;  %1875 = vst.msk [vmem:[#allocation2 + $0x30] sm:$0xff] %vm180_vm1, %v1859_v13  ;;  %4547 = vmatmul.msk.bf16.gmra.mxu0 %vm106_vm0, %v4939_v6 }
 0x1c2   :  { %4627 = vmatmul.msk.bf16.gmra.mxu1 %vm106_vm0, %v4951_v8  ;;  %v2263_v16 = vld [vmem:[#allocation2 + $0x20] sm:$0xff] }
 0x1c3   :  { %4707 = vmatmul.msk.bf16.gmra.mxu2 %vm106_vm0, %v4963_v12  ;;  %2085 = vst.msk [vmem:[#allocation2 + $0x28] sm:$0xff] %vm180_vm1, %v2069_v15  ;;  %v2279_v18 = vadd.f32 %v2263_v16, %v2229_v58  ;;  %v1848_v16 = vld [vmem:[#allocation2 + $0x58] sm:$0xff] }
 0x1c4   :  { %v2473_v20 = vld [vmem:[#allocation2 + $0x18] sm:$0xff]  ;;  %4787 = vmatmul.msk.bf16.gmra.mxu3 %vm106_vm0, %v4975_v19 }
 0x1c5   :  { %2295 = vst.msk [vmem:[#allocation2 + $0x20] sm:$0xff] %vm180_vm1, %v2279_v18  ;;  %v2489_v21 = vadd.f32 %v2473_v20, %v2437_v53 }
 0x1c6   :  { %v2234_v22 = vpop.f32.mrf.mxu2  ;;  %v1814_v23 = vpop.f32.mrf.mxu0 }
 0x1c7   :  { %v2025_v25 = vpop.f32.mrf.mxu1  ;;  %2505 = vst.msk [vmem:[#allocation2 + $0x18] sm:$0xff] %vm180_vm1, %v2489_v21  ;;  %v1860_v26 = vadd.f32 %v1844_v24, %v1814_v23  ;;  %v2445_v30 = vpop.f32.mrf.mxu3 }
 0x1c8   :  { %v2054_v27 = vld [vmem:[#allocation2 + $0x30] sm:$0xff] }
 0x1c9   :  { %v2070_v28 = vadd.f32 %v2054_v27, %v2023_v11  ;;  %1876 = vst.msk [vmem:[#allocation2 + $0x38] sm:$0xff] %vm180_vm1, %v1860_v26  ;;  %v4977_v11 = vld [vmem:[%s6154_s0 + $0x228] sm:$0xff] }
 0x1ca   :  { %v2264_v29 = vld [vmem:[#allocation2 + $0x28] sm:$0xff] }
 0x1cb   :  { %2086 = vst.msk [vmem:[#allocation2 + $0x30] sm:$0xff] %vm180_vm1, %v2070_v28  ;;  %v2280_v31 = vadd.f32 %v2264_v29, %v2231_v7  ;;  %v4942_v26 = vld [vmem:[%s6154_s0 + $0x1c4] sm:$0xff]  ;;  %v4954_v28 = vld [vmem:[%s6154_s0 + $0x20c] sm:$0xff] }
 0x1cc   :  { %v2474_v32 = vld [vmem:[#allocation2 + $0x20] sm:$0xff] }
 0x1cd   :  { %2296 = vst.msk [vmem:[#allocation2 + $0x28] sm:$0xff] %vm180_vm1, %v2280_v31  ;;  %v2490_v33 = vadd.f32 %v2474_v32, %v2440_v2  ;;  %v1847_v2 = vld [vmem:[#allocation2 + $0x50] sm:$0xff]  ;;  %v4966_v32 = vld [vmem:[%s6154_s0 + $0x1e8] sm:$0xff] }
 0x1ce   :  { %v2236_v35 = vpop.f32.mrf.mxu2  ;;  %v1817_v37 = vpop.f32.mrf.mxu0 }
 0x1cf   :  { %v2028_v39 = vpop.f32.mrf.mxu1  ;;  %2506 = vst.msk [vmem:[#allocation2 + $0x20] sm:$0xff] %vm180_vm1, %v2490_v33  ;;  %v1861_v41 = vadd.f32 %v1845_v38, %v1817_v37  ;;  %v2447_v45 = vpop.f32.mrf.mxu3 }
 0x1d0   :  { %v2055_v42 = vld [vmem:[#allocation2 + $0x38] sm:$0xff] }
 0x1d1   :  { %v2071_v43 = vadd.f32 %v2055_v42, %v2025_v25  ;;  %1877 = vst.msk [vmem:[#allocation2 + $0x40] sm:$0xff] %vm180_vm1, %v1861_v41  ;;  %4548 = vmatmul.msk.bf16.gmra.mxu0 %vm106_vm0, %v4940_v34 }
 0x1d2   :  { %4628 = vmatmul.msk.bf16.gmra.mxu1 %vm106_vm0, %v4952_v36  ;;  %v2265_v44 = vld [vmem:[#allocation2 + $0x30] sm:$0xff] }
 0x1d3   :  { %4708 = vmatmul.msk.bf16.gmra.mxu2 %vm106_vm0, %v4964_v40  ;;  %2087 = vst.msk [vmem:[#allocation2 + $0x38] sm:$0xff] %vm180_vm1, %v2071_v43  ;;  %v2281_v46 = vadd.f32 %v2265_v44, %v2234_v22  ;;  %v1850_v44 = vld [vmem:[#allocation2 + $0x68] sm:$0xff] }
 0x1d4   :  { %v2475_v48 = vld [vmem:[#allocation2 + $0x28] sm:$0xff]  ;;  %4788 = vmatmul.msk.bf16.gmra.mxu3 %vm106_vm0, %v4976_v47 }
 0x1d5   :  { %2297 = vst.msk [vmem:[#allocation2 + $0x30] sm:$0xff] %vm180_vm1, %v2281_v46  ;;  %v2491_v49 = vadd.f32 %v2475_v48, %v2442_v17 }
 0x1d6   :  { %v2239_v50 = vpop.f32.mrf.mxu2  ;;  %v1819_v51 = vpop.f32.mrf.mxu0 }
 0x1d7   :  { %v2030_v53 = vpop.f32.mrf.mxu1  ;;  %2507 = vst.msk [vmem:[#allocation2 + $0x28] sm:$0xff] %vm180_vm1, %v2491_v49  ;;  %v1862_v54 = vadd.f32 %v1846_v52, %v1819_v51  ;;  %v2450_v58 = vpop.f32.mrf.mxu3 }
 0x1d8   :  { %v2056_v55 = vld [vmem:[#allocation2 + $0x40] sm:$0xff] }
 0x1d9   :  { %v2072_v56 = vadd.f32 %v2056_v55, %v2028_v39  ;;  %1878 = vst.msk [vmem:[#allocation2 + $0x48] sm:$0xff] %vm180_vm1, %v1862_v54  ;;  %v4978_v39 = vld [vmem:[%s6154_s0 + $0x230] sm:$0xff] }
 0x1da   :  { %v2266_v57 = vld [vmem:[#allocation2 + $0x38] sm:$0xff]  ;;  %v4943_v54 = vld [vmem:[%s6154_s0 + $0x1cc] sm:$0xff] }
 0x1db   :  { %2088 = vst.msk [vmem:[#allocation2 + $0x40] sm:$0xff] %vm180_vm1, %v2072_v56  ;;  %v2282_v59 = vadd.f32 %v2266_v57, %v2236_v35  ;;  %v4955_v56 = vld [vmem:[%s6154_s0 + $0x214] sm:$0xff] }
 0x1dc   :  { %v2476_v60 = vld [vmem:[#allocation2 + $0x30] sm:$0xff] }
 0x1dd   :  { %2298 = vst.msk [vmem:[#allocation2 + $0x38] sm:$0xff] %vm180_vm1, %v2282_v59  ;;  %v2492_v61 = vadd.f32 %v2476_v60, %v2445_v30  ;;  %v1849_v30 = vld [vmem:[#allocation2 + $0x60] sm:$0xff]  ;;  %v4967_v60 = vld [vmem:[%s6154_s0 + $0x1f0] sm:$0xff] }
 0x1de   :  { %v2241_v63 = vpop.f32.mrf.mxu2  ;;  %v1822_v1 = vpop.f32.mrf.mxu0 }
 0x1df   :  { %v2033_v3 = vpop.f32.mrf.mxu1  ;;  %2508 = vst.msk [vmem:[#allocation2 + $0x30] sm:$0xff] %vm180_vm1, %v2492_v61  ;;  %v1863_v5 = vadd.f32 %v1847_v2, %v1822_v1  ;;  %v2452_v9 = vpop.f32.mrf.mxu3 }
 0x1e0   :  { %v2057_v6 = vld [vmem:[#allocation2 + $0x48] sm:$0xff] }
 0x1e1   :  { %v2073_v7 = vadd.f32 %v2057_v6, %v2030_v53  ;;  %1879 = vst.msk [vmem:[#allocation2 + $0x50] sm:$0xff] %vm180_vm1, %v1863_v5  ;;  %4549 = vmatmul.msk.bf16.gmra.mxu0 %vm106_vm0, %v4941_v62 }
 0x1e2   :  { %4629 = vmatmul.msk.bf16.gmra.mxu1 %vm106_vm0, %v4953_v0  ;;  %v2267_v8 = vld [vmem:[#allocation2 + $0x40] sm:$0xff] }
 0x1e3   :  { %4709 = vmatmul.msk.bf16.gmra.mxu2 %vm106_vm0, %v4965_v4  ;;  %2089 = vst.msk [vmem:[#allocation2 + $0x48] sm:$0xff] %vm180_vm1, %v2073_v7  ;;  %v2283_v10 = vadd.f32 %v2267_v8, %v2239_v50  ;;  %v1852_v8 = vld [vmem:[#allocation2 + $0x78] sm:$0xff] }
 0x1e4   :  { %v2477_v12 = vld [vmem:[#allocation2 + $0x38] sm:$0xff]  ;;  %4789 = vmatmul.msk.bf16.gmra.mxu3 %vm106_vm0, %v4977_v11 }
 0x1e5   :  { %2299 = vst.msk [vmem:[#allocation2 + $0x40] sm:$0xff] %vm180_vm1, %v2283_v10  ;;  %v2493_v13 = vadd.f32 %v2477_v12, %v2447_v45 }
 0x1e6   :  { %v2244_v14 = vpop.f32.mrf.mxu2  ;;  %v1824_v15 = vpop.f32.mrf.mxu0 }
 0x1e7   :  { %v2035_v17 = vpop.f32.mrf.mxu1  ;;  %2509 = vst.msk [vmem:[#allocation2 + $0x38] sm:$0xff] %vm180_vm1, %v2493_v13  ;;  %v1864_v18 = vadd.f32 %v1848_v16, %v1824_v15  ;;  %v2455_v22 = vpop.f32.mrf.mxu3 }
 0x1e8   :  { %v2058_v19 = vld [vmem:[#allocation2 + $0x50] sm:$0xff] }
 0x1e9   :  { %v2074_v20 = vadd.f32 %v2058_v19, %v2033_v3  ;;  %1880 = vst.msk [vmem:[#allocation2 + $0x58] sm:$0xff] %vm180_vm1, %v1864_v18  ;;  %v4979_v3 = vld [vmem:[%s6154_s0 + $0x238] sm:$0xff] }
 0x1ea   :  { %v2268_v21 = vld [vmem:[#allocation2 + $0x48] sm:$0xff] }
 0x1eb   :  { %2090 = vst.msk [vmem:[#allocation2 + $0x50] sm:$0xff] %vm180_vm1, %v2074_v20  ;;  %v2284_v23 = vadd.f32 %v2268_v21, %v2241_v63  ;;  %v2681_v20 = vld [vmem:[#allocation2] sm:$0xff] }
 0x1ec   :  { %v2478_v24 = vld [vmem:[#allocation2 + $0x40] sm:$0xff] }
 0x1ed   :  { %2300 = vst.msk [vmem:[#allocation2 + $0x48] sm:$0xff] %vm180_vm1, %v2284_v23  ;;  %v2494_v25 = vadd.f32 %v2478_v24, %v2450_v58  ;;  %v1851_v58 = vld [vmem:[#allocation2 + $0x70] sm:$0xff] }
 0x1ee   :  { %v2246_v27 = vpop.f32.mrf.mxu2  ;;  %v1827_v29 = vpop.f32.mrf.mxu0 }
 0x1ef   :  { %v2038_v31 = vpop.f32.mrf.mxu1  ;;  %2510 = vst.msk [vmem:[#allocation2 + $0x40] sm:$0xff] %vm180_vm1, %v2494_v25  ;;  %v1865_v33 = vadd.f32 %v1849_v30, %v1827_v29  ;;  %v2457_v37 = vpop.f32.mrf.mxu3 }
 0x1f0   :  { %v2059_v34 = vld [vmem:[#allocation2 + $0x58] sm:$0xff] }
 0x1f1   :  { %v2075_v35 = vadd.f32 %v2059_v34, %v2035_v17  ;;  %1881 = vst.msk [vmem:[#allocation2 + $0x60] sm:$0xff] %vm180_vm1, %v1865_v33  ;;  %4550 = vmatmul.msk.bf16.gmra.mxu0 %vm106_vm0, %v4942_v26 }
 0x1f2   :  { %4630 = vmatmul.msk.bf16.gmra.mxu1 %vm106_vm0, %v4954_v28  ;;  %v2269_v36 = vld [vmem:[#allocation2 + $0x50] sm:$0xff] }
 0x1f3   :  { %4710 = vmatmul.msk.bf16.gmra.mxu2 %vm106_vm0, %v4966_v32  ;;  %2091 = vst.msk [vmem:[#allocation2 + $0x58] sm:$0xff] %vm180_vm1, %v2075_v35  ;;  %v2285_v38 = vadd.f32 %v2269_v36, %v2244_v14  ;;  %v2682_v32 = vld [vmem:[#allocation2 + $0x8] sm:$0xff] }
 0x1f4   :  { %v2479_v40 = vld [vmem:[#allocation2 + $0x48] sm:$0xff]  ;;  %4790 = vmatmul.msk.bf16.gmra.mxu3 %vm106_vm0, %v4978_v39 }
 0x1f5   :  { %2301 = vst.msk [vmem:[#allocation2 + $0x50] sm:$0xff] %vm180_vm1, %v2285_v38  ;;  %v2495_v41 = vadd.f32 %v2479_v40, %v2452_v9 }
 0x1f6   :  { %v2249_v42 = vpop.f32.mrf.mxu2  ;;  %v1829_v43 = vpop.f32.mrf.mxu0 }
 0x1f7   :  { %v2040_v45 = vpop.f32.mrf.mxu1  ;;  %2511 = vst.msk [vmem:[#allocation2 + $0x48] sm:$0xff] %vm180_vm1, %v2495_v41  ;;  %v1866_v46 = vadd.f32 %v1850_v44, %v1829_v43  ;;  %v2460_v50 = vpop.f32.mrf.mxu3  ;;  %v2683_v44 = vld [vmem:[#allocation2 + $0x10] sm:$0xff] }
 0x1f8   :  { %v2060_v47 = vld [vmem:[#allocation2 + $0x60] sm:$0xff] }
 0x1f9   :  { %v2076_v48 = vadd.f32 %v2060_v47, %v2038_v31  ;;  %1882 = vst.msk [vmem:[#allocation2 + $0x68] sm:$0xff] %vm180_vm1, %v1866_v46 }
 0x1fa   :  { %v2270_v49 = vld [vmem:[#allocation2 + $0x58] sm:$0xff] }
 0x1fb   :  { %2092 = vst.msk [vmem:[#allocation2 + $0x60] sm:$0xff] %vm180_vm1, %v2076_v48  ;;  %v2286_v51 = vadd.f32 %v2270_v49, %v2246_v27 }
 0x1fc   :  { %v2480_v52 = vld [vmem:[#allocation2 + $0x50] sm:$0xff] }
 0x1fd   :  { %2302 = vst.msk [vmem:[#allocation2 + $0x58] sm:$0xff] %vm180_vm1, %v2286_v51  ;;  %v2496_v53 = vadd.f32 %v2480_v52, %v2455_v22 }
 0x1fe   :  { %v2251_v55 = vpop.f32.mrf.mxu2  ;;  %v1832_v57 = vpop.f32.mrf.mxu0 }
 0x1ff   :  { %v2043_v59 = vpop.f32.mrf.mxu1  ;;  %2512 = vst.msk [vmem:[#allocation2 + $0x50] sm:$0xff] %vm180_vm1, %v2496_v53  ;;  %v1867_v61 = vadd.f32 %v1851_v58, %v1832_v57  ;;  %v2462_v1 = vpop.f32.mrf.mxu3 }
 0x200   :  { %v2061_v62 = vld [vmem:[#allocation2 + $0x68] sm:$0xff] }
 0x201   :  { %v2077_v63 = vadd.f32 %v2061_v62, %v2040_v45  ;;  %1883 = vst.msk [vmem:[#allocation2 + $0x70] sm:$0xff] %vm180_vm1, %v1867_v61  ;;  %4551 = vmatmul.msk.bf16.gmra.mxu0 %vm106_vm0, %v4943_v54 }
 0x202   :  { %4631 = vmatmul.msk.bf16.gmra.mxu1 %vm106_vm0, %v4955_v56  ;;  %v2271_v0 = vld [vmem:[#allocation2 + $0x60] sm:$0xff]  ;;  %v2684_v56 = vld [vmem:[#allocation2 + $0x18] sm:$0xff] }
 0x203   :  { %4711 = vmatmul.msk.bf16.gmra.mxu2 %vm106_vm0, %v4967_v60  ;;  %2093 = vst.msk [vmem:[#allocation2 + $0x68] sm:$0xff] %vm180_vm1, %v2077_v63  ;;  %v2287_v2 = vadd.f32 %v2271_v0, %v2249_v42 }
 0x204   :  { %v2481_v4 = vld [vmem:[#allocation2 + $0x58] sm:$0xff]  ;;  %4791 = vmatmul.msk.bf16.gmra.mxu3 %vm106_vm0, %v4979_v3 }
 0x205   :  { %2303 = vst.msk [vmem:[#allocation2 + $0x60] sm:$0xff] %vm180_vm1, %v2287_v2  ;;  %v2497_v5 = vadd.f32 %v2481_v4, %v2457_v37  ;;  %v2685_v4 = vld [vmem:[#allocation2 + $0x20] sm:$0xff] }
 0x206   :  { %v2254_v6 = vpop.f32.mrf.mxu2  ;;  %v1834_v7 = vpop.f32.mrf.mxu0 }
 0x207   :  { %v2045_v9 = vpop.f32.mrf.mxu1  ;;  %2513 = vst.msk [vmem:[#allocation2 + $0x58] sm:$0xff] %vm180_vm1, %v2497_v5  ;;  %v1868_v10 = vadd.f32 %v1852_v8, %v1834_v7  ;;  %v2465_v14 = vpop.f32.mrf.mxu3 }
 0x208   :  { %v2062_v11 = vld [vmem:[#allocation2 + $0x70] sm:$0xff] }
 0x209   :  { %v2078_v12 = vadd.f32 %v2062_v11, %v2043_v59  ;;  %1884 = vst.msk [vmem:[#allocation2 + $0x78] sm:$0xff] %vm180_vm1, %v1868_v10  ;;  %v5925_v11 = vld [vmem:[%s6155_s2] ss:$0 sm:$0xff] }
 0x20a   :  { %v2272_v13 = vld [vmem:[#allocation2 + $0x68] sm:$0xff] }
 0x20b   :  { %2094 = vst.msk [vmem:[#allocation2 + $0x70] sm:$0xff] %vm180_vm1, %v2078_v12  ;;  %v2288_v15 = vadd.f32 %v2272_v13, %v2251_v55 }
 0x20c   :  { %v2482_v16 = vld [vmem:[#allocation2 + $0x60] sm:$0xff] }
 0x20d   :  { %2304 = vst.msk [vmem:[#allocation2 + $0x68] sm:$0xff] %vm180_vm1, %v2288_v15  ;;  %v2498_v17 = vadd.f32 %v2482_v16, %v2460_v50 }
 0x20e   :  { %v2256_v18 = vpop.f32.mrf.mxu2  ;;  %v2641_v19 = vpop.f32.mrf.mxu0 }
 0x20f   :  { %v2852_v21 = vpop.f32.mrf.mxu1  ;;  %2514 = vst.msk [vmem:[#allocation2 + $0x60] sm:$0xff] %vm180_vm1, %v2498_v17  ;;  %v2697_v22 = vadd.f32 %v2681_v20, %v2641_v19  ;;  %v2467_v26 = vpop.f32.mrf.mxu3 }
 0x210   :  { %v2063_v23 = vld [vmem:[#allocation2 + $0x78] sm:$0xff] }
 0x211   :  { %v2079_v24 = vadd.f32 %v2063_v23, %v2045_v9  ;;  %2713 = vst.msk [vmem:[#allocation2] sm:$0xff] %vm180_vm1, %v2697_v22 }
 0x212   :  { %v2273_v25 = vld [vmem:[#allocation2 + $0x70] sm:$0xff] }
 0x213   :  { %2095 = vst.msk [vmem:[#allocation2 + $0x78] sm:$0xff] %vm180_vm1, %v2079_v24  ;;  %v2289_v27 = vadd.f32 %v2273_v25, %v2254_v6 }
 0x214   :  { %v2483_v28 = vld [vmem:[#allocation2 + $0x68] sm:$0xff] }
 0x215   :  { %2305 = vst.msk [vmem:[#allocation2 + $0x70] sm:$0xff] %vm180_vm1, %v2289_v27  ;;  %v2499_v29 = vadd.f32 %v2483_v28, %v2462_v1 }
 0x216   :  { %v3063_v30 = vpop.f32.mrf.mxu2  ;;  %v2643_v31 = vpop.f32.mrf.mxu0 }
 0x217   :  { %v2854_v33 = vpop.f32.mrf.mxu1  ;;  %2515 = vst.msk [vmem:[#allocation2 + $0x68] sm:$0xff] %vm180_vm1, %v2499_v29  ;;  %v2698_v34 = vadd.f32 %v2682_v32, %v2643_v31  ;;  %v3274_v38 = vpop.f32.mrf.mxu3 }
 0x218   :  { %v2892_v35 = vld [vmem:[#allocation2] sm:$0xff] }
 0x219   :  { %v2908_v36 = vadd.f32 %v2892_v35, %v2852_v21  ;;  %2714 = vst.msk [vmem:[#allocation2 + $0x8] sm:$0xff] %vm180_vm1, %v2698_v34 }
 0x21a   :  { %v2274_v37 = vld [vmem:[#allocation2 + $0x78] sm:$0xff] }
 0x21b   :  { %2924 = vst.msk [vmem:[#allocation2] sm:$0xff] %vm180_vm1, %v2908_v36  ;;  %v2290_v39 = vadd.f32 %v2274_v37, %v2256_v18  ;;  %v2686_v18 = vld [vmem:[#allocation2 + $0x28] sm:$0xff] }
 0x21c   :  { %v2484_v40 = vld [vmem:[#allocation2 + $0x70] sm:$0xff] }
 0x21d   :  { %2306 = vst.msk [vmem:[#allocation2 + $0x78] sm:$0xff] %vm180_vm1, %v2290_v39  ;;  %v2500_v41 = vadd.f32 %v2484_v40, %v2465_v14 }
 0x21e   :  { %v3065_v42 = vpop.f32.mrf.mxu2  ;;  %v2646_v43 = vpop.f32.mrf.mxu0 }
 0x21f   :  { %v2857_v45 = vpop.f32.mrf.mxu1  ;;  %2516 = vst.msk [vmem:[#allocation2 + $0x70] sm:$0xff] %vm180_vm1, %v2500_v41  ;;  %v2699_v46 = vadd.f32 %v2683_v44, %v2646_v43  ;;  %v3276_v50 = vpop.f32.mrf.mxu3 }
 0x220   :  { %v2893_v47 = vld [vmem:[#allocation2 + $0x8] sm:$0xff] }
 0x221   :  { %v2909_v48 = vadd.f32 %v2893_v47, %v2854_v33  ;;  %2715 = vst.msk [vmem:[#allocation2 + $0x10] sm:$0xff] %vm180_vm1, %v2699_v46  ;;  %v2687_v33 = vld [vmem:[#allocation2 + $0x30] sm:$0xff] }
 0x222   :  { %v3103_v49 = vld [vmem:[#allocation2] sm:$0xff] }
 0x223   :  { %2925 = vst.msk [vmem:[#allocation2 + $0x8] sm:$0xff] %vm180_vm1, %v2909_v48  ;;  %v3119_v51 = vadd.f32 %v3103_v49, %v3063_v30 }
 0x224   :  { %v2485_v52 = vld [vmem:[#allocation2 + $0x78] sm:$0xff] }
 0x225   :  { %3135 = vst.msk [vmem:[#allocation2] sm:$0xff] %vm180_vm1, %v3119_v51  ;;  %v2501_v53 = vadd.f32 %v2485_v52, %v2467_v26 }
 0x226   :  { %v3068_v54 = vpop.f32.mrf.mxu2  ;;  %v2648_v55 = vpop.f32.mrf.mxu0 }
 0x227   :  { %v2859_v57 = vpop.f32.mrf.mxu1  ;;  %2517 = vst.msk [vmem:[#allocation2 + $0x78] sm:$0xff] %vm180_vm1, %v2501_v53  ;;  %v2700_v58 = vadd.f32 %v2684_v56, %v2648_v55  ;;  %v3279_v62 = vpop.f32.mrf.mxu3  ;;  %v2688_v56 = vld [vmem:[#allocation2 + $0x38] sm:$0xff] }
 0x228   :  { %v2894_v59 = vld [vmem:[#allocation2 + $0x10] sm:$0xff] }
 0x229   :  { %v2910_v60 = vadd.f32 %v2894_v59, %v2857_v45  ;;  %2716 = vst.msk [vmem:[#allocation2 + $0x18] sm:$0xff] %vm180_vm1, %v2700_v58 }
 0x22a   :  { %v3104_v61 = vld [vmem:[#allocation2 + $0x8] sm:$0xff] }
 0x22b   :  { %2926 = vst.msk [vmem:[#allocation2 + $0x10] sm:$0xff] %vm180_vm1, %v2910_v60  ;;  %v3120_v63 = vadd.f32 %v3104_v61, %v3065_v42 }
 0x22c   :  { %v3314_v0 = vld [vmem:[#allocation2] sm:$0xff] }
 0x22d   :  { %3136 = vst.msk [vmem:[#allocation2 + $0x8] sm:$0xff] %vm180_vm1, %v3120_v63  ;;  %v3330_v1 = vadd.f32 %v3314_v0, %v3274_v38 }
 0x22e   :  { %v3070_v2 = vpop.f32.mrf.mxu2  ;;  %v2651_v3 = vpop.f32.mrf.mxu0 }
 0x22f   :  { %v2862_v5 = vpop.f32.mrf.mxu1  ;;  %3346 = vst.msk [vmem:[#allocation2] sm:$0xff] %vm180_vm1, %v3330_v1  ;;  %v2701_v6 = vadd.f32 %v2685_v4, %v2651_v3  ;;  %v3281_v10 = vpop.f32.mrf.mxu3 }
 0x230   :  { %v2895_v7 = vld [vmem:[#allocation2 + $0x18] sm:$0xff] }
 0x231   :  { %v2911_v8 = vadd.f32 %v2895_v7, %v2859_v57  ;;  %2717 = vst.msk [vmem:[#allocation2 + $0x20] sm:$0xff] %vm180_vm1, %v2701_v6 }
 0x232   :  { %v3105_v9 = vld [vmem:[#allocation2 + $0x10] sm:$0xff] }
 0x233   :  { %2927 = vst.msk [vmem:[#allocation2 + $0x18] sm:$0xff] %vm180_vm1, %v2911_v8  ;;  %v3121_v12 = vadd.f32 %v3105_v9, %v3068_v54 }
 0x234   :  { %v3315_v13 = vld [vmem:[#allocation2 + $0x8] sm:$0xff] }
 0x235   :  { %3137 = vst.msk [vmem:[#allocation2 + $0x10] sm:$0xff] %vm180_vm1, %v3121_v12  ;;  %v3331_v14 = vadd.f32 %v3315_v13, %v3276_v50  ;;  %v2689_v13 = vld [vmem:[#allocation2 + $0x40] sm:$0xff] }
 0x236   :  { %v3073_v15 = vpop.f32.mrf.mxu2  ;;  %v3362_v16 = vld [vmem:[#allocation2] sm:$0xff]  ;;  %v2653_v17 = vpop.f32.mrf.mxu0 }
 0x237   :  { %v2864_v19 = vpop.f32.mrf.mxu1  ;;  %v3382_v20 = vadd.f32 %v5925_v11, %v3362_v16  ;;  %3347 = vst.msk [vmem:[#allocation2 + $0x8] sm:$0xff] %vm180_vm1, %v3331_v14  ;;  %v2702_v21 = vadd.f32 %v2686_v18, %v2653_v17  ;;  %v3284_v26 = vpop.f32.mrf.mxu3 }
 0x238   :  { %v2896_v22 = vld [vmem:[#allocation2 + $0x20] sm:$0xff] }
 0x239   :  { %v3491_v23 = vpack.c.bf16 %v3382_v20, %v3382_v20  ;;  %v2912_v24 = vadd.f32 %v2896_v22, %v2862_v5  ;;  %2718 = vst.msk [vmem:[#allocation2 + $0x28] sm:$0xff] %vm180_vm1, %v2702_v21  ;;  %v3437_v35 = vmul.f32 %v3382_v20, %v3382_v20  ;;  %v3398_v38 = vsel %vm180_vm1, %v3382_v20, 0.0 }
 0x23a   :  { %v3106_v25 = vld [vmem:[#allocation2 + $0x18] sm:$0xff] }
 0x23b   :  { %3508 = vst.msk [vmem:[%s6156_s3] sm:$0xf] %vm3507_vm2, %v3491_v23  ;;  %v3122_v27 = vadd.f32 %v3106_v25, %v3070_v2  ;;  %v3453_v46 = vsel %vm180_vm1, %v3437_v35, 0.0 }
 0x23c   :  { %2928 = vst.msk [vmem:[#allocation2 + $0x20] sm:$0xff] %vm180_vm1, %v2912_v24  ;;  %v3316_v28 = vld [vmem:[#allocation2 + $0x10] sm:$0xff] }
 0x23d   :  { %3138 = vst.msk [vmem:[#allocation2 + $0x18] sm:$0xff] %vm180_vm1, %v3122_v27  ;;  %v3332_v29 = vadd.f32 %v3316_v28, %v3279_v62 }
 0x23e   :  { %v3075_v30 = vpop.f32.mrf.mxu2  ;;  %v3363_v31 = vld [vmem:[#allocation2 + $0x8] sm:$0xff]  ;;  %v2656_v32 = vpop.f32.mrf.mxu0 }
 0x23f   :  { %v2867_v34 = vpop.f32.mrf.mxu1  ;;  %v3383_v36 = vadd.f32 %v5925_v11, %v3363_v31  ;;  %3348 = vst.msk [vmem:[#allocation2 + $0x10] sm:$0xff] %vm180_vm1, %v3332_v29  ;;  %v2703_v37 = vadd.f32 %v2687_v33, %v2656_v32  ;;  %v3286_v45 = vpop.f32.mrf.mxu3  ;;  %v2690_v32 = vld [vmem:[#allocation2 + $0x48] sm:$0xff] }
 0x240   :  { %v2897_v39 = vld [vmem:[#allocation2 + $0x28] sm:$0xff] }
 0x241   :  { %v3399_v40 = vsel %vm180_vm1, %v3383_v36, 0.0  ;;  %v3438_v41 = vmul.f32 %v3383_v36, %v3383_v36  ;;  %v3492_v42 = vpack.c.bf16 %v3383_v36, %v3383_v36  ;;  %v2913_v43 = vadd.f32 %v2897_v39, %v2864_v19  ;;  %2719 = vst.msk [vmem:[#allocation2 + $0x30] sm:$0xff] %vm180_vm1, %v2703_v37 }
 0x242   :  { %v3400_v44 = vadd.f32 %v3399_v40, %v3398_v38 }
 0x243   :  { %v3454_v47 = vsel %vm180_vm1, %v3438_v41, 0.0  ;;  %3509 = vst.msk [vmem:[%s6156_s3 + $0x4] sm:$0xf] %vm3507_vm2, %v3492_v42  ;;  %v3107_v48 = vld [vmem:[#allocation2 + $0x20] sm:$0xff] }
 0x244   :  { %v3455_v49 = vadd.f32 %v3454_v47, %v3453_v46  ;;  %2929 = vst.msk [vmem:[#allocation2 + $0x28] sm:$0xff] %vm180_vm1, %v2913_v43  ;;  %v3123_v50 = vadd.f32 %v3107_v48, %v3073_v15  ;;  %v3317_v51 = vld [vmem:[#allocation2 + $0x18] sm:$0xff] }
 0x245   :  { %v3333_v52 = vadd.f32 %v3317_v51, %v3281_v10 }
 0x246   :  { %v3078_v53 = vpop.f32.mrf.mxu2  ;;  %v3364_v54 = vld [vmem:[#allocation2 + $0x10] sm:$0xff]  ;;  %3139 = vst.msk [vmem:[#allocation2 + $0x20] sm:$0xff] %vm180_vm1, %v3123_v50  ;;  %v2658_v55 = vpop.f32.mrf.mxu0 }
 0x247   :  { %v2869_v57 = vpop.f32.mrf.mxu1  ;;  %v3384_v58 = vadd.f32 %v5925_v11, %v3364_v54  ;;  %3349 = vst.msk [vmem:[#allocation2 + $0x18] sm:$0xff] %vm180_vm1, %v3333_v52  ;;  %v2704_v59 = vadd.f32 %v2688_v56, %v2658_v55  ;;  %v3289_v4 = vpop.f32.mrf.mxu3  ;;  %v2691_v50 = vld [vmem:[#allocation2 + $0x50] sm:$0xff] }
 0x248   :  { %v2898_v60 = vld [vmem:[#allocation2 + $0x30] sm:$0xff] }
 0x249   :  { %v3401_v61 = vsel %vm180_vm1, %v3384_v58, 0.0  ;;  %v3439_v62 = vmul.f32 %v3384_v58, %v3384_v58  ;;  %v3493_v63 = vpack.c.bf16 %v3384_v58, %v3384_v58  ;;  %v2914_v0 = vadd.f32 %v2898_v60, %v2867_v34  ;;  %2720 = vst.msk [vmem:[#allocation2 + $0x38] sm:$0xff] %vm180_vm1, %v2704_v59 }
 0x24a   :  { %v3402_v1 = vadd.f32 %v3401_v61, %v3400_v44 }
 0x24b   :  { %v3456_v2 = vsel %vm180_vm1, %v3439_v62, 0.0  ;;  %3510 = vst.msk [vmem:[%s6156_s3 + $0x8] sm:$0xf] %vm3507_vm2, %v3493_v63  ;;  %v3108_v3 = vld [vmem:[#allocation2 + $0x28] sm:$0xff] }
 0x24c   :  { %v3457_v5 = vadd.f32 %v3456_v2, %v3455_v49  ;;  %2930 = vst.msk [vmem:[#allocation2 + $0x30] sm:$0xff] %vm180_vm1, %v2914_v0  ;;  %v3124_v6 = vadd.f32 %v3108_v3, %v3075_v30 }
 0x24d   :  { %v3318_v7 = vld [vmem:[#allocation2 + $0x20] sm:$0xff] }
 0x24e   :  { %v3080_v8 = vpop.f32.mrf.mxu2  ;;  %v3365_v9 = vld [vmem:[#allocation2 + $0x18] sm:$0xff]  ;;  %3140 = vst.msk [vmem:[#allocation2 + $0x28] sm:$0xff] %vm180_vm1, %v3124_v6  ;;  %v3334_v10 = vadd.f32 %v3318_v7, %v3284_v26  ;;  %v2661_v12 = vpop.f32.mrf.mxu0 }
 0x24f   :  { %v2872_v14 = vpop.f32.mrf.mxu1  ;;  %v3385_v15 = vadd.f32 %v5925_v11, %v3365_v9  ;;  %v2705_v16 = vadd.f32 %v2689_v13, %v2661_v12  ;;  %v3291_v29 = vpop.f32.mrf.mxu3 }
 0x250   :  { %3350 = vst.msk [vmem:[#allocation2 + $0x20] sm:$0xff] %vm180_vm1, %v3334_v10  ;;  %v2899_v17 = vld [vmem:[#allocation2 + $0x38] sm:$0xff] }
 0x251   :  { %v3403_v18 = vsel %vm180_vm1, %v3385_v15, 0.0  ;;  %v3440_v19 = vmul.f32 %v3385_v15, %v3385_v15  ;;  %v3494_v20 = vpack.c.bf16 %v3385_v15, %v3385_v15  ;;  %v2915_v21 = vadd.f32 %v2899_v17, %v2869_v57  ;;  %2721 = vst.msk [vmem:[#allocation2 + $0x40] sm:$0xff] %vm180_vm1, %v2705_v16  ;;  %v2693_v17 = vld [vmem:[#allocation2 + $0x60] sm:$0xff] }
 0x252   :  { %v3404_v22 = vadd.f32 %v3403_v18, %v3402_v1  ;;  %v2692_v1 = vld [vmem:[#allocation2 + $0x58] sm:$0xff] }
 0x253   :  { %v3458_v23 = vsel %vm180_vm1, %v3440_v19, 0.0  ;;  %3511 = vst.msk [vmem:[%s6156_s3 + $0xc] sm:$0xf] %vm3507_vm2, %v3494_v20  ;;  %v3109_v24 = vld [vmem:[#allocation2 + $0x30] sm:$0xff] }
 0x254   :  { %v3459_v25 = vadd.f32 %v3458_v23, %v3457_v5  ;;  %2931 = vst.msk [vmem:[#allocation2 + $0x38] sm:$0xff] %vm180_vm1, %v2915_v21  ;;  %v3125_v26 = vadd.f32 %v3109_v24, %v3078_v53 }
 0x255   :  { %v3319_v27 = vld [vmem:[#allocation2 + $0x28] sm:$0xff] }
 0x256   :  { %v3083_v28 = vpop.f32.mrf.mxu2  ;;  %3141 = vst.msk [vmem:[#allocation2 + $0x30] sm:$0xff] %vm180_vm1, %v3125_v26  ;;  %v3335_v30 = vadd.f32 %v3319_v27, %v3286_v45  ;;  %v2663_v31 = vpop.f32.mrf.mxu0 }
 0x257   :  { %v2874_v33 = vpop.f32.mrf.mxu1  ;;  %v3366_v34 = vld [vmem:[#allocation2 + $0x20] sm:$0xff]  ;;  %v2706_v35 = vadd.f32 %v2690_v32, %v2663_v31  ;;  %v3294_v55 = vpop.f32.mrf.mxu3 }
 0x258   :  { %v3386_v36 = vadd.f32 %v5925_v11, %v3366_v34  ;;  %3351 = vst.msk [vmem:[#allocation2 + $0x28] sm:$0xff] %vm180_vm1, %v3335_v30  ;;  %v2900_v37 = vld [vmem:[#allocation2 + $0x40] sm:$0xff] }
 0x259   :  { %v2916_v38 = vadd.f32 %v2900_v37, %v2872_v14  ;;  %2722 = vst.msk [vmem:[#allocation2 + $0x48] sm:$0xff] %vm180_vm1, %v2706_v35 }
 0x25a   :  { %v3405_v39 = vsel %vm180_vm1, %v3386_v36, 0.0  ;;  %v3441_v40 = vmul.f32 %v3386_v36, %v3386_v36  ;;  %v3495_v41 = vpack.c.bf16 %v3386_v36, %v3386_v36 }
 0x25b   :  { %v5977_v42 = vadd.f32 %v3405_v39, %v3404_v22  ;;  %2932 = vst.msk [vmem:[#allocation2 + $0x40] sm:$0xff] %vm180_vm1, %v2916_v38  ;;  %v3110_v43 = vld [vmem:[#allocation2 + $0x38] sm:$0xff] }
 0x25c   :  { %v3460_v44 = vsel %vm180_vm1, %v3441_v40, 0.0  ;;  %3512 = vst.msk [vmem:[%s6156_s3 + $0x10] sm:$0xf] %vm3507_vm2, %v3495_v41  ;;  %v3126_v45 = vadd.f32 %v3110_v43, %v3080_v8 }
 0x25d   :  { %v5985_v46 = vadd.f32 %v3460_v44, %v3459_v25  ;;  %v3320_v47 = vld [vmem:[#allocation2 + $0x30] sm:$0xff] }
 0x25e   :  { %3142 = vst.msk [vmem:[#allocation2 + $0x38] sm:$0xff] %vm180_vm1, %v3126_v45  ;;  %v3336_v48 = vadd.f32 %v3320_v47, %v3289_v4  ;;  %v2666_v49 = vpop.f32.mrf.mxu0  ;;  %v3085_v54 = vpop.f32.mrf.mxu2 }
 0x25f   :  { %v2877_v51 = vpop.f32.mrf.mxu1  ;;  %v3367_v52 = vld [vmem:[#allocation2 + $0x28] sm:$0xff]  ;;  %v2707_v53 = vadd.f32 %v2691_v50, %v2666_v49  ;;  %v3296_v9 = vpop.f32.mrf.mxu3  ;;  %v2695_v50 = vld [vmem:[#allocation2 + $0x70] sm:$0xff] }
 0x260   :  { %v5989_v56 = vadd.f32 %v5925_v11, %v3367_v52  ;;  %3352 = vst.msk [vmem:[#allocation2 + $0x30] sm:$0xff] %vm180_vm1, %v3336_v48  ;;  %v2901_v57 = vld [vmem:[#allocation2 + $0x48] sm:$0xff] }
 0x261   :  { %v2917_v58 = vadd.f32 %v2901_v57, %v2874_v33  ;;  %2723 = vst.msk [vmem:[#allocation2 + $0x50] sm:$0xff] %vm180_vm1, %v2707_v53  ;;  %v2694_v33 = vld [vmem:[#allocation2 + $0x68] sm:$0xff] }
 0x262   :  { %v3496_v59 = vpack.c.bf16 %v5989_v56, %v5989_v56  ;;  %v3111_v60 = vld [vmem:[#allocation2 + $0x40] sm:$0xff] }
 0x263   :  { %2933 = vst.msk [vmem:[#allocation2 + $0x48] sm:$0xff] %vm180_vm1, %v2917_v58  ;;  %v3127_v61 = vadd.f32 %v3111_v60, %v3083_v28 }
 0x264   :  { %3513 = vst.msk [vmem:[%s6156_s3 + $0x14] sm:$0xf] %vm3507_vm2, %v3496_v59 }
 0x265   :  { %3143 = vst.msk [vmem:[#allocation2 + $0x40] sm:$0xff] %vm180_vm1, %v3127_v61  ;;  %v3321_v62 = vld [vmem:[#allocation2 + $0x38] sm:$0xff] }
 0x266   :  { %v3337_v63 = vadd.f32 %v3321_v62, %v3291_v29  ;;  %v2668_v0 = vpop.f32.mrf.mxu0  ;;  %v3088_v8 = vpop.f32.mrf.mxu2 }
 0x267   :  { %v3368_v2 = vld [vmem:[#allocation2 + $0x30] sm:$0xff]  ;;  %v2708_v3 = vadd.f32 %v2692_v1, %v2668_v0  ;;  %v2879_v6 = vpop.f32.mrf.mxu1  ;;  %v3299_v28 = vpop.f32.mrf.mxu3  ;;  %v2696_v0 = vld [vmem:[#allocation2 + $0x78] sm:$0xff] }
 0x268   :  { %v6002_v4 = vadd.f32 %v5925_v11, %v3368_v2  ;;  %3353 = vst.msk [vmem:[#allocation2 + $0x38] sm:$0xff] %vm180_vm1, %v3337_v63  ;;  %v2902_v5 = vld [vmem:[#allocation2 + $0x50] sm:$0xff] }
 0x269   :  { %v2918_v7 = vadd.f32 %v2902_v5, %v2877_v51  ;;  %2724 = vst.msk [vmem:[#allocation2 + $0x58] sm:$0xff] %vm180_vm1, %v2708_v3 }
 0x26a   :  { %v3497_v10 = vpack.c.bf16 %v6002_v4, %v6002_v4  ;;  %v3112_v12 = vld [vmem:[#allocation2 + $0x48] sm:$0xff] }
 0x26b   :  { %2934 = vst.msk [vmem:[#allocation2 + $0x50] sm:$0xff] %vm180_vm1, %v2918_v7  ;;  %v3128_v13 = vadd.f32 %v3112_v12, %v3085_v54 }
 0x26c   :  { %3514 = vst.msk [vmem:[%s6156_s3 + $0x18] sm:$0xf] %vm3507_vm2, %v3497_v10  ;;  %v3322_v14 = vld [vmem:[#allocation2 + $0x40] sm:$0xff] }
 0x26d   :  { %3144 = vst.msk [vmem:[#allocation2 + $0x48] sm:$0xff] %vm180_vm1, %v3128_v13  ;;  %v3338_v15 = vadd.f32 %v3322_v14, %v3294_v55 }
 0x26e   :  { %v2671_v16 = vpop.f32.mrf.mxu0  ;;  %v3090_v27 = vpop.f32.mrf.mxu2 }
 0x26f   :  { %v3369_v18 = vld [vmem:[#allocation2 + $0x38] sm:$0xff]  ;;  %3354 = vst.msk [vmem:[#allocation2 + $0x40] sm:$0xff] %vm180_vm1, %v3338_v15  ;;  %v2709_v19 = vadd.f32 %v2693_v17, %v2671_v16  ;;  %v2882_v25 = vpop.f32.mrf.mxu1  ;;  %v3301_v47 = vpop.f32.mrf.mxu3 }
 0x270   :  { %v6016_v20 = vadd.f32 %v5925_v11, %v3369_v18  ;;  %v2903_v21 = vld [vmem:[#allocation2 + $0x58] sm:$0xff] }
 0x271   :  { %v2919_v22 = vadd.f32 %v2903_v21, %v2879_v6  ;;  %2725 = vst.msk [vmem:[#allocation2 + $0x60] sm:$0xff] %vm180_vm1, %v2709_v19 }
 0x272   :  { %v3498_v23 = vpack.c.bf16 %v6016_v20, %v6016_v20  ;;  %v3113_v24 = vld [vmem:[#allocation2 + $0x50] sm:$0xff] }
 0x273   :  { %2935 = vst.msk [vmem:[#allocation2 + $0x58] sm:$0xff] %vm180_vm1, %v2919_v22  ;;  %v3129_v26 = vadd.f32 %v3113_v24, %v3088_v8 }
 0x274   :  { %3515 = vst.msk [vmem:[%s6156_s3 + $0x1c] sm:$0xf] %vm3507_vm2, %v3498_v23  ;;  %v3323_v29 = vld [vmem:[#allocation2 + $0x48] sm:$0xff] }
 0x275   :  { %3145 = vst.msk [vmem:[#allocation2 + $0x50] sm:$0xff] %vm180_vm1, %v3129_v26  ;;  %v3339_v30 = vadd.f32 %v3323_v29, %v3296_v9  ;;  %v3442_v29 = vmul.f32 %v5989_v56, %v5989_v56 }
 0x276   :  { %v3370_v31 = vld [vmem:[#allocation2 + $0x40] sm:$0xff]  ;;  %v2673_v32 = vpop.f32.mrf.mxu0  ;;  %v3093_v45 = vpop.f32.mrf.mxu2 }
 0x277   :  { %v6028_v34 = vadd.f32 %v5925_v11, %v3370_v31  ;;  %3355 = vst.msk [vmem:[#allocation2 + $0x48] sm:$0xff] %vm180_vm1, %v3339_v30  ;;  %v2710_v35 = vadd.f32 %v2694_v33, %v2673_v32  ;;  %v2884_v43 = vpop.f32.mrf.mxu1  ;;  %v3304_v3 = vpop.f32.mrf.mxu3 }
 0x278   :  { %v2904_v36 = vld [vmem:[#allocation2 + $0x60] sm:$0xff] }
 0x279   :  { %v3499_v37 = vpack.c.bf16 %v6028_v34, %v6028_v34  ;;  %v2920_v38 = vadd.f32 %v2904_v36, %v2882_v25  ;;  %2726 = vst.msk [vmem:[#allocation2 + $0x68] sm:$0xff] %vm180_vm1, %v2710_v35  ;;  %v3407_v35 = vsel %vm180_vm1, %v5989_v56, 0.0  ;;  %v3443_v36 = vmul.f32 %v6002_v4, %v6002_v4 }
 0x27a   :  { %v3114_v39 = vld [vmem:[#allocation2 + $0x58] sm:$0xff] }
 0x27b   :  { %3516 = vst.msk [vmem:[%s6156_s3 + $0x20] sm:$0xf] %vm3507_vm2, %v3499_v37  ;;  %v3130_v40 = vadd.f32 %v3114_v39, %v3090_v27  ;;  %v3462_v39 = vsel %vm180_vm1, %v3442_v29, 0.0 }
 0x27c   :  { %2936 = vst.msk [vmem:[#allocation2 + $0x60] sm:$0xff] %vm180_vm1, %v2920_v38  ;;  %v3324_v41 = vld [vmem:[#allocation2 + $0x50] sm:$0xff] }
 0x27d   :  { %3146 = vst.msk [vmem:[#allocation2 + $0x58] sm:$0xff] %vm180_vm1, %v3130_v40  ;;  %v3340_v44 = vadd.f32 %v3324_v41, %v3299_v28  ;;  %v3409_v40 = vsel %vm180_vm1, %v6002_v4, 0.0  ;;  %v3444_v41 = vmul.f32 %v6016_v20, %v6016_v20  ;;  %v3463_v4 = vadd.f32 %v3462_v39, %v5985_v46 }
 0x27e   :  { %v3371_v48 = vld [vmem:[#allocation2 + $0x48] sm:$0xff]  ;;  %v2676_v49 = vpop.f32.mrf.mxu0  ;;  %v3095_v2 = vpop.f32.mrf.mxu2 }
 0x27f   :  { %v6041_v51 = vadd.f32 %v5925_v11, %v3371_v48  ;;  %3356 = vst.msk [vmem:[#allocation2 + $0x50] sm:$0xff] %vm180_vm1, %v3340_v44  ;;  %v2711_v52 = vadd.f32 %v2695_v50, %v2676_v49  ;;  %v2887_v62 = vpop.f32.mrf.mxu1  ;;  %v3306_v22 = vpop.f32.mrf.mxu3  ;;  %v3445_v48 = vmul.f32 %v6028_v34, %v6028_v34 }
 0x280   :  { %v2905_v53 = vld [vmem:[#allocation2 + $0x68] sm:$0xff] }
 0x281   :  { %v3500_v54 = vpack.c.bf16 %v6041_v51, %v6041_v51  ;;  %v2921_v55 = vadd.f32 %v2905_v53, %v2884_v43  ;;  %2727 = vst.msk [vmem:[#allocation2 + $0x70] sm:$0xff] %vm180_vm1, %v2711_v52  ;;  %v3408_v43 = vadd.f32 %v3407_v35, %v5977_v42  ;;  %v3466_v52 = vsel %vm180_vm1, %v3444_v41, 0.0 }
 0x282   :  { %v3413_v42 = vsel %vm180_vm1, %v6028_v34, 0.0  ;;  %v3446_v53 = vmul.f32 %v6041_v51, %v6041_v51 }
 0x283   :  { %3517 = vst.msk [vmem:[%s6156_s3 + $0x24] sm:$0xf] %vm3507_vm2, %v3500_v54  ;;  %v3115_v57 = vld [vmem:[#allocation2 + $0x60] sm:$0xff]  ;;  %v3410_v50 = vadd.f32 %v3409_v40, %v3408_v43 }
 0x284   :  { %2937 = vst.msk [vmem:[#allocation2 + $0x68] sm:$0xff] %vm180_vm1, %v2921_v55  ;;  %v3131_v58 = vadd.f32 %v3115_v57, %v3093_v45  ;;  %v3325_v59 = vld [vmem:[#allocation2 + $0x58] sm:$0xff]  ;;  %v3464_v45 = vsel %vm180_vm1, %v3443_v36, 0.0  ;;  %v3468_v57 = vsel %vm180_vm1, %v3445_v48, 0.0 }
 0x285   :  { %v3341_v60 = vadd.f32 %v3325_v59, %v3301_v47  ;;  %v3411_v47 = vsel %vm180_vm1, %v6016_v20, 0.0  ;;  %v3465_v20 = vadd.f32 %v3464_v45, %v3463_v4 }
 0x286   :  { %v3372_v61 = vld [vmem:[#allocation2 + $0x50] sm:$0xff]  ;;  %3147 = vst.msk [vmem:[#allocation2 + $0x60] sm:$0xff] %vm180_vm1, %v3131_v58  ;;  %v2678_v63 = vpop.f32.mrf.mxu0  ;;  %v3098_v21 = vpop.f32.mrf.mxu2  ;;  %v3412_v55 = vadd.f32 %v3411_v47, %v3410_v50  ;;  %v3415_v58 = vsel %vm180_vm1, %v6041_v51, 0.0 }
 0x287   :  { %v6054_v1 = vadd.f32 %v5925_v11, %v3372_v61  ;;  %3357 = vst.msk [vmem:[#allocation2 + $0x58] sm:$0xff] %vm180_vm1, %v3341_v60  ;;  %v2712_v5 = vadd.f32 %v2696_v0, %v2678_v63  ;;  %v2889_v16 = vpop.f32.mrf.mxu1  ;;  %v3309_v33 = vpop.f32.mrf.mxu3  ;;  %v3467_v34 = vadd.f32 %v3466_v52, %v3465_v20 }
 0x288   :  { %v2906_v6 = vld [vmem:[#allocation2 + $0x70] sm:$0xff]  ;;  %v3414_v59 = vadd.f32 %v3413_v42, %v3412_v55 }
 0x289   :  { %v3501_v7 = vpack.c.bf16 %v6054_v1, %v6054_v1  ;;  %v2922_v8 = vadd.f32 %v2906_v6, %v2887_v62  ;;  %2728 = vst.msk [vmem:[#allocation2 + $0x78] sm:$0xff] %vm180_vm1, %v2712_v5  ;;  %v3447_v46 = vmul.f32 %v6054_v1, %v6054_v1  ;;  %v3470_v62 = vsel %vm180_vm1, %v3446_v53, 0.0 }
 0x28a   :  { %v3417_v63 = vsel %vm180_vm1, %v6054_v1, 0.0 }
 0x28b   :  { %3518 = vst.msk [vmem:[%s6156_s3 + $0x28] sm:$0xf] %vm3507_vm2, %v3501_v7  ;;  %v3116_v9 = vld [vmem:[#allocation2 + $0x68] sm:$0xff]  ;;  %v3472_v6 = vsel %vm180_vm1, %v3447_v46, 0.0 }
 0x28c   :  { %2938 = vst.msk [vmem:[#allocation2 + $0x70] sm:$0xff] %vm180_vm1, %v2922_v8  ;;  %v3132_v10 = vadd.f32 %v3116_v9, %v3095_v2  ;;  %v3469_v2 = vadd.f32 %v3468_v57, %v3467_v34 }
 0x28d   :  { %v3326_v12 = vld [vmem:[#allocation2 + $0x60] sm:$0xff] }
 0x28e   :  { %v3373_v13 = vld [vmem:[#allocation2 + $0x58] sm:$0xff]  ;;  %3148 = vst.msk [vmem:[#allocation2 + $0x68] sm:$0xff] %vm180_vm1, %v3132_v10  ;;  %v3342_v14 = vadd.f32 %v3326_v12, %v3304_v3  ;;  %v3100_v31 = vpop.f32.mrf.mxu2  ;;  %v3416_v3 = vadd.f32 %v3415_v58, %v3414_v59  ;;  %v3471_v10 = vadd.f32 %v3470_v62, %v3469_v2 }
 0x28f   :  { %v6067_v15 = vadd.f32 %v5925_v11, %v3373_v13  ;;  %v3311_v60 = vpop.f32.mrf.mxu3 }
 0x290   :  { %3358 = vst.msk [vmem:[#allocation2 + $0x60] sm:$0xff] %vm180_vm1, %v3342_v14  ;;  %v2907_v17 = vld [vmem:[#allocation2 + $0x78] sm:$0xff]  ;;  %v3418_v12 = vadd.f32 %v3417_v63, %v3416_v3 }
 0x291   :  { %v3502_v18 = vpack.c.bf16 %v6067_v15, %v6067_v15  ;;  %v2923_v19 = vadd.f32 %v2907_v17, %v2889_v16  ;;  %v3448_v51 = vmul.f32 %v6067_v15, %v6067_v15  ;;  %v3419_v7 = vsel %vm180_vm1, %v6067_v15, 0.0 }
 0x292   :  { %v3473_v17 = vadd.f32 %v3472_v6, %v3471_v10 }
 0x293   :  { %3519 = vst.msk [vmem:[%s6156_s3 + $0x2c] sm:$0xf] %vm3507_vm2, %v3502_v18  ;;  %v3117_v23 = vld [vmem:[#allocation2 + $0x70] sm:$0xff]  ;;  %v3474_v1 = vsel %vm180_vm1, %v3448_v51, 0.0  ;;  %v3420_v18 = vadd.f32 %v3419_v7, %v3418_v12 }
 0x294   :  { %2939 = vst.msk [vmem:[#allocation2 + $0x78] sm:$0xff] %vm180_vm1, %v2923_v19  ;;  %v3133_v24 = vadd.f32 %v3117_v23, %v3098_v21 }
 0x295   :  { %v3327_v25 = vld [vmem:[#allocation2 + $0x68] sm:$0xff] }
 0x296   :  { %3149 = vst.msk [vmem:[#allocation2 + $0x70] sm:$0xff] %vm180_vm1, %v3133_v24  ;;  %v3343_v26 = vadd.f32 %v3327_v25, %v3306_v22  ;;  %v3475_v22 = vadd.f32 %v3474_v1, %v3473_v17 }
 0x297   :  { %v3374_v27 = vld [vmem:[#allocation2 + $0x60] sm:$0xff] }
 0x298   :  { %v3394_v28 = vadd.f32 %v5925_v11, %v3374_v27  ;;  %3359 = vst.msk [vmem:[#allocation2 + $0x68] sm:$0xff] %vm180_vm1, %v3343_v26 }
 0x29a   :  { %v3503_v30 = vpack.c.bf16 %v3394_v28, %v3394_v28  ;;  %v3449_v8 = vmul.f32 %v3394_v28, %v3394_v28  ;;  %v3421_v13 = vsel %vm180_vm1, %v3394_v28, 0.0 }
 0x29b   :  { %v3118_v32 = vld [vmem:[#allocation2 + $0x78] sm:$0xff]  ;;  %v3422_v23 = vadd.f32 %v3421_v13, %v3420_v18 }
 0x29c   :  { %3520 = vst.msk [vmem:[%s6156_s3 + $0x30] sm:$0xf] %vm3507_vm2, %v3503_v30  ;;  %v3134_v37 = vadd.f32 %v3118_v32, %v3100_v31  ;;  %v3476_v19 = vsel %vm180_vm1, %v3449_v8, 0.0 }
 0x29d   :  { %v3328_v38 = vld [vmem:[#allocation2 + $0x70] sm:$0xff]  ;;  %v3477_v26 = vadd.f32 %v3476_v19, %v3475_v22 }
 0x29e   :  { %3150 = vst.msk [vmem:[#allocation2 + $0x78] sm:$0xff] %vm180_vm1, %v3134_v37  ;;  %v3344_v56 = vadd.f32 %v3328_v38, %v3309_v33 }
 0x29f   :  { %v3375_v44 = vld [vmem:[#allocation2 + $0x68] sm:$0xff] }
 0x2a0   :  { %v3395_v49 = vadd.f32 %v5925_v11, %v3375_v44  ;;  %3360 = vst.msk [vmem:[#allocation2 + $0x70] sm:$0xff] %vm180_vm1, %v3344_v56 }
 0x2a2   :  { %v3504_v54 = vpack.c.bf16 %v3395_v49, %v3395_v49  ;;  %v3450_v14 = vmul.f32 %v3395_v49, %v3395_v49  ;;  %v3423_v21 = vsel %vm180_vm1, %v3395_v49, 0.0 }
 0x2a3   :  { %v3424_v27 = vadd.f32 %v3423_v21, %v3422_v23 }
 0x2a4   :  { %3521 = vst.msk [vmem:[%s6156_s3 + $0x34] sm:$0xf] %vm3507_vm2, %v3504_v54  ;;  %v3478_v24 = vsel %vm180_vm1, %v3450_v14, 0.0 }
 0x2a5   :  { %v3329_v61 = vld [vmem:[#allocation2 + $0x78] sm:$0xff]  ;;  %v3479_v31 = vadd.f32 %v3478_v24, %v3477_v26 }
 0x2a6   :  { %v3345_v0 = vadd.f32 %v3329_v61, %v3311_v60 }
 0x2a7   :  { %v3376_v5 = vld [vmem:[#allocation2 + $0x70] sm:$0xff] }
 0x2a8   :  { %v3396_v9 = vadd.f32 %v5925_v11, %v3376_v5  ;;  %3361 = vst.msk [vmem:[#allocation2 + $0x78] sm:$0xff] %vm180_vm1, %v3345_v0 }
 0x2aa   :  { %v3505_v16 = vpack.c.bf16 %v3396_v9, %v3396_v9  ;;  %v3451_v15 = vmul.f32 %v3396_v9, %v3396_v9  ;;  %v3425_v25 = vsel %vm180_vm1, %v3396_v9, 0.0 }
 0x2ab   :  { %v3426_v32 = vadd.f32 %v3425_v25, %v3424_v27 }
 0x2ac   :  { %3522 = vst.msk [vmem:[%s6156_s3 + $0x38] sm:$0xf] %vm3507_vm2, %v3505_v16  ;;  %v3480_v29 = vsel %vm180_vm1, %v3451_v15, 0.0 }
 0x2ad   :  { %v3481_v37 = vadd.f32 %v3480_v29, %v3479_v31 }
 0x2af   :  { %v3377_v28 = vld [vmem:[#allocation2 + $0x78] sm:$0xff] }
 0x2b0   :  { %v3397_v30 = vadd.f32 %v5925_v11, %v3377_v28 }
 0x2b2   :  { %v3427_v33 = vsel %vm180_vm1, %v3397_v30, 0.0  ;;  %v3452_v35 = vmul.f32 %v3397_v30, %v3397_v30  ;;  %v3506_v36 = vpack.c.bf16 %v3397_v30, %v3397_v30 }
 0x2b3   :  { %v3428_v38 = vadd.f32 %v3427_v33, %v3426_v32 }
 0x2b4   :  { %v3482_v39 = vsel %vm180_vm1, %v3452_v35, 0.0  ;;  %3523 = vst.msk [vmem:[%s6156_s3 + $0x3c] sm:$0xf] %vm3507_vm2, %v3506_v36 }
 0x2b5   :  { %v3429_v40 = vrot.slane %v3428_v38, 4  ;;  %v3483_v41 = vadd.f32 %v3482_v39, %v3481_v37 }
 0x2b7   :  { %v3430_v56 = vadd.f32 %v3429_v40, %v3428_v38  ;;  %v3484_v43 = vrot.slane %v3483_v41, 4 }
 0x2b9   :  { %v3431_v11 = vrot.slane %v3430_v56, 2  ;;  %v3485_v44 = vadd.f32 %v3484_v43, %v3483_v41 }
 0x2bb   :  { %v3432_v45 = vadd.f32 %v3431_v11, %v3430_v56  ;;  %v3486_v47 = vrot.slane %v3485_v44, 2 }
 0x2bd   :  { %v3433_v48 = vrot.slane %v3432_v45, 1  ;;  %v3487_v49 = vadd.f32 %v3486_v47, %v3485_v44 }
 0x2bf   :  { %v3434_v4 = vadd.f32 %v3433_v48, %v3432_v45  ;;  %v3488_v50 = vrot.slane %v3487_v49, 1 }
 0x2c1   :  { %3436 = vst.msk [vmem:[%s6157_s4] sm:$0x1] %vm3435_vm3, %v3434_v4  ;;  %v3489_v52 = vadd.f32 %v3488_v50, %v3487_v49 }
 0x2c3   :  { %3490 = vst.msk [vmem:[%s6158_s5] sm:$0x1] %vm3435_vm3, %v3489_v52 }

// kernel: discriminator_forward.9
= control target key start
LH: loop header
LB: loop body
LE: loop exit
PB: predicated region body
PF: predicated region fallthrough
CT: control target
= control target key end

     0   :  { %vm397_vm0 = vcmask 130048   ;;  %vm451_vm1 = vcmask 125952   ;;  %vm427_vm2 = vcmask 122880   ;;  %s880_s1 = inlined_call_operand.vmem [shape: bf16[512,16], index: 1, kind: input, shape index: {}]   ;;  %s881_s0 = inlined_call_operand.vmem [shape: bf16[32,512], index: 0, kind: input, shape index: {}]   ;;  %s882_s2 = inlined_call_operand.vmem [shape: f32[1,16], index: 2, kind: input, shape index: {}]   ;;  %s883_s3 = inlined_call_operand.vmem [shape: bf16[32,16], index: 3, kind: output, shape index: {0}]   ;;  %s884_s4 = inlined_call_operand.vmem [shape: f32[1,1,16], index: 4, kind: output, shape index: {1}]   ;;  %s885_s5 = inlined_call_operand.vmem [shape: f32[1,1,16], index: 5, kind: output, shape index: {2}]  }
   0x1   :  { %v643_v0 = vld [vmem:[%s880_s1 + $0x38] sm:$0xff]  ;;  %v642_v4 = vld [vmem:[%s880_s1 + $0x30] sm:$0xff]  ;;  %v641_v8 = vld [vmem:[%s880_s1 + $0x28] sm:$0xff] }
   0x2   :  { %v651_v1 = vld [vmem:[%s880_s1 + $0x78] sm:$0xff]  ;;  %321 = vmatpush.bf16.msra.mxu0 %v643_v0  ;;  %v650_v5 = vld [vmem:[%s880_s1 + $0x70] sm:$0xff]  ;;  %v649_v9 = vld [vmem:[%s880_s1 + $0x68] sm:$0xff] }
   0x3   :  { %v659_v2 = vld [vmem:[%s880_s1 + $0xb8] sm:$0xff]  ;;  %340 = vmatpush.bf16.msra.mxu1 %v651_v1  ;;  %v658_v6 = vld [vmem:[%s880_s1 + $0xb0] sm:$0xff]  ;;  %v657_v10 = vld [vmem:[%s880_s1 + $0xa8] sm:$0xff] }
   0x4   :  { %v667_v3 = vld [vmem:[%s880_s1 + $0xf8] sm:$0xff]  ;;  %359 = vmatpush.bf16.msra.mxu2 %v659_v2  ;;  %v666_v7 = vld [vmem:[%s880_s1 + $0xf0] sm:$0xff]  ;;  %v665_v11 = vld [vmem:[%s880_s1 + $0xe8] sm:$0xff] }
   0x5   :  { %378 = vmatpush.bf16.msra.mxu3 %v667_v3  ;;  %v640_v12 = vld [vmem:[%s880_s1 + $0x20] sm:$0xff]  ;;  %v639_v16 = vld [vmem:[%s880_s1 + $0x18] sm:$0xff]  ;;  %v638_v20 = vld [vmem:[%s880_s1 + $0x10] sm:$0xff] }
   0x6   :  { %322 = vmatpush.bf16.msra.mxu0 %v642_v4  ;;  %v648_v13 = vld [vmem:[%s880_s1 + $0x60] sm:$0xff]  ;;  %v647_v17 = vld [vmem:[%s880_s1 + $0x58] sm:$0xff]  ;;  %v646_v21 = vld [vmem:[%s880_s1 + $0x50] sm:$0xff] }
   0x7   :  { %341 = vmatpush.bf16.msra.mxu1 %v650_v5  ;;  %v656_v14 = vld [vmem:[%s880_s1 + $0xa0] sm:$0xff]  ;;  %v655_v18 = vld [vmem:[%s880_s1 + $0x98] sm:$0xff]  ;;  %v654_v22 = vld [vmem:[%s880_s1 + $0x90] sm:$0xff] }
   0x8   :  { %360 = vmatpush.bf16.msra.mxu2 %v658_v6  ;;  %v664_v15 = vld [vmem:[%s880_s1 + $0xe0] sm:$0xff]  ;;  %v663_v19 = vld [vmem:[%s880_s1 + $0xd8] sm:$0xff]  ;;  %v662_v23 = vld [vmem:[%s880_s1 + $0xd0] sm:$0xff] }
   0x9   :  { %379 = vmatpush.bf16.msra.mxu3 %v666_v7  ;;  %v637_v24 = vld [vmem:[%s880_s1 + $0x8] sm:$0xff]  ;;  %v636_v28 = vld [vmem:[%s880_s1] sm:$0xff]  ;;  %v630_v33 = vld [vmem:[%s881_s0 + $0xc] sm:$0xf0] }
   0xa   :  { %323 = vmatpush.bf16.msra.mxu0 %v641_v8  ;;  %v645_v25 = vld [vmem:[%s880_s1 + $0x48] sm:$0xff]  ;;  %v644_v29 = vld [vmem:[%s880_s1 + $0x40] sm:$0xff]  ;;  %v472_v35 = vld [vmem:[%s881_s0 + $0x10] sm:$0xf0] }
   0xb   :  { %342 = vmatpush.bf16.msra.mxu1 %v649_v9  ;;  %v653_v26 = vld [vmem:[%s880_s1 + $0x88] sm:$0xff]  ;;  %v652_v30 = vld [vmem:[%s880_s1 + $0x80] sm:$0xff]  ;;  %v631_v37 = vld [vmem:[%s881_s0 + $0x14] sm:$0xf0] }
   0xc   :  { %361 = vmatpush.bf16.msra.mxu2 %v657_v10  ;;  %v661_v27 = vld [vmem:[%s880_s1 + $0xc8] sm:$0xff]  ;;  %v660_v31 = vld [vmem:[%s880_s1 + $0xc0] sm:$0xff]  ;;  %v480_v39 = vld [vmem:[%s881_s0 + $0x18] sm:$0xf0] }
   0xd   :  { %380 = vmatpush.bf16.msra.mxu3 %v665_v11  ;;  %v470_v32 = vld [vmem:[%s881_s0] sm:$0xf]  ;;  %v628_v34 = vld [vmem:[%s881_s0 + $0x4] sm:$0xf]  ;;  %v478_v36 = vld [vmem:[%s881_s0 + $0x8] sm:$0xf] }
   0xe   :  { %324 = vmatpush.bf16.msra.mxu0 %v640_v12  ;;  %v629_v38 = vld [vmem:[%s881_s0 + $0xc] sm:$0xf]  ;;  %v471_v40 = vor.u32 %v630_v33, %v470_v32  ;;  %v475_v41 = vor.u32 %v628_v34, %v472_v35  ;;  %v479_v42 = vor.u32 %v631_v37, %v478_v36  ;;  %v486_v44 = vld [vmem:[%s881_s0 + $0x20] sm:$0xf]  ;;  %v634_v45 = vld [vmem:[%s881_s0 + $0x2c] sm:$0xf0] }
   0xf   :  { %343 = vmatpush.bf16.msra.mxu1 %v648_v13  ;;  %v483_v43 = vor.u32 %v629_v38, %v480_v39  ;;  %v632_v46 = vld [vmem:[%s881_s0 + $0x24] sm:$0xf]  ;;  %v488_v47 = vld [vmem:[%s881_s0 + $0x30] sm:$0xf0]  ;;  %v494_v48 = vld [vmem:[%s881_s0 + $0x28] sm:$0xf]  ;;  %v487_v52 = vor.u32 %v634_v45, %v486_v44 }
  0x10   :  { %362 = vmatpush.bf16.msra.mxu2 %v656_v14  ;;  %v635_v49 = vld [vmem:[%s881_s0 + $0x34] sm:$0xf0]  ;;  %v633_v50 = vld [vmem:[%s881_s0 + $0x2c] sm:$0xf]  ;;  %v496_v51 = vld [vmem:[%s881_s0 + $0x38] sm:$0xf0]  ;;  %v491_v53 = vor.u32 %v632_v46, %v488_v47 }
  0x11   :  { %381 = vmatpush.bf16.msra.mxu3 %v664_v15  ;;  %v495_v54 = vor.u32 %v635_v49, %v494_v48  ;;  %v499_v55 = vor.u32 %v633_v50, %v496_v51  ;;  %v668_v4 = vld [vmem:[%s882_s2] ss:$0 sm:$0xff] }
  0x12   :  { %325 = vmatpush.bf16.msra.mxu0 %v639_v16 }
  0x13   :  { %344 = vmatpush.bf16.msra.mxu1 %v647_v17 }
  0x14   :  { %363 = vmatpush.bf16.msra.mxu2 %v655_v18 }
  0x15   :  { %382 = vmatpush.bf16.msra.mxu3 %v663_v19 }
  0x16   :  { %326 = vmatpush.bf16.msra.mxu0 %v638_v20 }
  0x17   :  { %345 = vmatpush.bf16.msra.mxu1 %v646_v21 }
  0x18   :  { %364 = vmatpush.bf16.msra.mxu2 %v654_v22 }
  0x19   :  { %383 = vmatpush.bf16.msra.mxu3 %v662_v23 }
  0x1a   :  { %327 = vmatpush.bf16.msra.mxu0 %v637_v24 }
  0x1b   :  { %346 = vmatpush.bf16.msra.mxu1 %v645_v25 }
  0x1c   :  { %365 = vmatpush.bf16.msra.mxu2 %v653_v26 }
  0x1d   :  { %384 = vmatpush.bf16.msra.mxu3 %v661_v27 }
  0x1e   :  { %328 = vmatpush.bf16.msra.mxu0 %v636_v28 }
  0x1f   :  { %347 = vmatpush.bf16.msra.mxu1 %v644_v29 }
  0x20   :  { %366 = vmatpush.bf16.msra.mxu2 %v652_v30 }
  0x21   :  { %385 = vmatpush.bf16.msra.mxu3 %v660_v31  ;;  %329 = vmatmul.bf16.vlgmr.msra.gmra.mxu0 %v471_v40 }
  0x22   :  { %348 = vmatmul.bf16.vlgmr.msra.gmra.mxu1 %v475_v41 }
  0x23   :  { %367 = vmatmul.bf16.vlgmr.msra.gmra.mxu2 %v479_v42 }
  0x24   :  { %386 = vmatmul.bf16.vlgmr.msra.gmra.mxu3 %v483_v43 }
  0x31   :  { %334 = vmatmul.bf16.gmra.mxu0 %v487_v52 }
  0x32   :  { %353 = vmatmul.bf16.gmra.mxu1 %v491_v53 }
  0x33   :  { %372 = vmatmul.bf16.gmra.mxu2 %v495_v54 }
  0x34   :  { %391 = vmatmul.bf16.gmra.mxu3 %v499_v55 }
  0x9e   :  { %v330_v56 = vpop.f32.mrf.mxu0 }
  0x9f   :  { %v349_v57 = vpop.f32.mrf.mxu1 }
  0xa0   :  { %v350_v58 = vadd.f32 %v349_v57, %v330_v56 }
  0xa6   :  { %v368_v59 = vpop.f32.mrf.mxu2  ;;  %v332_v62 = vpop.f32.mrf.mxu0 }
  0xa7   :  { %v387_v60 = vpop.f32.mrf.mxu3  ;;  %v369_v61 = vadd.f32 %v368_v59, %v350_v58  ;;  %v351_v63 = vpop.f32.mrf.mxu1 }
  0xa8   :  { %v352_v1 = vadd.f32 %v351_v63, %v332_v62 }
  0xa9   :  { %v388_v0 = vadd.f32 %v387_v60, %v369_v61 }
  0xab   :  { %398 = vst.msk [vmem:[#allocation2] sm:$0xff] %vm397_vm0, %v388_v0 }
  0xae   :  { %v370_v2 = vpop.f32.mrf.mxu2  ;;  %v335_v6 = vpop.f32.mrf.mxu0 }
  0xaf   :  { %v389_v3 = vpop.f32.mrf.mxu3  ;;  %v371_v5 = vadd.f32 %v370_v2, %v352_v1  ;;  %v354_v7 = vpop.f32.mrf.mxu1 }
  0xb0   :  { %v355_v11 = vadd.f32 %v354_v7, %v335_v6 }
  0xb1   :  { %v390_v8 = vadd.f32 %v389_v3, %v371_v5 }
  0xb2   :  { %v402_v9 = vld [vmem:[#allocation2] sm:$0xff] }
  0xb3   :  { %v410_v10 = vadd.f32 %v668_v4, %v402_v9  ;;  %399 = vst.msk [vmem:[#allocation2 + $0x8] sm:$0xff] %vm397_vm0, %v390_v8 }
  0xb5   :  { %v447_v12 = vpack.c.bf16 %v410_v10, %v410_v10  ;;  %v429_v31 = vmul.f32 %v410_v10, %v410_v10  ;;  %v414_v34 = vsel %vm397_vm0, %v410_v10, 0.0 }
  0xb6   :  { %v373_v13 = vpop.f32.mrf.mxu2  ;;  %v337_v18 = vpop.f32.mrf.mxu0 }
  0xb7   :  { %v392_v14 = vpop.f32.mrf.mxu3  ;;  %452 = vst.msk [vmem:[%s883_s3] sm:$0xf] %vm451_vm1, %v447_v12  ;;  %v374_v15 = vadd.f32 %v373_v13, %v355_v11  ;;  %v356_v19 = vpop.f32.mrf.mxu1  ;;  %v433_v39 = vsel %vm397_vm0, %v429_v31, 0.0 }
  0xb8   :  { %v357_v22 = vadd.f32 %v356_v19, %v337_v18 }
  0xb9   :  { %v393_v16 = vadd.f32 %v392_v14, %v374_v15 }
  0xba   :  { %v403_v17 = vld [vmem:[#allocation2 + $0x8] sm:$0xff] }
  0xbb   :  { %v411_v20 = vadd.f32 %v668_v4, %v403_v17  ;;  %400 = vst.msk [vmem:[#allocation2 + $0x10] sm:$0xff] %vm397_vm0, %v393_v16 }
  0xbd   :  { %v448_v21 = vpack.c.bf16 %v411_v20, %v411_v20  ;;  %v430_v29 = vmul.f32 %v411_v20, %v411_v20  ;;  %v415_v32 = vsel %vm397_vm0, %v411_v20, 0.0 }
  0xbe   :  { %v375_v23 = vpop.f32.mrf.mxu2  ;;  %v416_v37 = vadd.f32 %v415_v32, %v414_v34 }
  0xbf   :  { %453 = vst.msk [vmem:[%s883_s3 + $0x4] sm:$0xf] %vm451_vm1, %v448_v21  ;;  %v376_v24 = vadd.f32 %v375_v23, %v357_v22  ;;  %v394_v25 = vpop.f32.mrf.mxu3  ;;  %v434_v35 = vsel %vm397_vm0, %v430_v29, 0.0 }
  0xc0   :  { %v435_v42 = vadd.f32 %v434_v35, %v433_v39 }
  0xc1   :  { %v395_v26 = vadd.f32 %v394_v25, %v376_v24 }
  0xc2   :  { %v404_v27 = vld [vmem:[#allocation2 + $0x10] sm:$0xff] }
  0xc3   :  { %v412_v28 = vadd.f32 %v668_v4, %v404_v27  ;;  %401 = vst.msk [vmem:[#allocation2 + $0x18] sm:$0xff] %vm397_vm0, %v395_v26 }
  0xc5   :  { %v449_v30 = vpack.c.bf16 %v412_v28, %v412_v28  ;;  %v431_v33 = vmul.f32 %v412_v28, %v412_v28  ;;  %v417_v36 = vsel %vm397_vm0, %v412_v28, 0.0 }
  0xc6   :  { %v418_v43 = vadd.f32 %v417_v36, %v416_v37 }
  0xc7   :  { %454 = vst.msk [vmem:[%s883_s3 + $0x8] sm:$0xf] %vm451_vm1, %v449_v30  ;;  %v436_v40 = vsel %vm397_vm0, %v431_v33, 0.0 }
  0xc8   :  { %v437_v47 = vadd.f32 %v436_v40, %v435_v42 }
  0xca   :  { %v405_v38 = vld [vmem:[#allocation2 + $0x18] sm:$0xff] }
  0xcb   :  { %v413_v41 = vadd.f32 %v668_v4, %v405_v38 }
  0xcd   :  { %v419_v44 = vsel %vm397_vm0, %v413_v41, 0.0  ;;  %v432_v45 = vmul.f32 %v413_v41, %v413_v41  ;;  %v450_v46 = vpack.c.bf16 %v413_v41, %v413_v41 }
  0xce   :  { %v420_v48 = vadd.f32 %v419_v44, %v418_v43 }
  0xcf   :  { %v438_v49 = vsel %vm397_vm0, %v432_v45, 0.0  ;;  %455 = vst.msk [vmem:[%s883_s3 + $0xc] sm:$0xf] %vm451_vm1, %v450_v46 }
  0xd0   :  { %v421_v50 = vrot.slane %v420_v48, 4  ;;  %v439_v51 = vadd.f32 %v438_v49, %v437_v47 }
  0xd2   :  { %v422_v52 = vadd.f32 %v421_v50, %v420_v48  ;;  %v440_v53 = vrot.slane %v439_v51, 4 }
  0xd4   :  { %v423_v54 = vrot.slane %v422_v52, 2  ;;  %v441_v55 = vadd.f32 %v440_v53, %v439_v51 }
  0xd6   :  { %v424_v56 = vadd.f32 %v423_v54, %v422_v52  ;;  %v442_v57 = vrot.slane %v441_v55, 2 }
  0xd8   :  { %v425_v58 = vrot.slane %v424_v56, 1  ;;  %v443_v59 = vadd.f32 %v442_v57, %v441_v55 }
  0xda   :  { %v426_v60 = vadd.f32 %v425_v58, %v424_v56  ;;  %v444_v61 = vrot.slane %v443_v59, 1 }
  0xdc   :  { %428 = vst.msk [vmem:[%s884_s4] sm:$0x1] %vm427_vm2, %v426_v60  ;;  %v445_v62 = vadd.f32 %v444_v61, %v443_v59 }
  0xde   :  { %446 = vst.msk [vmem:[%s885_s5] sm:$0x1] %vm427_vm2, %v445_v62 }

// kernel: discriminator_forward.10
= control target key start
LH: loop header
LB: loop body
LE: loop exit
PB: predicated region body
PF: predicated region fallthrough
CT: control target
= control target key end

     0   :  { %vm54_vm4 = vcmask 125952   ;;  %s118_s0 = inlined_call_operand.vmem [shape: bf16[32,16], index: 0, kind: input, shape index: {}]   ;;  %s119_s1 = inlined_call_operand.vmem [shape: f32[1,16], index: 1, kind: input, shape index: {}]   ;;  %s120_s2 = inlined_call_operand.vmem [shape: f32[1,16], index: 2, kind: input, shape index: {}]   ;;  %s121_s3 = inlined_call_operand.vmem [shape: bf16[32,16], index: 3, kind: output, shape index: {}]  }
   0x1   :  { %v64_v0 = vld [vmem:[%s118_s0] sm:$0xff]   ;;  %v71_v5 = vld [vmem:[%s118_s0 + $0x8] sm:$0xff]  }
   0x2   :  { %v72_v1 = vld [vmem:[%s119_s1] ss:$0 sm:$0xff]  ;;  %v65_v2 = vunpack.c.l.bf16 %v64_v0  ;;  %v66_v4 = vunpack.c.h.bf16 %v64_v0  ;;  %v69_v6 = vunpack.c.l.bf16 %v71_v5  ;;  %v70_v7 = vunpack.c.h.bf16 %v71_v5 }
   0x3   :  { %v73_v3 = vld [vmem:[%s120_s2] ss:$0 sm:$0xff] }
   0x4   :  { %v26_v8 = vmul.f32 %v72_v1, %v65_v2  ;;  %v27_v9 = vmul.f32 %v72_v1, %v66_v4  ;;  %v28_v10 = vmul.f32 %v72_v1, %v69_v6  ;;  %v29_v11 = vmul.f32 %v72_v1, %v70_v7 }
   0x6   :  { %v34_v12 = vadd.f32 %v73_v3, %v26_v8  ;;  %v35_v13 = vadd.f32 %v73_v3, %v27_v9  ;;  %v36_v14 = vadd.f32 %v73_v3, %v28_v10  ;;  %v37_v15 = vadd.f32 %v73_v3, %v29_v11 }
   0x8   :  { %vm38_vm0 = vcmp.ge.f32.partialorder %v34_v12, 0.0  ;;  %v42_v16 = vmul.f32 0.2, %v34_v12  ;;  %vm39_vm1 = vcmp.ge.f32.partialorder %v35_v13, 0.0  ;;  %v43_v17 = vmul.f32 0.2, %v35_v13 }
   0x9   :  { %vm40_vm2 = vcmp.ge.f32.partialorder %v36_v14, 0.0  ;;  %v44_v18 = vmul.f32 0.2, %v36_v14  ;;  %vm41_vm3 = vcmp.ge.f32.partialorder %v37_v15, 0.0  ;;  %v45_v19 = vmul.f32 0.2, %v37_v15 }
   0xa   :  { %v46_v20 = vsel %vm38_vm0, %v34_v12, %v42_v16  ;;  %v47_v21 = vsel %vm39_vm1, %v35_v13, %v43_v17 }
   0xb   :  { %v50_v22 = vpack.c.bf16 %v46_v20, %v46_v20  ;;  %v51_v23 = vpack.c.bf16 %v47_v21, %v47_v21  ;;  %v48_v24 = vsel %vm40_vm2, %v36_v14, %v44_v18  ;;  %v49_v25 = vsel %vm41_vm3, %v37_v15, %v45_v19 }
   0xc   :  { %v52_v26 = vpack.c.bf16 %v48_v24, %v48_v24  ;;  %v53_v27 = vpack.c.bf16 %v49_v25, %v49_v25 }
   0xd   :  { %55 = vst.msk [vmem:[%s121_s3] sm:$0xf] %vm54_vm4, %v50_v22 }
   0xe   :  { %56 = vst.msk [vmem:[%s121_s3 + $0x4] sm:$0xf] %vm54_vm4, %v51_v23 }
   0xf   :  { %57 = vst.msk [vmem:[%s121_s3 + $0x8] sm:$0xf] %vm54_vm4, %v52_v26 }
  0x10   :  { %58 = vst.msk [vmem:[%s121_s3 + $0xc] sm:$0xf] %vm54_vm4, %v53_v27 }

// kernel: discriminator_forward.11
= control target key start
LH: loop header
LB: loop body
LE: loop exit
PB: predicated region body
PF: predicated region fallthrough
CT: control target
= control target key end

     0   :  { %vm177_vm0 = vcmask 1024   ;;  %s373_s1 = inlined_call_operand.vmem [shape: bf16[256,1], index: 1, kind: input, shape index: {}]   ;;  %s374_s0 = inlined_call_operand.vmem [shape: bf16[2,256], index: 0, kind: input, shape index: {}]   ;;  %s375_s2 = inlined_call_operand.<no memory space> [shape: f32[1,1], index: 2, kind: input, shape index: {}]   ;;  %s376_s3 = inlined_call_operand.vmem [shape: f32[2,1], index: 3, kind: output, shape index: {}]  }
   0x1   :  { %v280_v0 = vld [vmem:[%s373_s1 + $0x38] sm:$0xff]  ;;  %v279_v2 = vld [vmem:[%s373_s1 + $0x30] sm:$0xff]  ;;  %v16_v4 = vld [vmem:[%s374_s0] sm:$0x3]  ;;  %v8_v19 = vstv %s375_s2 }
   0x2   :  { %v288_v1 = vld [vmem:[%s373_s1 + $0x78] sm:$0xff]  ;;  %151 = vmatpush.bf16.msra.mxu0 %v280_v0  ;;  %v287_v3 = vld [vmem:[%s373_s1 + $0x70] sm:$0xff]  ;;  %v278_v5 = vld [vmem:[%s373_s1 + $0x28] sm:$0xff]  ;;  %50 = vst [vmem:[#allocation1] ss:$9 sm:$0xff] %v16_v4 }
   0x3   :  { %164 = vmatpush.bf16.msra.mxu1 %v288_v1  ;;  %v286_v6 = vld [vmem:[%s373_s1 + $0x68] sm:$0xff]  ;;  %v277_v7 = vld [vmem:[%s373_s1 + $0x20] sm:$0xff]  ;;  %v276_v9 = vld [vmem:[%s373_s1 + $0x18] sm:$0xff]  ;;  %9 = vst [vmem:[#allocation3] sm:$0x1] %v8_v19 }
   0x4   :  { %v285_v8 = vld [vmem:[%s373_s1 + $0x60] sm:$0xff]  ;;  %v284_v10 = vld [vmem:[%s373_s1 + $0x58] sm:$0xff]  ;;  %v275_v11 = vld [vmem:[%s373_s1 + $0x10] sm:$0xff] }
   0x5   :  { %v283_v12 = vld [vmem:[%s373_s1 + $0x50] sm:$0xff]  ;;  %v274_v13 = vld [vmem:[%s373_s1 + $0x8] sm:$0xff]  ;;  %v273_v15 = vld [vmem:[%s373_s1] sm:$0xff] }
   0x6   :  { %152 = vmatpush.bf16.msra.mxu0 %v279_v2  ;;  %v282_v14 = vld [vmem:[%s373_s1 + $0x48] sm:$0xff]  ;;  %v281_v16 = vld [vmem:[%s373_s1 + $0x40] sm:$0xff] }
   0x7   :  { %165 = vmatpush.bf16.msra.mxu1 %v287_v3 }
   0x9   :  { %v51_v17 = vld [vmem:[#allocation1] sm:$0xff]  ;;  %v52_v18 = vld [vmem:[#allocation1 + $0x9] sm:$0xff] }
   0xa   :  { %153 = vmatpush.bf16.msra.mxu0 %v278_v5  ;;  %v289_v23 = vld [vmem:[#allocation3] ss:$0 sm:$0xff] }
   0xb   :  { %166 = vmatpush.bf16.msra.mxu1 %v286_v6 }
   0xe   :  { %154 = vmatpush.bf16.msra.mxu0 %v277_v7 }
   0xf   :  { %167 = vmatpush.bf16.msra.mxu1 %v285_v8 }
  0x12   :  { %155 = vmatpush.bf16.msra.mxu0 %v276_v9 }
  0x13   :  { %168 = vmatpush.bf16.msra.mxu1 %v284_v10 }
  0x16   :  { %156 = vmatpush.bf16.msra.mxu0 %v275_v11 }
  0x17   :  { %169 = vmatpush.bf16.msra.mxu1 %v283_v12 }
  0x1a   :  { %157 = vmatpush.bf16.msra.mxu0 %v274_v13 }
  0x1b   :  { %170 = vmatpush.bf16.msra.mxu1 %v282_v14 }
  0x1e   :  { %158 = vmatpush.bf16.msra.mxu0 %v273_v15 }
  0x1f   :  { %171 = vmatpush.bf16.msra.mxu1 %v281_v16 }
  0x21   :  { %159 = vmatmul.bf16.vlgmr.msra.gmra.mxu0 %v51_v17 }
  0x22   :  { %172 = vmatmul.bf16.vlgmr.msra.gmra.mxu1 %v52_v18 }
  0x9e   :  { %v160_v20 = vpop.f32.mrf.mxu0 }
  0x9f   :  { %v173_v21 = vpop.f32.mrf.mxu1 }
  0xa0   :  { %v174_v22 = vadd.f32 %v173_v21, %v160_v20 }
  0xa2   :  { %178 = vst.msk [vmem:[#allocation2] sm:$0x3] %vm177_vm0, %v174_v22 }
  0xa6   :  { %v162_v24 = vpop.f32.mrf.mxu0 }
  0xa7   :  { %v175_v25 = vpop.f32.mrf.mxu1 }
  0xa9   :  { %v179_v26 = vld [vmem:[#allocation2] sm:$0x3] }
  0xaa   :  { %v184_v27 = vadd.f32 %v289_v23, %v179_v26 }
  0xac   :  { %v185_v28 = vsub.f32 0.0, %v184_v27 }
  0xae   :  { %v186_v29 = vmul.f32 1.442695, %v185_v28 }
  0xb0   :  { %290 = vpow2.f32 %v186_v29 }
  0xb6   :  { %v291_v30 = vpop.eup %290 }
  0xb7   :  { %v188_v31 = vadd.f32 1.0, %v291_v30 }
  0xb9   :  { %292 = vrcp.f32 %v188_v31  ;;  %v200_v35 = vand.u32 2147483648, %v188_v31  ;;  %v198_v37 = vand.u32 2147483647, %v188_v31  ;;  %vm194_vm2 = vweird.f32 %v188_v31 }
  0xbb   :  { %v201_v39 = vor.u32 1.1754944e-38, %v200_v35  ;;  %vm199_vm4 = vcmp.eq.f32.partialorder %v198_v37, 8.507059e+37 }
  0xbf   :  { %v293_v32 = vpop.eup %292 }
  0xc0   :  { %v190_v33 = vmul.f32 %v293_v32, %v188_v31  ;;  %vm195_vm1 = vweird.f32 %v293_v32 }
  0xc1   :  { %vm196_vm3 = vmor %vm194_vm2, %vm195_vm1 }
  0xc2   :  { %v191_v34 = vsub.f32 1.0, %v190_v33 }
  0xc4   :  { %v192_v36 = vmul.f32 %v293_v32, %v191_v34 }
  0xc6   :  { %v193_v38 = vadd.f32 %v293_v32, %v192_v36 }
  0xc8   :  { %v197_v40 = vsel %vm196_vm3, %v293_v32, %v193_v38 }
  0xc9   :  { %v202_v41 = vsel %vm199_vm4, %v201_v39, %v197_v40 }
  0xca   :  { %204 = vst.msk [vmem:[%s376_s3] sm:$0x3] %vm177_vm0, %v202_v41 }

</bundles_post_ra>
